<compile_context>
chip_gen: v7x
topology: tpu7x:2x2x1
jax: 0.10.0
libtpu: 0.0.40
codegen_flags: <defaults>
</compile_context>

<pallas_src>
import jax
import jax.numpy as jnp
from jax import lax
from jax.experimental import pallas as pl
from jax.experimental.pallas import tpu as pltpu


def conv_down_forward(x, weight, *, stride=2, padding=1, eps=1e-5,
                      negative_slope=0.2, compute_dtype=jnp.bfloat16,
                      row_tile=None):
    """x: (N, C_in, H, W) f32 NCHW, weight: (C_out, C_in, 4, 4) OIHW.

    Returns f32 (N, C_out, H_out, W_out) = LeakyReLU(InstanceNorm(Conv2d(x))).
    """
    N, C_in, H, W = x.shape
    C_out, C_in_w, K, K2 = weight.shape
    assert C_in_w == C_in and K == 4 and K2 == 4, "kernel must be 4x4"
    assert stride == 2, "only stride=2 supported (space-to-depth decomposition)"
    Hp, Wp = H + 2 * padding, W + 2 * padding
    assert Hp % 2 == 0 and Wp % 2 == 0, "padded spatial dims must be even"

    H2, W2 = Hp // 2, Wp // 2
    H_out, W_out = H2 - 1, W2 - 1
    C4 = C_in * 4
    P = H_out * W_out
    inv_P = 1.0 / float(P)
    if compute_dtype is None:
        compute_dtype = x.dtype

    # --- space-to-depth of the padded input (pure pad/reshape/transpose,
    # ~1x the input bytes; replaces the 16-tap strided-gather im2col). ----
    xp = jnp.pad(x, ((0, 0), (0, 0), (padding, padding), (padding, padding)))
    xs = xp.reshape(N, C_in, H2, 2, W2, 2).transpose(0, 1, 3, 5, 2, 4)
    xs = xs.reshape(N, C4, H2, W2).astype(compute_dtype)
    xa = xs[:, :, :H_out, :]   # row-tap i=0 (rows oh)
    xb = xs[:, :, 1:, :]       # row-tap i=1 (rows oh+1): the +1-row halo

    # weight -> 4 tap matrices (i, j), each (C_out, C4), matching the
    # (c, sh, sw) channel order of the space-to-depth input.
    w6 = weight.reshape(C_out, C_in, 2, 2, 2, 2)      # (o, c, i, sh, j, sw)
    w4 = w6.transpose(2, 4, 0, 1, 3, 5).reshape(4, C_out, C4)
    w4 = w4.astype(compute_dtype)

    # --- row-tile selection: multiple of 8 (sublane tiling) dividing H_out,
    # sized so a tile is a few thousand lane-rows. -------------------------
    if row_tile is not None:
        TR = row_tile
    else:
        divisors = [t for t in range(8, H_out + 1, 8) if H_out % t == 0]
        fitting = [t for t in divisors if t * W2 <= 8192]
        if fitting:
            TR = max(fitting)
        elif divisors:
            TR = min(divisors)
        else:
            TR = H_out
    assert H_out % TR == 0, "row tile must divide H_out"
    assert TR % 8 == 0 or TR == H_out
    R = H_out // TR

    # --- VMEM budget (double-buffered blocks), capped well below v7x's
    # 64 MiB physical / 32 MiB scoped VMEM (and v5e's 16 MiB default). -----
    cd_bytes = jnp.dtype(compute_dtype).itemsize
    conv_step_bytes = (2 * 2 * C4 * TR * W2 * cd_bytes      # xa/xb blocks x2
                       + 2 * C_out * TR * W_out * 4          # y block x2
                       + 2 * C_out * 2 * 4                   # stats
                       + 4 * C_out * C4 * cd_bytes)          # resident weight
    norm_step_bytes = 4 * C_out * TR * W_out * 4 + 2 * C_out * 2 * 4
    vmem_limit = int(min(32 * 1024 * 1024,
                         max(4 * 1024 * 1024,
                             6 * max(conv_step_bytes, norm_step_bytes))))

    # ------------------------------ call 1 --------------------------------
    # Conv (as 4 tap matmuls on the MXU, f32 accumulation) + per-channel
    # sum / sum-of-squares accumulated over the "arbitrary" row-block axis.
    def conv_stats_kernel(w_ref, xa_ref, xb_ref, y_ref, stats_ref):
        # w_ref:     (4, C_out, C4)        resident conv taps (i, j)
        # xa_ref:    (1, C4, TR, W2)       space-to-depth rows oh
        # xb_ref:    (1, C4, TR, W2)       space-to-depth rows oh+1
        # y_ref:     (1, C_out, TR, W_out) pre-norm conv output tile
        # stats_ref: (1, C_out, 1, 2)      [sum, sum_sq], resident across r
        @pl.when(pl.program_id(1) == 0)
        def _init():
            stats_ref[...] = jnp.zeros_like(stats_ref)

        w00 = w_ref[0]
        w01 = w_ref[1]
        w10 = w_ref[2]
        w11 = w_ref[3]

        s1 = jnp.zeros((C_out, 1), jnp.float32)
        s2 = jnp.zeros((C_out, 1), jnp.float32)
        for rr in range(TR):                       # static unroll (TR small)
            xar = xa_ref[0, :, rr, :]              # (C4, W2)
            xbr = xb_ref[0, :, rr, :]              # (C4, W2)
            # column tap j = 0
            y0 = jnp.dot(w00, xar, preferred_element_type=jnp.float32)
            y0 = y0 + jnp.dot(w10, xbr, preferred_element_type=jnp.float32)
            # column tap j = 1: matmul at padded width, then shift the result
            # one column left (roll commutes with the matmul; the wraparound
            # only pollutes the padded column W2-1, dropped below).
            y1 = jnp.dot(w01, xar, preferred_element_type=jnp.float32)
            y1 = y1 + jnp.dot(w11, xbr, preferred_element_type=jnp.float32)
            yr = y0 + pltpu.roll(y1, shift=W2 - 1, axis=1)
            yv = yr[:, :W_out]                     # drop padded column
            y_ref[0, :, rr, :] = yv
            s1 = s1 + jnp.sum(yv, axis=1, keepdims=True)
            s2 = s2 + jnp.sum(yv * yv, axis=1, keepdims=True)

        stats_ref[0, :, 0, :] += jnp.concatenate([s1, s2], axis=1)

    flops = 2 * N * C_out * (C_in * 16) * P
    conv_bytes = ((xa.size + xb.size + w4.size) * cd_bytes
                  + (N * C_out * P + N * C_out * 2) * 4)
    y_pre, stats = pl.pallas_call(
        conv_stats_kernel,
        out_shape=(
            jax.ShapeDtypeStruct((N, C_out, H_out, W_out), jnp.float32),
            jax.ShapeDtypeStruct((N, C_out, 1, 2), jnp.float32),
        ),
        grid_spec=pltpu.PrefetchScalarGridSpec(
            num_scalar_prefetch=0,
            grid=(N, R),
            in_specs=[
                # constant index_map -> tiny weight stays VMEM-resident
                pl.BlockSpec((4, C_out, C4), lambda n, r: (0, 0, 0)),
                pl.BlockSpec((1, C4, TR, W2), lambda n, r: (n, 0, r, 0)),
                pl.BlockSpec((1, C4, TR, W2), lambda n, r: (n, 0, r, 0)),
            ],
            out_specs=(
                pl.BlockSpec((1, C_out, TR, W_out), lambda n, r: (n, 0, r, 0)),
                pl.BlockSpec((1, C_out, 1, 2), lambda n, r: (n, 0, 0, 0)),
            ),
        ),
        compiler_params=pltpu.CompilerParams(
            dimension_semantics=("parallel", "arbitrary"),
            vmem_limit_bytes=vmem_limit,
        ),
        cost_estimate=pl.CostEstimate(
            flops=int(flops), transcendentals=0,
            bytes_accessed=int(conv_bytes)),
    )(w4, xa, xb)

    # ------------------------------ call 2 --------------------------------
    # Fused InstanceNorm (global biased variance) + LeakyReLU in one
    # elementwise streaming pass.
    def norm_act_kernel(stats_ref, y_ref, o_ref):
        st = stats_ref[0]                          # (C_out, 1, 2)
        mean = st[:, :, 0:1] * inv_P               # (C_out, 1, 1)
        mean_sq = st[:, :, 1:2] * inv_P
        var = mean_sq - mean * mean                # biased variance, full P
        rstd = lax.rsqrt(var + eps)
        shift = -mean * rstd
        z = y_ref[0] * rstd + shift                # single fused pass
        o_ref[0] = jnp.where(z >= 0, z, negative_slope * z)

    out = pl.pallas_call(
        norm_act_kernel,
        out_shape=jax.ShapeDtypeStruct((N, C_out, H_out, W_out), jnp.float32),
        grid_spec=pltpu.PrefetchScalarGridSpec(
            num_scalar_prefetch=0,
            grid=(N, R),
            in_specs=[
                pl.BlockSpec((1, C_out, 1, 2), lambda n, r: (n, 0, 0, 0)),
                pl.BlockSpec((1, C_out, TR, W_out), lambda n, r: (n, 0, r, 0)),
            ],
            out_specs=pl.BlockSpec((1, C_out, TR, W_out),
                                   lambda n, r: (n, 0, r, 0)),
        ),
        compiler_params=pltpu.CompilerParams(
            dimension_semantics=("parallel", "parallel"),
            vmem_limit_bytes=vmem_limit,
        ),
        cost_estimate=pl.CostEstimate(
            flops=int(4 * N * C_out * P), transcendentals=int(N * C_out),
            bytes_accessed=int(2 * N * C_out * P * 4 + N * C_out * 2 * 4)),
    )(stats, y_pre)

    return out


def conv_down_reference(x, weight, *, stride=2, padding=1, eps=1e-5,
                        negative_slope=0.2, compute_dtype=None):
    """Pure-JAX reference: Conv2d(bias=False) + InstanceNorm2d + LeakyReLU."""
    xc = x if compute_dtype is None else x.astype(compute_dtype)
    wc = weight if compute_dtype is None else weight.astype(compute_dtype)
    y = lax.conv_general_dilated(
        xc, wc,
        window_strides=(stride, stride),
        padding=((padding, padding), (padding, padding)),
        dimension_numbers=("NCHW", "OIHW", "NCHW"),
        preferred_element_type=jnp.float32,
    )
    mean = jnp.mean(y, axis=(2, 3), keepdims=True)
    var = jnp.mean((y - mean) ** 2, axis=(2, 3), keepdims=True)
    yn = (y - mean) * lax.rsqrt(var + eps)
    return jnp.where(yn >= 0, yn, negative_slope * yn)


if __name__ == "__main__":
    # ConvDown(4, 128, 4, 2, padding=1, layers=1, activ=False):
    # nums = 128/64 = 2 != 8 -> nf_mult = 2 -> Conv2d(4 -> 8), IN, LeakyReLU.
    in_c, kernel, stride, padding = 4, 4, 2, 1
    C_out = 2 * in_c
    N, H, W = 2, 16, 16

    key = jax.random.PRNGKey(0)
    kx, kw = jax.random.split(key)
    x = jax.random.normal(kx, (N, in_c, H, W), dtype=jnp.float32)
    fan_in = in_c * kernel * kernel
    weight = jax.random.normal(kw, (C_out, in_c, kernel, kernel),
                               dtype=jnp.float32) * (1.0 / (fan_in ** 0.5))

    fwd = jax.jit(lambda a, b: conv_down_forward(a, b, padding=padding))
    out = jax.block_until_ready(fwd(x, weight))

    # Reference with the same bf16 operand rounding as the kernel path.
    ref = jax.block_until_ready(
        conv_down_reference(x, weight, stride=stride, padding=padding,
                            compute_dtype=jnp.bfloat16))

    assert out.shape == (N, C_out, H // 2, W // 2), out.shape
    err = float(jnp.max(jnp.abs(out - ref)))
    assert err < 2e-3, err
    print("KERNEL_OK")
</pallas_src>

<mosaic_0001>
module attributes {stable_mosaic.version = 11 : i64} {
  func.func @norm_act_kernel(%arg0: i32, %arg1: i32, %arg2: memref<1x8x1x2xf32, #tpu.memory_space<vmem>>, %arg3: memref<1x8x8x8xf32, #tpu.memory_space<vmem>>, %arg4: memref<1x8x8x8xf32, #tpu.memory_space<vmem>>) attributes {dimension_semantics = [#tpu.dimension_semantics<parallel>, #tpu.dimension_semantics<parallel>], iteration_bounds = array<i64: 2, 1>, scalar_prefetch = 0 : i64, scratch_operands = 0 : i64, tpu.core_type = #tpu.core_type<tc>, window_params = [{transform_indices = @transform_0, window_bounds = array<i64: 1, 8, 1, 2>}, {transform_indices = @transform_1, window_bounds = array<i64: 1, 8, 8, 8>}, {transform_indices = @transform_2, window_bounds = array<i64: 1, 8, 8, 8>}]} {
    %c0 = arith.constant 0 : index
    %c0_0 = arith.constant 0 : index
    %c0_1 = arith.constant 0 : index
    %c0_2 = arith.constant 0 : index
    %0 = vector.load %arg2[%c0, %c0_0, %c0_1, %c0_2] : memref<1x8x1x2xf32, #tpu.memory_space<vmem>>, vector<1x8x1x2xf32>
    %1 = vector.shape_cast %0 : vector<1x8x1x2xf32> to vector<8x1x2xf32>
    %2 = vector.extract_strided_slice %1 {offsets = [0, 0, 0], sizes = [8, 1, 1], strides = [1, 1, 1]} : vector<8x1x2xf32> to vector<8x1x1xf32>
    %cst = arith.constant 1.562500e-02 : f32
    %3 = vector.broadcast %cst : f32 to vector<8x1x1xf32>
    %4 = arith.mulf %2, %3 : vector<8x1x1xf32>
    %5 = vector.extract_strided_slice %1 {offsets = [0, 0, 1], sizes = [8, 1, 1], strides = [1, 1, 1]} : vector<8x1x2xf32> to vector<8x1x1xf32>
    %cst_3 = arith.constant 1.562500e-02 : f32
    %6 = vector.broadcast %cst_3 : f32 to vector<8x1x1xf32>
    %7 = arith.mulf %5, %6 : vector<8x1x1xf32>
    %8 = arith.mulf %4, %4 : vector<8x1x1xf32>
    %9 = arith.subf %7, %8 : vector<8x1x1xf32>
    %cst_4 = arith.constant 9.99999974E-6 : f32
    %10 = vector.broadcast %cst_4 : f32 to vector<8x1x1xf32>
    %11 = arith.addf %9, %10 : vector<8x1x1xf32>
    %12 = math.rsqrt %11 : vector<8x1x1xf32>
    %cst_5 = arith.constant 0.000000e+00 : f32
    %13 = vector.broadcast %cst_5 : f32 to vector<8x1x1xf32>
    %14 = arith.subf %13, %4 : vector<8x1x1xf32>
    %15 = arith.mulf %14, %12 : vector<8x1x1xf32>
    %c0_6 = arith.constant 0 : index
    %c0_7 = arith.constant 0 : index
    %c0_8 = arith.constant 0 : index
    %c0_9 = arith.constant 0 : index
    %16 = vector.load %arg3[%c0_6, %c0_7, %c0_8, %c0_9] : memref<1x8x8x8xf32, #tpu.memory_space<vmem>>, vector<1x8x8x8xf32>
    %17 = vector.shape_cast %16 : vector<1x8x8x8xf32> to vector<8x8x8xf32>
    %18 = vector.broadcast %12 : vector<8x1x1xf32> to vector<8x8x8xf32>
    %19 = arith.mulf %17, %18 : vector<8x8x8xf32>
    %20 = vector.broadcast %15 : vector<8x1x1xf32> to vector<8x8x8xf32>
    %21 = arith.addf %19, %20 : vector<8x8x8xf32>
    %cst_10 = arith.constant 0.000000e+00 : f32
    %22 = vector.broadcast %cst_10 : f32 to vector<8x8x8xf32>
    %23 = arith.cmpf oge, %21, %22 : vector<8x8x8xf32>
    %cst_11 = arith.constant 2.000000e-01 : f32
    %24 = vector.broadcast %cst_11 : f32 to vector<8x8x8xf32>
    %25 = arith.mulf %24, %21 : vector<8x8x8xf32>
    %26 = arith.select %23, %21, %25 : vector<8x8x8xi1>, vector<8x8x8xf32>
    %c0_12 = arith.constant 0 : index
    %c0_13 = arith.constant 0 : index
    %c0_14 = arith.constant 0 : index
    %c0_15 = arith.constant 0 : index
    %27 = vector.load %arg4[%c0_12, %c0_13, %c0_14, %c0_15] : memref<1x8x8x8xf32, #tpu.memory_space<vmem>>, vector<1x8x8x8xf32>
    %28 = vector.shape_cast %27 : vector<1x8x8x8xf32> to vector<8x8x8xf32>
    %29 = vector.shape_cast %26 : vector<8x8x8xf32> to vector<1x8x8x8xf32>
    tpu.vector_store %arg4[%c0_12, %c0_13, %c0_14, %c0_15], %29 {strides = array<i32>} : memref<1x8x8x8xf32, #tpu.memory_space<vmem>>, vector<1x8x8x8xf32>,
    return
  }
  func.func @transform_0(%arg0: i32, %arg1: i32) -> (i32, i32, i32, i32) {
    %c0_i32 = arith.constant 0 : i32
    %c0_i32_0 = arith.constant 0 : i32
    %c0_i32_1 = arith.constant 0 : i32
    %c0_i32_2 = arith.constant 0 : i32
    return %arg0, %c0_i32, %c0_i32_0, %c0_i32_1 : i32, i32, i32, i32
  }
  func.func @transform_1(%arg0: i32, %arg1: i32) -> (i32, i32, i32, i32) {
    %c0_i32 = arith.constant 0 : i32
    %c0_i32_0 = arith.constant 0 : i32
    %c0_i32_1 = arith.constant 0 : i32
    return %arg0, %c0_i32, %arg1, %c0_i32_0 : i32, i32, i32, i32
  }
  func.func @transform_2(%arg0: i32, %arg1: i32) -> (i32, i32, i32, i32) {
    %c0_i32 = arith.constant 0 : i32
    %c0_i32_0 = arith.constant 0 : i32
    %c0_i32_1 = arith.constant 0 : i32
    return %arg0, %c0_i32, %arg1, %c0_i32_0 : i32, i32, i32, i32
  }
}

module attributes {stable_mosaic.version = 11 : i64} {
  func.func @conv_stats_kernel(%arg0: i32, %arg1: i32, %arg2: memref<4x8x16xbf16, #tpu.memory_space<vmem>>, %arg3: memref<1x16x8x9xbf16, #tpu.memory_space<vmem>>, %arg4: memref<1x16x8x9xbf16, #tpu.memory_space<vmem>>, %arg5: memref<1x8x8x8xf32, #tpu.memory_space<vmem>>, %arg6: memref<1x8x1x2xf32, #tpu.memory_space<vmem>>) attributes {dimension_semantics = [#tpu.dimension_semantics<parallel>, #tpu.dimension_semantics<arbitrary>], iteration_bounds = array<i64: 2, 1>, scalar_prefetch = 0 : i64, scratch_operands = 0 : i64, tpu.core_type = #tpu.core_type<tc>, window_params = [{pipeline_mode = #tpu.pipeline_mode<synchronous>, transform_indices = @transform_0, window_bounds = array<i64: 4, 8, 16>}, {transform_indices = @transform_1, window_bounds = array<i64: 1, 16, 8, 9>}, {transform_indices = @transform_2, window_bounds = array<i64: 1, 16, 8, 9>}, {transform_indices = @transform_3, window_bounds = array<i64: 1, 8, 8, 8>}, {transform_indices = @transform_4, window_bounds = array<i64: 1, 8, 1, 2>}]} {
    %c0_i32 = arith.constant 0 : i32
    %0 = arith.cmpi eq, %arg1, %c0_i32 : i32
    %1 = arith.extui %0 : i1 to i32
    %c0_i32_0 = arith.constant 0 : i32
    %2 = arith.cmpi ne, %1, %c0_i32_0 : i32
    scf.if %2 {
      %cst_165 = arith.constant 0.000000e+00 : f32
      %204 = vector.broadcast %cst_165 : f32 to vector<1x8x1x2xf32>
      %c0_166 = arith.constant 0 : index
      %c0_167 = arith.constant 0 : index
      %c0_168 = arith.constant 0 : index
      %c0_169 = arith.constant 0 : index
      %205 = vector.load %arg6[%c0_166, %c0_167, %c0_168, %c0_169] : memref<1x8x1x2xf32, #tpu.memory_space<vmem>>, vector<1x8x1x2xf32>
      tpu.vector_store %arg6[%c0_166, %c0_167, %c0_168, %c0_169], %204 {strides = array<i32>} : memref<1x8x1x2xf32, #tpu.memory_space<vmem>>, vector<1x8x1x2xf32>,
    } else {
    }
    %c0 = arith.constant 0 : index
    %c0_1 = arith.constant 0 : index
    %c0_2 = arith.constant 0 : index
    %3 = vector.load %arg2[%c0, %c0_1, %c0_2] : memref<4x8x16xbf16, #tpu.memory_space<vmem>>, vector<1x8x16xbf16>
    %4 = vector.shape_cast %3 : vector<1x8x16xbf16> to vector<8x16xbf16>
    %c1 = arith.constant 1 : index
    %c0_3 = arith.constant 0 : index
    %c0_4 = arith.constant 0 : index
    %5 = vector.load %arg2[%c1, %c0_3, %c0_4] : memref<4x8x16xbf16, #tpu.memory_space<vmem>>, vector<1x8x16xbf16>
    %6 = vector.shape_cast %5 : vector<1x8x16xbf16> to vector<8x16xbf16>
    %c2 = arith.constant 2 : index
    %c0_5 = arith.constant 0 : index
    %c0_6 = arith.constant 0 : index
    %7 = vector.load %arg2[%c2, %c0_5, %c0_6] : memref<4x8x16xbf16, #tpu.memory_space<vmem>>, vector<1x8x16xbf16>
    %8 = vector.shape_cast %7 : vector<1x8x16xbf16> to vector<8x16xbf16>
    %c3 = arith.constant 3 : index
    %c0_7 = arith.constant 0 : index
    %c0_8 = arith.constant 0 : index
    %9 = vector.load %arg2[%c3, %c0_7, %c0_8] : memref<4x8x16xbf16, #tpu.memory_space<vmem>>, vector<1x8x16xbf16>
    %10 = vector.shape_cast %9 : vector<1x8x16xbf16> to vector<8x16xbf16>
    %cst = arith.constant 0.000000e+00 : f32
    %11 = vector.broadcast %cst : f32 to vector<8x1xf32>
    %cst_9 = arith.constant 0.000000e+00 : f32
    %12 = vector.broadcast %cst_9 : f32 to vector<8x1xf32>
    %c0_10 = arith.constant 0 : index
    %c0_11 = arith.constant 0 : index
    %c0_12 = arith.constant 0 : index
    %c0_13 = arith.constant 0 : index
    %13 = vector.load %arg3[%c0_10, %c0_11, %c0_12, %c0_13] : memref<1x16x8x9xbf16, #tpu.memory_space<vmem>>, vector<1x16x1x9xbf16>
    %14 = vector.shape_cast %13 : vector<1x16x1x9xbf16> to vector<16x9xbf16>
    %c0_14 = arith.constant 0 : index
    %c0_15 = arith.constant 0 : index
    %c0_16 = arith.constant 0 : index
    %c0_17 = arith.constant 0 : index
    %15 = vector.load %arg4[%c0_14, %c0_15, %c0_16, %c0_17] : memref<1x16x8x9xbf16, #tpu.memory_space<vmem>>, vector<1x16x1x9xbf16>
    %16 = vector.shape_cast %15 : vector<1x16x1x9xbf16> to vector<16x9xbf16>
    %cst_18 = arith.constant dense<0.000000e+00> : vector<8x9xf32>
    %17 = tpu.matmul %4, %14, %cst_18 {dimension_numbers = #tpu.dot_dimension_numbers<[1], [0], [0], [1], [0, 0, 1, 1], [], []>} : vector<8x16xbf16>, vector<16x9xbf16>, vector<8x9xf32> -> vector<8x9xf32>
    %cst_19 = arith.constant dense<0.000000e+00> : vector<8x9xf32>
    %18 = tpu.matmul %8, %16, %cst_19 {dimension_numbers = #tpu.dot_dimension_numbers<[1], [0], [0], [1], [0, 0, 1, 1], [], []>} : vector<8x16xbf16>, vector<16x9xbf16>, vector<8x9xf32> -> vector<8x9xf32>
    %19 = arith.addf %17, %18 : vector<8x9xf32>
    %cst_20 = arith.constant dense<0.000000e+00> : vector<8x9xf32>
    %20 = tpu.matmul %6, %14, %cst_20 {dimension_numbers = #tpu.dot_dimension_numbers<[1], [0], [0], [1], [0, 0, 1, 1], [], []>} : vector<8x16xbf16>, vector<16x9xbf16>, vector<8x9xf32> -> vector<8x9xf32>
    %cst_21 = arith.constant dense<0.000000e+00> : vector<8x9xf32>
    %21 = tpu.matmul %10, %16, %cst_21 {dimension_numbers = #tpu.dot_dimension_numbers<[1], [0], [0], [1], [0, 0, 1, 1], [], []>} : vector<8x16xbf16>, vector<16x9xbf16>, vector<8x9xf32> -> vector<8x9xf32>
    %22 = arith.addf %20, %21 : vector<8x9xf32>
    %c8_i32 = arith.constant 8 : i32
    %23 = tpu.dynamic_rotate %22 by %c8_i32 dim 1 : vector<8x9xf32>, i32 -> vector<8x9xf32>
    %24 = arith.addf %19, %23 : vector<8x9xf32>
    %25 = vector.extract_strided_slice %24 {offsets = [0, 0], sizes = [8, 8], strides = [1, 1]} : vector<8x9xf32> to vector<8x8xf32>
    %c0_22 = arith.constant 0 : index
    %c0_23 = arith.constant 0 : index
    %c0_24 = arith.constant 0 : index
    %c0_25 = arith.constant 0 : index
    %26 = vector.load %arg5[%c0_22, %c0_23, %c0_24, %c0_25] : memref<1x8x8x8xf32, #tpu.memory_space<vmem>>, vector<1x8x1x8xf32>
    %27 = vector.shape_cast %26 : vector<1x8x1x8xf32> to vector<8x8xf32>
    %28 = vector.shape_cast %25 : vector<8x8xf32> to vector<1x8x1x8xf32>
    tpu.vector_store %arg5[%c0_22, %c0_23, %c0_24, %c0_25], %28 {strides = array<i32>} : memref<1x8x8x8xf32, #tpu.memory_space<vmem>>, vector<1x8x1x8xf32>,
    %cst_26 = arith.constant dense<0.000000e+00> : vector<8xf32>
    %29 = vector.multi_reduction <add>, %25, %cst_26 [1] : vector<8x8xf32> to vector<8xf32>
    %30 = vector.shape_cast %29 : vector<8xf32> to vector<8x1xf32>
    %31 = arith.addf %11, %30 : vector<8x1xf32>
    %32 = arith.mulf %25, %25 : vector<8x8xf32>
    %cst_27 = arith.constant dense<0.000000e+00> : vector<8xf32>
    %33 = vector.multi_reduction <add>, %32, %cst_27 [1] : vector<8x8xf32> to vector<8xf32>
    %34 = vector.shape_cast %33 : vector<8xf32> to vector<8x1xf32>
    %35 = arith.addf %12, %34 : vector<8x1xf32>
    %c0_28 = arith.constant 0 : index
    %c0_29 = arith.constant 0 : index
    %c1_30 = arith.constant 1 : index
    %c0_31 = arith.constant 0 : index
    %36 = vector.load %arg3[%c0_28, %c0_29, %c1_30, %c0_31] : memref<1x16x8x9xbf16, #tpu.memory_space<vmem>>, vector<1x16x1x9xbf16>
    %37 = vector.shape_cast %36 : vector<1x16x1x9xbf16> to vector<16x9xbf16>
    %c0_32 = arith.constant 0 : index
    %c0_33 = arith.constant 0 : index
    %c1_34 = arith.constant 1 : index
    %c0_35 = arith.constant 0 : index
    %38 = vector.load %arg4[%c0_32, %c0_33, %c1_34, %c0_35] : memref<1x16x8x9xbf16, #tpu.memory_space<vmem>>, vector<1x16x1x9xbf16>
    %39 = vector.shape_cast %38 : vector<1x16x1x9xbf16> to vector<16x9xbf16>
    %cst_36 = arith.constant dense<0.000000e+00> : vector<8x9xf32>
    %40 = tpu.matmul %4, %37, %cst_36 {dimension_numbers = #tpu.dot_dimension_numbers<[1], [0], [0], [1], [0, 0, 1, 1], [], []>} : vector<8x16xbf16>, vector<16x9xbf16>, vector<8x9xf32> -> vector<8x9xf32>
    %cst_37 = arith.constant dense<0.000000e+00> : vector<8x9xf32>
    %41 = tpu.matmul %8, %39, %cst_37 {dimension_numbers = #tpu.dot_dimension_numbers<[1], [0], [0], [1], [0, 0, 1, 1], [], []>} : vector<8x16xbf16>, vector<16x9xbf16>, vector<8x9xf32> -> vector<8x9xf32>
    %42 = arith.addf %40, %41 : vector<8x9xf32>
    %cst_38 = arith.constant dense<0.000000e+00> : vector<8x9xf32>
    %43 = tpu.matmul %6, %37, %cst_38 {dimension_numbers = #tpu.dot_dimension_numbers<[1], [0], [0], [1], [0, 0, 1, 1], [], []>} : vector<8x16xbf16>, vector<16x9xbf16>, vector<8x9xf32> -> vector<8x9xf32>
    %cst_39 = arith.constant dense<0.000000e+00> : vector<8x9xf32>
    %44 = tpu.matmul %10, %39, %cst_39 {dimension_numbers = #tpu.dot_dimension_numbers<[1], [0], [0], [1], [0, 0, 1, 1], [], []>} : vector<8x16xbf16>, vector<16x9xbf16>, vector<8x9xf32> -> vector<8x9xf32>
    %45 = arith.addf %43, %44 : vector<8x9xf32>
    %c8_i32_40 = arith.constant 8 : i32
    %46 = tpu.dynamic_rotate %45 by %c8_i32_40 dim 1 : vector<8x9xf32>, i32 -> vector<8x9xf32>
    %47 = arith.addf %42, %46 : vector<8x9xf32>
    %48 = vector.extract_strided_slice %47 {offsets = [0, 0], sizes = [8, 8], strides = [1, 1]} : vector<8x9xf32> to vector<8x8xf32>
    %c0_41 = arith.constant 0 : index
    %c0_42 = arith.constant 0 : index
    %c1_43 = arith.constant 1 : index
    %c0_44 = arith.constant 0 : index
    %49 = vector.load %arg5[%c0_41, %c0_42, %c1_43, %c0_44] : memref<1x8x8x8xf32, #tpu.memory_space<vmem>>, vector<1x8x1x8xf32>
    %50 = vector.shape_cast %49 : vector<1x8x1x8xf32> to vector<8x8xf32>
    %51 = vector.shape_cast %48 : vector<8x8xf32> to vector<1x8x1x8xf32>
    tpu.vector_store %arg5[%c0_41, %c0_42, %c1_43, %c0_44], %51 {strides = array<i32>} : memref<1x8x8x8xf32, #tpu.memory_space<vmem>>, vector<1x8x1x8xf32>,
    %cst_45 = arith.constant dense<0.000000e+00> : vector<8xf32>
    %52 = vector.multi_reduction <add>, %48, %cst_45 [1] : vector<8x8xf32> to vector<8xf32>
    %53 = vector.shape_cast %52 : vector<8xf32> to vector<8x1xf32>
    %54 = arith.addf %31, %53 : vector<8x1xf32>
    %55 = arith.mulf %48, %48 : vector<8x8xf32>
    %cst_46 = arith.constant dense<0.000000e+00> : vector<8xf32>
    %56 = vector.multi_reduction <add>, %55, %cst_46 [1] : vector<8x8xf32> to vector<8xf32>
    %57 = vector.shape_cast %56 : vector<8xf32> to vector<8x1xf32>
    %58 = arith.addf %35, %57 : vector<8x1xf32>
    %c0_47 = arith.constant 0 : index
    %c0_48 = arith.constant 0 : index
    %c2_49 = arith.constant 2 : index
    %c0_50 = arith.constant 0 : index
    %59 = vector.load %arg3[%c0_47, %c0_48, %c2_49, %c0_50] : memref<1x16x8x9xbf16, #tpu.memory_space<vmem>>, vector<1x16x1x9xbf16>
    %60 = vector.shape_cast %59 : vector<1x16x1x9xbf16> to vector<16x9xbf16>
    %c0_51 = arith.constant 0 : index
    %c0_52 = arith.constant 0 : index
    %c2_53 = arith.constant 2 : index
    %c0_54 = arith.constant 0 : index
    %61 = vector.load %arg4[%c0_51, %c0_52, %c2_53, %c0_54] : memref<1x16x8x9xbf16, #tpu.memory_space<vmem>>, vector<1x16x1x9xbf16>
    %62 = vector.shape_cast %61 : vector<1x16x1x9xbf16> to vector<16x9xbf16>
    %cst_55 = arith.constant dense<0.000000e+00> : vector<8x9xf32>
    %63 = tpu.matmul %4, %60, %cst_55 {dimension_numbers = #tpu.dot_dimension_numbers<[1], [0], [0], [1], [0, 0, 1, 1], [], []>} : vector<8x16xbf16>, vector<16x9xbf16>, vector<8x9xf32> -> vector<8x9xf32>
    %cst_56 = arith.constant dense<0.000000e+00> : vector<8x9xf32>
    %64 = tpu.matmul %8, %62, %cst_56 {dimension_numbers = #tpu.dot_dimension_numbers<[1], [0], [0], [1], [0, 0, 1, 1], [], []>} : vector<8x16xbf16>, vector<16x9xbf16>, vector<8x9xf32> -> vector<8x9xf32>
    %65 = arith.addf %63, %64 : vector<8x9xf32>
    %cst_57 = arith.constant dense<0.000000e+00> : vector<8x9xf32>
    %66 = tpu.matmul %6, %60, %cst_57 {dimension_numbers = #tpu.dot_dimension_numbers<[1], [0], [0], [1], [0, 0, 1, 1], [], []>} : vector<8x16xbf16>, vector<16x9xbf16>, vector<8x9xf32> -> vector<8x9xf32>
    %cst_58 = arith.constant dense<0.000000e+00> : vector<8x9xf32>
    %67 = tpu.matmul %10, %62, %cst_58 {dimension_numbers = #tpu.dot_dimension_numbers<[1], [0], [0], [1], [0, 0, 1, 1], [], []>} : vector<8x16xbf16>, vector<16x9xbf16>, vector<8x9xf32> -> vector<8x9xf32>
    %68 = arith.addf %66, %67 : vector<8x9xf32>
    %c8_i32_59 = arith.constant 8 : i32
    %69 = tpu.dynamic_rotate %68 by %c8_i32_59 dim 1 : vector<8x9xf32>, i32 -> vector<8x9xf32>
    %70 = arith.addf %65, %69 : vector<8x9xf32>
    %71 = vector.extract_strided_slice %70 {offsets = [0, 0], sizes = [8, 8], strides = [1, 1]} : vector<8x9xf32> to vector<8x8xf32>
    %c0_60 = arith.constant 0 : index
    %c0_61 = arith.constant 0 : index
    %c2_62 = arith.constant 2 : index
    %c0_63 = arith.constant 0 : index
    %72 = vector.load %arg5[%c0_60, %c0_61, %c2_62, %c0_63] : memref<1x8x8x8xf32, #tpu.memory_space<vmem>>, vector<1x8x1x8xf32>
    %73 = vector.shape_cast %72 : vector<1x8x1x8xf32> to vector<8x8xf32>
    %74 = vector.shape_cast %71 : vector<8x8xf32> to vector<1x8x1x8xf32>
    tpu.vector_store %arg5[%c0_60, %c0_61, %c2_62, %c0_63], %74 {strides = array<i32>} : memref<1x8x8x8xf32, #tpu.memory_space<vmem>>, vector<1x8x1x8xf32>,
    %cst_64 = arith.constant dense<0.000000e+00> : vector<8xf32>
    %75 = vector.multi_reduction <add>, %71, %cst_64 [1] : vector<8x8xf32> to vector<8xf32>
    %76 = vector.shape_cast %75 : vector<8xf32> to vector<8x1xf32>
    %77 = arith.addf %54, %76 : vector<8x1xf32>
    %78 = arith.mulf %71, %71 : vector<8x8xf32>
    %cst_65 = arith.constant dense<0.000000e+00> : vector<8xf32>
    %79 = vector.multi_reduction <add>, %78, %cst_65 [1] : vector<8x8xf32> to vector<8xf32>
    %80 = vector.shape_cast %79 : vector<8xf32> to vector<8x1xf32>
    %81 = arith.addf %58, %80 : vector<8x1xf32>
    %c0_66 = arith.constant 0 : index
    %c0_67 = arith.constant 0 : index
    %c3_68 = arith.constant 3 : index
    %c0_69 = arith.constant 0 : index
    %82 = vector.load %arg3[%c0_66, %c0_67, %c3_68, %c0_69] : memref<1x16x8x9xbf16, #tpu.memory_space<vmem>>, vector<1x16x1x9xbf16>
    %83 = vector.shape_cast %82 : vector<1x16x1x9xbf16> to vector<16x9xbf16>
    %c0_70 = arith.constant 0 : index
    %c0_71 = arith.constant 0 : index
    %c3_72 = arith.constant 3 : index
    %c0_73 = arith.constant 0 : index
    %84 = vector.load %arg4[%c0_70, %c0_71, %c3_72, %c0_73] : memref<1x16x8x9xbf16, #tpu.memory_space<vmem>>, vector<1x16x1x9xbf16>
    %85 = vector.shape_cast %84 : vector<1x16x1x9xbf16> to vector<16x9xbf16>
    %cst_74 = arith.constant dense<0.000000e+00> : vector<8x9xf32>
    %86 = tpu.matmul %4, %83, %cst_74 {dimension_numbers = #tpu.dot_dimension_numbers<[1], [0], [0], [1], [0, 0, 1, 1], [], []>} : vector<8x16xbf16>, vector<16x9xbf16>, vector<8x9xf32> -> vector<8x9xf32>
    %cst_75 = arith.constant dense<0.000000e+00> : vector<8x9xf32>
    %87 = tpu.matmul %8, %85, %cst_75 {dimension_numbers = #tpu.dot_dimension_numbers<[1], [0], [0], [1], [0, 0, 1, 1], [], []>} : vector<8x16xbf16>, vector<16x9xbf16>, vector<8x9xf32> -> vector<8x9xf32>
    %88 = arith.addf %86, %87 : vector<8x9xf32>
    %cst_76 = arith.constant dense<0.000000e+00> : vector<8x9xf32>
    %89 = tpu.matmul %6, %83, %cst_76 {dimension_numbers = #tpu.dot_dimension_numbers<[1], [0], [0], [1], [0, 0, 1, 1], [], []>} : vector<8x16xbf16>, vector<16x9xbf16>, vector<8x9xf32> -> vector<8x9xf32>
    %cst_77 = arith.constant dense<0.000000e+00> : vector<8x9xf32>
    %90 = tpu.matmul %10, %85, %cst_77 {dimension_numbers = #tpu.dot_dimension_numbers<[1], [0], [0], [1], [0, 0, 1, 1], [], []>} : vector<8x16xbf16>, vector<16x9xbf16>, vector<8x9xf32> -> vector<8x9xf32>
    %91 = arith.addf %89, %90 : vector<8x9xf32>
    %c8_i32_78 = arith.constant 8 : i32
    %92 = tpu.dynamic_rotate %91 by %c8_i32_78 dim 1 : vector<8x9xf32>, i32 -> vector<8x9xf32>
    %93 = arith.addf %88, %92 : vector<8x9xf32>
    %94 = vector.extract_strided_slice %93 {offsets = [0, 0], sizes = [8, 8], strides = [1, 1]} : vector<8x9xf32> to vector<8x8xf32>
    %c0_79 = arith.constant 0 : index
    %c0_80 = arith.constant 0 : index
    %c3_81 = arith.constant 3 : index
    %c0_82 = arith.constant 0 : index
    %95 = vector.load %arg5[%c0_79, %c0_80, %c3_81, %c0_82] : memref<1x8x8x8xf32, #tpu.memory_space<vmem>>, vector<1x8x1x8xf32>
    %96 = vector.shape_cast %95 : vector<1x8x1x8xf32> to vector<8x8xf32>
    %97 = vector.shape_cast %94 : vector<8x8xf32> to vector<1x8x1x8xf32>
    tpu.vector_store %arg5[%c0_79, %c0_80, %c3_81, %c0_82], %97 {strides = array<i32>} : memref<1x8x8x8xf32, #tpu.memory_space<vmem>>, vector<1x8x1x8xf32>,
    %cst_83 = arith.constant dense<0.000000e+00> : vector<8xf32>
    %98 = vector.multi_reduction <add>, %94, %cst_83 [1] : vector<8x8xf32> to vector<8xf32>
    %99 = vector.shape_cast %98 : vector<8xf32> to vector<8x1xf32>
    %100 = arith.addf %77, %99 : vector<8x1xf32>
    %101 = arith.mulf %94, %94 : vector<8x8xf32>
    %cst_84 = arith.constant dense<0.000000e+00> : vector<8xf32>
    %102 = vector.multi_reduction <add>, %101, %cst_84 [1] : vector<8x8xf32> to vector<8xf32>
    %103 = vector.shape_cast %102 : vector<8xf32> to vector<8x1xf32>
    %104 = arith.addf %81, %103 : vector<8x1xf32>
    %c0_85 = arith.constant 0 : index
    %c0_86 = arith.constant 0 : index
    %c4 = arith.constant 4 : index
    %c0_87 = arith.constant 0 : index
    %105 = vector.load %arg3[%c0_85, %c0_86, %c4, %c0_87] : memref<1x16x8x9xbf16, #tpu.memory_space<vmem>>, vector<1x16x1x9xbf16>
    %106 = vector.shape_cast %105 : vector<1x16x1x9xbf16> to vector<16x9xbf16>
    %c0_88 = arith.constant 0 : index
    %c0_89 = arith.constant 0 : index
    %c4_90 = arith.constant 4 : index
    %c0_91 = arith.constant 0 : index
    %107 = vector.load %arg4[%c0_88, %c0_89, %c4_90, %c0_91] : memref<1x16x8x9xbf16, #tpu.memory_space<vmem>>, vector<1x16x1x9xbf16>
    %108 = vector.shape_cast %107 : vector<1x16x1x9xbf16> to vector<16x9xbf16>
    %cst_92 = arith.constant dense<0.000000e+00> : vector<8x9xf32>
    %109 = tpu.matmul %4, %106, %cst_92 {dimension_numbers = #tpu.dot_dimension_numbers<[1], [0], [0], [1], [0, 0, 1, 1], [], []>} : vector<8x16xbf16>, vector<16x9xbf16>, vector<8x9xf32> -> vector<8x9xf32>
    %cst_93 = arith.constant dense<0.000000e+00> : vector<8x9xf32>
    %110 = tpu.matmul %8, %108, %cst_93 {dimension_numbers = #tpu.dot_dimension_numbers<[1], [0], [0], [1], [0, 0, 1, 1], [], []>} : vector<8x16xbf16>, vector<16x9xbf16>, vector<8x9xf32> -> vector<8x9xf32>
    %111 = arith.addf %109, %110 : vector<8x9xf32>
    %cst_94 = arith.constant dense<0.000000e+00> : vector<8x9xf32>
    %112 = tpu.matmul %6, %106, %cst_94 {dimension_numbers = #tpu.dot_dimension_numbers<[1], [0], [0], [1], [0, 0, 1, 1], [], []>} : vector<8x16xbf16>, vector<16x9xbf16>, vector<8x9xf32> -> vector<8x9xf32>
    %cst_95 = arith.constant dense<0.000000e+00> : vector<8x9xf32>
    %113 = tpu.matmul %10, %108, %cst_95 {dimension_numbers = #tpu.dot_dimension_numbers<[1], [0], [0], [1], [0, 0, 1, 1], [], []>} : vector<8x16xbf16>, vector<16x9xbf16>, vector<8x9xf32> -> vector<8x9xf32>
    %114 = arith.addf %112, %113 : vector<8x9xf32>
    %c8_i32_96 = arith.constant 8 : i32
    %115 = tpu.dynamic_rotate %114 by %c8_i32_96 dim 1 : vector<8x9xf32>, i32 -> vector<8x9xf32>
    %116 = arith.addf %111, %115 : vector<8x9xf32>
    %117 = vector.extract_strided_slice %116 {offsets = [0, 0], sizes = [8, 8], strides = [1, 1]} : vector<8x9xf32> to vector<8x8xf32>
    %c0_97 = arith.constant 0 : index
    %c0_98 = arith.constant 0 : index
    %c4_99 = arith.constant 4 : index
    %c0_100 = arith.constant 0 : index
    %118 = vector.load %arg5[%c0_97, %c0_98, %c4_99, %c0_100] : memref<1x8x8x8xf32, #tpu.memory_space<vmem>>, vector<1x8x1x8xf32>
    %119 = vector.shape_cast %118 : vector<1x8x1x8xf32> to vector<8x8xf32>
    %120 = vector.shape_cast %117 : vector<8x8xf32> to vector<1x8x1x8xf32>
    tpu.vector_store %arg5[%c0_97, %c0_98, %c4_99, %c0_100], %120 {strides = array<i32>} : memref<1x8x8x8xf32, #tpu.memory_space<vmem>>, vector<1x8x1x8xf32>,
    %cst_101 = arith.constant dense<0.000000e+00> : vector<8xf32>
    %121 = vector.multi_reduction <add>, %117, %cst_101 [1] : vector<8x8xf32> to vector<8xf32>
    %122 = vector.shape_cast %121 : vector<8xf32> to vector<8x1xf32>
    %123 = arith.addf %100, %122 : vector<8x1xf32>
    %124 = arith.mulf %117, %117 : vector<8x8xf32>
    %cst_102 = arith.constant dense<0.000000e+00> : vector<8xf32>
    %125 = vector.multi_reduction <add>, %124, %cst_102 [1] : vector<8x8xf32> to vector<8xf32>
    %126 = vector.shape_cast %125 : vector<8xf32> to vector<8x1xf32>
    %127 = arith.addf %104, %126 : vector<8x1xf32>
    %c0_103 = arith.constant 0 : index
    %c0_104 = arith.constant 0 : index
    %c5 = arith.constant 5 : index
    %c0_105 = arith.constant 0 : index
    %128 = vector.load %arg3[%c0_103, %c0_104, %c5, %c0_105] : memref<1x16x8x9xbf16, #tpu.memory_space<vmem>>, vector<1x16x1x9xbf16>
    %129 = vector.shape_cast %128 : vector<1x16x1x9xbf16> to vector<16x9xbf16>
    %c0_106 = arith.constant 0 : index
    %c0_107 = arith.constant 0 : index
    %c5_108 = arith.constant 5 : index
    %c0_109 = arith.constant 0 : index
    %130 = vector.load %arg4[%c0_106, %c0_107, %c5_108, %c0_109] : memref<1x16x8x9xbf16, #tpu.memory_space<vmem>>, vector<1x16x1x9xbf16>
    %131 = vector.shape_cast %130 : vector<1x16x1x9xbf16> to vector<16x9xbf16>
    %cst_110 = arith.constant dense<0.000000e+00> : vector<8x9xf32>
    %132 = tpu.matmul %4, %129, %cst_110 {dimension_numbers = #tpu.dot_dimension_numbers<[1], [0], [0], [1], [0, 0, 1, 1], [], []>} : vector<8x16xbf16>, vector<16x9xbf16>, vector<8x9xf32> -> vector<8x9xf32>
    %cst_111 = arith.constant dense<0.000000e+00> : vector<8x9xf32>
    %133 = tpu.matmul %8, %131, %cst_111 {dimension_numbers = #tpu.dot_dimension_numbers<[1], [0], [0], [1], [0, 0, 1, 1], [], []>} : vector<8x16xbf16>, vector<16x9xbf16>, vector<8x9xf32> -> vector<8x9xf32>
    %134 = arith.addf %132, %133 : vector<8x9xf32>
    %cst_112 = arith.constant dense<0.000000e+00> : vector<8x9xf32>
    %135 = tpu.matmul %6, %129, %cst_112 {dimension_numbers = #tpu.dot_dimension_numbers<[1], [0], [0], [1], [0, 0, 1, 1], [], []>} : vector<8x16xbf16>, vector<16x9xbf16>, vector<8x9xf32> -> vector<8x9xf32>
    %cst_113 = arith.constant dense<0.000000e+00> : vector<8x9xf32>
    %136 = tpu.matmul %10, %131, %cst_113 {dimension_numbers = #tpu.dot_dimension_numbers<[1], [0], [0], [1], [0, 0, 1, 1], [], []>} : vector<8x16xbf16>, vector<16x9xbf16>, vector<8x9xf32> -> vector<8x9xf32>
    %137 = arith.addf %135, %136 : vector<8x9xf32>
    %c8_i32_114 = arith.constant 8 : i32
    %138 = tpu.dynamic_rotate %137 by %c8_i32_114 dim 1 : vector<8x9xf32>, i32 -> vector<8x9xf32>
    %139 = arith.addf %134, %138 : vector<8x9xf32>
    %140 = vector.extract_strided_slice %139 {offsets = [0, 0], sizes = [8, 8], strides = [1, 1]} : vector<8x9xf32> to vector<8x8xf32>
    %c0_115 = arith.constant 0 : index
    %c0_116 = arith.constant 0 : index
    %c5_117 = arith.constant 5 : index
    %c0_118 = arith.constant 0 : index
    %141 = vector.load %arg5[%c0_115, %c0_116, %c5_117, %c0_118] : memref<1x8x8x8xf32, #tpu.memory_space<vmem>>, vector<1x8x1x8xf32>
    %142 = vector.shape_cast %141 : vector<1x8x1x8xf32> to vector<8x8xf32>
    %143 = vector.shape_cast %140 : vector<8x8xf32> to vector<1x8x1x8xf32>
    tpu.vector_store %arg5[%c0_115, %c0_116, %c5_117, %c0_118], %143 {strides = array<i32>} : memref<1x8x8x8xf32, #tpu.memory_space<vmem>>, vector<1x8x1x8xf32>,
    %cst_119 = arith.constant dense<0.000000e+00> : vector<8xf32>
    %144 = vector.multi_reduction <add>, %140, %cst_119 [1] : vector<8x8xf32> to vector<8xf32>
    %145 = vector.shape_cast %144 : vector<8xf32> to vector<8x1xf32>
    %146 = arith.addf %123, %145 : vector<8x1xf32>
    %147 = arith.mulf %140, %140 : vector<8x8xf32>
    %cst_120 = arith.constant dense<0.000000e+00> : vector<8xf32>
    %148 = vector.multi_reduction <add>, %147, %cst_120 [1] : vector<8x8xf32> to vector<8xf32>
    %149 = vector.shape_cast %148 : vector<8xf32> to vector<8x1xf32>
    %150 = arith.addf %127, %149 : vector<8x1xf32>
    %c0_121 = arith.constant 0 : index
    %c0_122 = arith.constant 0 : index
    %c6 = arith.constant 6 : index
    %c0_123 = arith.constant 0 : index
    %151 = vector.load %arg3[%c0_121, %c0_122, %c6, %c0_123] : memref<1x16x8x9xbf16, #tpu.memory_space<vmem>>, vector<1x16x1x9xbf16>
    %152 = vector.shape_cast %151 : vector<1x16x1x9xbf16> to vector<16x9xbf16>
    %c0_124 = arith.constant 0 : index
    %c0_125 = arith.constant 0 : index
    %c6_126 = arith.constant 6 : index
    %c0_127 = arith.constant 0 : index
    %153 = vector.load %arg4[%c0_124, %c0_125, %c6_126, %c0_127] : memref<1x16x8x9xbf16, #tpu.memory_space<vmem>>, vector<1x16x1x9xbf16>
    %154 = vector.shape_cast %153 : vector<1x16x1x9xbf16> to vector<16x9xbf16>
    %cst_128 = arith.constant dense<0.000000e+00> : vector<8x9xf32>
    %155 = tpu.matmul %4, %152, %cst_128 {dimension_numbers = #tpu.dot_dimension_numbers<[1], [0], [0], [1], [0, 0, 1, 1], [], []>} : vector<8x16xbf16>, vector<16x9xbf16>, vector<8x9xf32> -> vector<8x9xf32>
    %cst_129 = arith.constant dense<0.000000e+00> : vector<8x9xf32>
    %156 = tpu.matmul %8, %154, %cst_129 {dimension_numbers = #tpu.dot_dimension_numbers<[1], [0], [0], [1], [0, 0, 1, 1], [], []>} : vector<8x16xbf16>, vector<16x9xbf16>, vector<8x9xf32> -> vector<8x9xf32>
    %157 = arith.addf %155, %156 : vector<8x9xf32>
    %cst_130 = arith.constant dense<0.000000e+00> : vector<8x9xf32>
    %158 = tpu.matmul %6, %152, %cst_130 {dimension_numbers = #tpu.dot_dimension_numbers<[1], [0], [0], [1], [0, 0, 1, 1], [], []>} : vector<8x16xbf16>, vector<16x9xbf16>, vector<8x9xf32> -> vector<8x9xf32>
    %cst_131 = arith.constant dense<0.000000e+00> : vector<8x9xf32>
    %159 = tpu.matmul %10, %154, %cst_131 {dimension_numbers = #tpu.dot_dimension_numbers<[1], [0], [0], [1], [0, 0, 1, 1], [], []>} : vector<8x16xbf16>, vector<16x9xbf16>, vector<8x9xf32> -> vector<8x9xf32>
    %160 = arith.addf %158, %159 : vector<8x9xf32>
    %c8_i32_132 = arith.constant 8 : i32
    %161 = tpu.dynamic_rotate %160 by %c8_i32_132 dim 1 : vector<8x9xf32>, i32 -> vector<8x9xf32>
    %162 = arith.addf %157, %161 : vector<8x9xf32>
    %163 = vector.extract_strided_slice %162 {offsets = [0, 0], sizes = [8, 8], strides = [1, 1]} : vector<8x9xf32> to vector<8x8xf32>
    %c0_133 = arith.constant 0 : index
    %c0_134 = arith.constant 0 : index
    %c6_135 = arith.constant 6 : index
    %c0_136 = arith.constant 0 : index
    %164 = vector.load %arg5[%c0_133, %c0_134, %c6_135, %c0_136] : memref<1x8x8x8xf32, #tpu.memory_space<vmem>>, vector<1x8x1x8xf32>
    %165 = vector.shape_cast %164 : vector<1x8x1x8xf32> to vector<8x8xf32>
    %166 = vector.shape_cast %163 : vector<8x8xf32> to vector<1x8x1x8xf32>
    tpu.vector_store %arg5[%c0_133, %c0_134, %c6_135, %c0_136], %166 {strides = array<i32>} : memref<1x8x8x8xf32, #tpu.memory_space<vmem>>, vector<1x8x1x8xf32>,
    %cst_137 = arith.constant dense<0.000000e+00> : vector<8xf32>
    %167 = vector.multi_reduction <add>, %163, %cst_137 [1] : vector<8x8xf32> to vector<8xf32>
    %168 = vector.shape_cast %167 : vector<8xf32> to vector<8x1xf32>
    %169 = arith.addf %146, %168 : vector<8x1xf32>
    %170 = arith.mulf %163, %163 : vector<8x8xf32>
    %cst_138 = arith.constant dense<0.000000e+00> : vector<8xf32>
    %171 = vector.multi_reduction <add>, %170, %cst_138 [1] : vector<8x8xf32> to vector<8xf32>
    %172 = vector.shape_cast %171 : vector<8xf32> to vector<8x1xf32>
    %173 = arith.addf %150, %172 : vector<8x1xf32>
    %c0_139 = arith.constant 0 : index
    %c0_140 = arith.constant 0 : index
    %c7 = arith.constant 7 : index
    %c0_141 = arith.constant 0 : index
    %174 = vector.load %arg3[%c0_139, %c0_140, %c7, %c0_141] : memref<1x16x8x9xbf16, #tpu.memory_space<vmem>>, vector<1x16x1x9xbf16>
    %175 = vector.shape_cast %174 : vector<1x16x1x9xbf16> to vector<16x9xbf16>
    %c0_142 = arith.constant 0 : index
    %c0_143 = arith.constant 0 : index
    %c7_144 = arith.constant 7 : index
    %c0_145 = arith.constant 0 : index
    %176 = vector.load %arg4[%c0_142, %c0_143, %c7_144, %c0_145] : memref<1x16x8x9xbf16, #tpu.memory_space<vmem>>, vector<1x16x1x9xbf16>
    %177 = vector.shape_cast %176 : vector<1x16x1x9xbf16> to vector<16x9xbf16>
    %cst_146 = arith.constant dense<0.000000e+00> : vector<8x9xf32>
    %178 = tpu.matmul %4, %175, %cst_146 {dimension_numbers = #tpu.dot_dimension_numbers<[1], [0], [0], [1], [0, 0, 1, 1], [], []>} : vector<8x16xbf16>, vector<16x9xbf16>, vector<8x9xf32> -> vector<8x9xf32>
    %cst_147 = arith.constant dense<0.000000e+00> : vector<8x9xf32>
    %179 = tpu.matmul %8, %177, %cst_147 {dimension_numbers = #tpu.dot_dimension_numbers<[1], [0], [0], [1], [0, 0, 1, 1], [], []>} : vector<8x16xbf16>, vector<16x9xbf16>, vector<8x9xf32> -> vector<8x9xf32>
    %180 = arith.addf %178, %179 : vector<8x9xf32>
    %cst_148 = arith.constant dense<0.000000e+00> : vector<8x9xf32>
    %181 = tpu.matmul %6, %175, %cst_148 {dimension_numbers = #tpu.dot_dimension_numbers<[1], [0], [0], [1], [0, 0, 1, 1], [], []>} : vector<8x16xbf16>, vector<16x9xbf16>, vector<8x9xf32> -> vector<8x9xf32>
    %cst_149 = arith.constant dense<0.000000e+00> : vector<8x9xf32>
    %182 = tpu.matmul %10, %177, %cst_149 {dimension_numbers = #tpu.dot_dimension_numbers<[1], [0], [0], [1], [0, 0, 1, 1], [], []>} : vector<8x16xbf16>, vector<16x9xbf16>, vector<8x9xf32> -> vector<8x9xf32>
    %183 = arith.addf %181, %182 : vector<8x9xf32>
    %c8_i32_150 = arith.constant 8 : i32
    %184 = tpu.dynamic_rotate %183 by %c8_i32_150 dim 1 : vector<8x9xf32>, i32 -> vector<8x9xf32>
    %185 = arith.addf %180, %184 : vector<8x9xf32>
    %186 = vector.extract_strided_slice %185 {offsets = [0, 0], sizes = [8, 8], strides = [1, 1]} : vector<8x9xf32> to vector<8x8xf32>
    %c0_151 = arith.constant 0 : index
    %c0_152 = arith.constant 0 : index
    %c7_153 = arith.constant 7 : index
    %c0_154 = arith.constant 0 : index
    %187 = vector.load %arg5[%c0_151, %c0_152, %c7_153, %c0_154] : memref<1x8x8x8xf32, #tpu.memory_space<vmem>>, vector<1x8x1x8xf32>
    %188 = vector.shape_cast %187 : vector<1x8x1x8xf32> to vector<8x8xf32>
    %189 = vector.shape_cast %186 : vector<8x8xf32> to vector<1x8x1x8xf32>
    tpu.vector_store %arg5[%c0_151, %c0_152, %c7_153, %c0_154], %189 {strides = array<i32>} : memref<1x8x8x8xf32, #tpu.memory_space<vmem>>, vector<1x8x1x8xf32>,
    %cst_155 = arith.constant dense<0.000000e+00> : vector<8xf32>
    %190 = vector.multi_reduction <add>, %186, %cst_155 [1] : vector<8x8xf32> to vector<8xf32>
    %191 = vector.shape_cast %190 : vector<8xf32> to vector<8x1xf32>
    %192 = arith.addf %169, %191 : vector<8x1xf32>
    %193 = arith.mulf %186, %186 : vector<8x8xf32>
    %cst_156 = arith.constant dense<0.000000e+00> : vector<8xf32>
    %194 = vector.multi_reduction <add>, %193, %cst_156 [1] : vector<8x8xf32> to vector<8xf32>
    %195 = vector.shape_cast %194 : vector<8xf32> to vector<8x1xf32>
    %196 = arith.addf %173, %195 : vector<8x1xf32>
    %c0_157 = arith.constant 0 : index
    %c0_158 = arith.constant 0 : index
    %c0_159 = arith.constant 0 : index
    %c0_160 = arith.constant 0 : index
    %197 = vector.load %arg6[%c0_157, %c0_158, %c0_159, %c0_160] : memref<1x8x1x2xf32, #tpu.memory_space<vmem>>, vector<1x8x1x2xf32>
    %198 = vector.shape_cast %197 : vector<1x8x1x2xf32> to vector<8x2xf32>
    %199 = tpu.concatenate %192, %196 in 1 : vector<8x1xf32>, vector<8x1xf32> -> vector<8x2xf32>
    %200 = arith.addf %198, %199 : vector<8x2xf32>
    %c0_161 = arith.constant 0 : index
    %c0_162 = arith.constant 0 : index
    %c0_163 = arith.constant 0 : index
    %c0_164 = arith.constant 0 : index
    %201 = vector.load %arg6[%c0_161, %c0_162, %c0_163, %c0_164] : memref<1x8x1x2xf32, #tpu.memory_space<vmem>>, vector<1x8x1x2xf32>
    %202 = vector.shape_cast %201 : vector<1x8x1x2xf32> to vector<8x2xf32>
    %203 = vector.shape_cast %200 : vector<8x2xf32> to vector<1x8x1x2xf32>
    tpu.vector_store %arg6[%c0_161, %c0_162, %c0_163, %c0_164], %203 {strides = array<i32>} : memref<1x8x1x2xf32, #tpu.memory_space<vmem>>, vector<1x8x1x2xf32>,
    return
  }
  func.func @transform_0(%arg0: i32, %arg1: i32) -> (i32, i32, i32) {
    %c0_i32 = arith.constant 0 : i32
    %c0_i32_0 = arith.constant 0 : i32
    %c0_i32_1 = arith.constant 0 : i32
    %c0_i32_2 = arith.constant 0 : i32
    return %c0_i32, %c0_i32_0, %c0_i32_1 : i32, i32, i32
  }
  func.func @transform_1(%arg0: i32, %arg1: i32) -> (i32, i32, i32, i32) {
    %c0_i32 = arith.constant 0 : i32
    %c0_i32_0 = arith.constant 0 : i32
    %c0_i32_1 = arith.constant 0 : i32
    return %arg0, %c0_i32, %arg1, %c0_i32_0 : i32, i32, i32, i32
  }
  func.func @transform_2(%arg0: i32, %arg1: i32) -> (i32, i32, i32, i32) {
    %c0_i32 = arith.constant 0 : i32
    %c0_i32_0 = arith.constant 0 : i32
    %c0_i32_1 = arith.constant 0 : i32
    return %arg0, %c0_i32, %arg1, %c0_i32_0 : i32, i32, i32, i32
  }
  func.func @transform_3(%arg0: i32, %arg1: i32) -> (i32, i32, i32, i32) {
    %c0_i32 = arith.constant 0 : i32
    %c0_i32_0 = arith.constant 0 : i32
    %c0_i32_1 = arith.constant 0 : i32
    return %arg0, %c0_i32, %arg1, %c0_i32_0 : i32, i32, i32, i32
  }
  func.func @transform_4(%arg0: i32, %arg1: i32) -> (i32, i32, i32, i32) {
    %c0_i32 = arith.constant 0 : i32
    %c0_i32_0 = arith.constant 0 : i32
    %c0_i32_1 = arith.constant 0 : i32
    %c0_i32_2 = arith.constant 0 : i32
    return %arg0, %c0_i32, %c0_i32_0, %c0_i32_1 : i32, i32, i32, i32
  }
}

</mosaic_0001>

<bundles_post_ra>
// kernel: _lambda_.3
= control target key start
LH: loop header
LB: loop body
LE: loop exit
PB: predicated region body
PF: predicated region fallthrough
CT: control target
= control target key end

     0   :  { %7 = vsyncpa [#allocation3], 0  ;;  %s1030_s0 = inlined_call_operand.vmem [shape: f32[2,8,1,2], index: 0, kind: input, shape index: {}]   ;;  %s1031_s1 = inlined_call_operand.vmem [shape: f32[2,8,8,8], index: 1, kind: input, shape index: {}]   ;;  %s1032_s2 = inlined_call_operand.hbm [shape: f32[2,8,8,8], index: 2, kind: output, shape index: {}]  }
   0x1   :  { %9 = vsyncpa [#allocation3 + $0x1], 0  ;;  %s809_s9 = smov 0   ;;  %s811_s10 = smov 0  }
   0x2   :  { %s813_s11 = smov 0   ;;  %s815_s12 = smov 0  }
   0x3   :  { %s817_s13 = smov 0   ;;  %s819_s14 = smov 0  }
   0x4 LB: > { %s610_s15 = sadd.s32 4294967295, %s785_s14   ;;  %s611_s16 = sadd.s32 4294967294, %s785_s14   ;;  %s785_s14 = sphi %s819_s14, %s15_s14   ;;  %s781_s13 = sphi %s817_s13, %s1039_s13   ;;  %s777_s12 = sphi %s815_s12, %s1038_s12   ;;  %s773_s11 = sphi %s813_s11, %s1037_s11   ;;  %s769_s10 = sphi %s811_s10, %s1036_s10   ;;  %s765_s9 = sphi %s809_s9, %s1035_s9  }
   0x5   : > { %s27_s17 = sadd.s32 1, %s781_s13  ;;  %s90_s18 = sadd.s32 1, %s773_s11 }
   0x6   : > { %p29_p0 = scmp.ge.s32.totalorder %s27_s17, 2  ;;  %p100_p1 = scmp.ne.s32.totalorder %s773_s11, %s769_s10 }
   0x7   : > { %p101_p2 = scmp.eq.s32.totalorder %s610_s15, 1  ;;  %p106_p3 = scmp.ne.s32.totalorder %s769_s10, %s765_s9 }
   0x8   : > { %s1041_s17 = smov (%p29_p0, %s27_s17), 0  ;;  %p107_p5 = scmp.eq.s32.totalorder %s611_s16, 1 }
   0x9   : > { %p849_p4 = por %p101_p2, %p100_p1  ;;  %s85_s20 = ssub.s32 %s781_s13, %s1041_s17 }
   0xa   : > { %p614_p6 = scmp.ge.s32.totalorder %s785_s14, 1  ;;  %p88_p7 = scmp.eq.s32.totalorder %s85_s20, 0 }
   0xb   : > { %p856_p8 = por %p107_p5, %p106_p3  ;;  %p143_p9 = scmp.lt.s32.totalorder %s785_s14, 3 }
   0xc   : > { %s862_s22 = scalar_select %p88_p7, %s773_s11, %s90_s18  }
   0xd   : > { %p144_p10 = pnand %p614_p6, %p143_p9 }
   0xe   : > { %p172_p11 = scmp.lt.s32.totalorder (!%p144_p10), %s777_s12, 1  ;;  %s787_s28 = smov (!%p144_p10), 1   ;;  %v788_v24 = vmov (!%p144_p10), 1   ;;  %v320_v51 = vlaneseq (!%p144_p10)  ;;  %vm496_vm0 = vcmask (!%p144_p10), 64512  }
   0xf   : > { %147 = sbr.rel (%p144_p10) target bundleno = 444 (0x1bc), region = 28  ;;  %687 = vset.pattern.permute.xlu0 (!%p144_p10), %v788_v24  ;;  %688 = vset.pattern.permute.xlu1 (!%p144_p10), %v788_v24  ;;  %s789_s29 = smov (!%p144_p10), 127  }
  0x10   : > { %v321_v54 = vshrl.u32 (!%p144_p10), %v320_v51, 7  ;;  %s169_s6 = sand.u32 (!%p144_p10), 1, %s769_s10   ;;  %s625_s15 = sshll.u32 (!%p144_p10), %s777_s12, 10 }
  0x11   : > { %s615_s7 = sshll.u32 (!%p144_p10), %s169_s6, 6  ;;  %s791_s25 = smov (!%p144_p10), [#allocation2]  }
  0x12   : > { %v912_v57 = vsub.s32 (!%p144_p10), 0, %v321_v54  ;;  %s954_s8 = scalar_lea.vmem (!%p144_p10), [#allocation2], %s615_s7  ;;  %s711_s26 = sshll.u32 (!%p144_p10), %s791_s25, 4  ;;  %s712_s26 = int_to_ptr.vmem [resolvable:$false] %s711_s26 }
  0x13   : > { %s520_s16 = sshll.u32 (!%p144_p10), %s954_s8, 4  ;;  %s978_s16 = int_to_ptr.vmem [resolvable:$true] %s520_s16 }
  0x14   : > { %p714_p1 = scmp.lt.s32.totalorder (!%p144_p10), %s978_s16, %s712_s26 }
  0x16   : > { %s866_s23 = scalar_select %p172_p11, %s777_s12, 1 }
  0x17   : > { %s984_s12 = scalar_lea.sflag [#allocation3], %s169_s6 }
  0x18   : > { %s616_s24 = sshll.u32 %s866_s23, 3  ;;  %s624_s30 = sshll.u32 %s866_s23, 6 }
  0x19   : > { %s175_s27 = scalar_lea.vmem %s1030_s0, %s616_s24  ;;  %s942_s5 = scalar_lea.vmem %s1031_s1, %s624_s30 }
  0x1a   : > { %v184_v0 = vld [vmem:[%s175_s27] sm:$0x1]  ;;  %v186_v1 = vld [vmem:[%s175_s27 + $0x2] sm:$0x1]  ;;  %v185_v2 = vld [vmem:[%s175_s27 + $0x1] sm:$0x1]  ;;  %s976_s23 = scalar_lea.hbm %s1032_s2, %s625_s15 }
  0x1b   : > { %v872_v3 = vmul.f32 0.015625, %v184_v0  ;;  %v874_v4 = vmul.f32 0.015625, %v186_v1  ;;  %v876_v5 = vmul.f32 0.015625, %v185_v2  ;;  %v187_v6 = vld [vmem:[%s175_s27 + $0x3] sm:$0x1]  ;;  %s707_s24 = scalar_lea.vmem %s978_s16, 1024 }
  0x1c   : > { %v878_v7 = vmul.f32 0.015625, %v187_v6  ;;  %v188_v8 = vld [vmem:[%s175_s27 + $0x4] sm:$0x1]  ;;  %v189_v9 = vld [vmem:[%s175_s27 + $0x5] sm:$0x1]  ;;  %p708_p12 = scmp.ne.s32.totalorder %s978_s16, %s707_s24 }
  0x1d   : > { %v200_v10 = vmul.f32 %v872_v3, %v872_v3  ;;  %v202_v11 = vmul.f32 %v874_v4, %v874_v4  ;;  %v201_v12 = vmul.f32 %v876_v5, %v876_v5  ;;  %v888_v14 = vmul.f32 0.015625, %v188_v8  ;;  %v190_v16 = vld [vmem:[%s175_s27 + $0x6] sm:$0x1]  ;;  %v191_v17 = vld [vmem:[%s175_s27 + $0x7] sm:$0x1]  ;;  %s713_s27 = scalar_lea.vmem %s712_s26, 2048 }
  0x1e   : > { %v203_v13 = vmul.f32 %v878_v7, %v878_v7  ;;  %v890_v15 = vmul.f32 0.015625, %v189_v9  ;;  %v896_v20 = vmul.f32 0.015625, %v190_v16  ;;  %v898_v21 = vmul.f32 0.015625, %v191_v17  ;;  %v316_v54 = vld [vmem:[%s942_s5 + $0x20] sm:$0xff]  ;;  %p709_p13 = pnand %p708_p12, %p849_p4  ;;  %p715_p2 = scmp.lt.s32.totalorder %s713_s27, %s707_s24 }
  0x1f   : > { %216 = vrot.lane.b32.xlu0 %v200_v10, %s787_s28  ;;  %220 = vrot.lane.b32.xlu1 %v202_v11, %s787_s28  ;;  %v204_v18 = vmul.f32 %v888_v14, %v888_v14  ;;  %v790_v8 = vmov 0   ;;  %v264_v9 = vsub.f32 0.0, %v872_v3  ;;  %v268_v24 = vsub.f32 0.0, %v888_v14 }
  0x20   : > { %v205_v19 = vmul.f32 %v890_v15, %v890_v15  ;;  %v206_v22 = vmul.f32 %v896_v20, %v896_v20  ;;  %v207_v23 = vmul.f32 %v898_v21, %v898_v21  ;;  %p710_p0 = pneg %p709_p13  ;;  %p716_p3 = por %p715_p2, %p714_p1 }
  0x22   : > { %p717_p5 = pnand %p716_p3, %p710_p0 }
  0x23   : > { %218 = vrot.lane.b32.xlu0 %v201_v12, %s787_s28  ;;  %222 = vrot.lane.b32.xlu1 %v203_v13, %s787_s28  ;;  %v265_v12 = vsub.f32 0.0, %v876_v5  ;;  %v266_v13 = vsub.f32 0.0, %v874_v4 }
  0x27   : > { %224 = vrot.lane.b32.xlu0 %v204_v18, %s787_s28  ;;  %226 = vrot.lane.b32.xlu1 %v205_v19, %s787_s28 }
  0x2b   : > { %228 = vrot.lane.b32.xlu0 %v206_v22, %s787_s28  ;;  %230 = vrot.lane.b32.xlu1 %v207_v23, %s787_s28  ;;  %v267_v23 = vsub.f32 0.0, %v878_v7 }
  0x91   : > { %v217_v25 = vpop.permute.xlu0 %216  ;;  %v221_v26 = vpop.permute.xlu1 %220 }
  0x92   : > { %v240_v27 = vsub.f32 %v872_v3, %v217_v25  ;;  %v242_v28 = vsub.f32 %v874_v4, %v221_v26  ;;  %v269_v4 = vsub.f32 0.0, %v890_v15 }
  0x94   : > { %v248_v29 = vadd.f32 1e-05, %v240_v27  ;;  %v250_v30 = vadd.f32 1e-05, %v242_v28 }
  0x95   : > { %v219_v31 = vpop.permute.xlu0 %218  ;;  %v223_v32 = vpop.permute.xlu1 %222 }
  0x96   : > { %691 = vrsqrt.f32 %v248_v29  ;;  %v241_v33 = vsub.f32 %v876_v5, %v219_v31  ;;  %v243_v34 = vsub.f32 %v878_v7, %v223_v32  ;;  %v270_v29 = vsub.f32 0.0, %v896_v20 }
  0x97   : > { %693 = vrsqrt.f32 %v250_v30 }
  0x98   : > { %v249_v35 = vadd.f32 1e-05, %v241_v33  ;;  %v251_v36 = vadd.f32 1e-05, %v243_v34  ;;  %v271_v34 = vsub.f32 0.0, %v898_v21 }
  0x99   : > { %v225_v37 = vpop.permute.xlu0 %224  ;;  %v227_v38 = vpop.permute.xlu1 %226 }
  0x9a   : > { %695 = vrsqrt.f32 %v249_v35  ;;  %v244_v39 = vsub.f32 %v888_v14, %v225_v37  ;;  %v245_v40 = vsub.f32 %v890_v15, %v227_v38 }
  0x9b   : > { %697 = vrsqrt.f32 %v251_v36 }
  0x9c   : > { %v252_v41 = vadd.f32 1e-05, %v244_v39  ;;  %v253_v42 = vadd.f32 1e-05, %v245_v40 }
  0x9d   : > { %v229_v43 = vpop.permute.xlu0 %228  ;;  %v231_v44 = vpop.permute.xlu1 %230 }
  0x9e   : > { %699 = vrsqrt.f32 %v252_v41  ;;  %v246_v45 = vsub.f32 %v896_v20, %v229_v43  ;;  %v247_v46 = vsub.f32 %v898_v21, %v231_v44  ;;  %v312_v43 = vld [vmem:[%s942_s5] sm:$0xff] }
  0x9f   : > { %701 = vrsqrt.f32 %v253_v42 }
  0xa0   : > { %v692_v47 = vpop.eup %691  ;;  %v254_v48 = vadd.f32 1e-05, %v246_v45  ;;  %v255_v49 = vadd.f32 1e-05, %v247_v46  ;;  %v313_v46 = vld [vmem:[%s942_s5 + $0x8] sm:$0xff] }
  0xa1   : > { %280 = vrot.lane.b32.xlu0 %v692_v47, %s789_s29  ;;  %v694_v50 = vpop.eup %693  ;;  %v323_v60 = vrot.slane %v692_v47, %v912_v57  ;;  %v314_v47 = vld [vmem:[%s942_s5 + $0x10] sm:$0xff] }
  0xa2   : > { %703 = vrsqrt.f32 %v254_v48  ;;  %v331_v63 = vrot.slane %v694_v50, %v912_v57 }
  0xa3   : > { %705 = vrsqrt.f32 %v255_v49 }
  0xa4   : > { %v696_v52 = vpop.eup %695 }
  0xa5   : > { %284 = vrot.lane.b32.xlu0 %v694_v50, %s789_s29  ;;  %282 = vrot.lane.b32.xlu1 %v696_v52, %s789_s29  ;;  %v698_v53 = vpop.eup %697  ;;  %v327_v61 = vrot.slane %v696_v52, %v912_v57  ;;  %v315_v52 = vld [vmem:[%s942_s5 + $0x18] sm:$0xff] }
  0xa6   : > { %v335_v62 = vrot.slane %v698_v53, %v912_v57 }
  0xa8   : > { %v700_v55 = vpop.eup %699 }
  0xa9   : > { %286 = vrot.lane.b32.xlu1 %v698_v53, %s789_s29  ;;  %288 = vrot.lane.b32.xlu0 %v700_v55, %s789_s29  ;;  %v702_v56 = vpop.eup %701  ;;  %v339_v1 = vrot.slane %v700_v55, %v912_v57 }
  0xaa   : > { %v343_v0 = vrot.slane %v702_v56, %v912_v57 }
  0xac   : > { %v704_v58 = vpop.eup %703 }
  0xad   : > { %290 = vrot.lane.b32.xlu1 %v702_v56, %s789_s29  ;;  %292 = vrot.lane.b32.xlu0 %v704_v58, %s789_s29  ;;  %v706_v59 = vpop.eup %705  ;;  %v347_v6 = vrot.slane %v704_v58, %v912_v57 }
  0xae   : > { %v351_v2 = vrot.slane %v706_v59, %v912_v57 }
  0xb1   : > { %294 = vrot.lane.b32.xlu1 %v706_v59, %s789_s29  ;;  %353 = vperm.xlu0 %687, %v323_v60  }
  0xb5   : > { %357 = vperm.xlu1 %688, %v327_v61   ;;  %365 = vperm.xlu0 %687, %v335_v62   ;;  %v317_v62 = vld [vmem:[%s942_s5 + $0x28] sm:$0xff] }
  0xb9   : > { %361 = vperm.xlu1 %688, %v331_v63   ;;  %373 = vperm.xlu0 %687, %v343_v0   ;;  %v318_v0 = vld [vmem:[%s942_s5 + $0x30] sm:$0xff] }
  0xbd   : > { %369 = vperm.xlu1 %688, %v339_v1   ;;  %381 = vperm.xlu0 %687, %v351_v2  }
  0xc1   : > { %377 = vperm.xlu1 %688, %v347_v6   ;;  %690 = vset.pattern.permute.xlu0 %v790_v8 }
  0xc5   : > { %689 = vset.pattern.permute.xlu1 %v790_v8 }
 0x113   : > { %v281_v10 = vpop.permute.xlu0 %280 }
 0x114   : > { %v304_v11 = vmul.f32 %v281_v10, %v264_v9 }
 0x116   : > { %v403_v16 = vrot.slane %v304_v11, %v912_v57 }
 0x117   : > { %v283_v17 = vpop.permute.xlu1 %282  ;;  %v285_v18 = vpop.permute.xlu0 %284 }
 0x118   : > { %v305_v19 = vmul.f32 %v283_v17, %v265_v12  ;;  %v306_v22 = vmul.f32 %v285_v18, %v266_v13  ;;  %433 = vperm.xlu1 %689, %v403_v16   ;;  %v319_v16 = vld [vmem:[%s942_s5 + $0x38] sm:$0xff] }
 0x11a   : > { %v407_v25 = vrot.slane %v305_v19, %v912_v57  ;;  %v411_v3 = vrot.slane %v306_v22, %v912_v57 }
 0x11b   : > { %v287_v26 = vpop.permute.xlu1 %286  ;;  %v289_v27 = vpop.permute.xlu0 %288 }
 0x11c   : > { %v307_v5 = vmul.f32 %v287_v26, %v267_v23  ;;  %v308_v28 = vmul.f32 %v289_v27, %v268_v24  ;;  %437 = vperm.xlu0 %690, %v407_v25   ;;  %441 = vperm.xlu1 %689, %v411_v3  }
 0x11e   : > { %v415_v30 = vrot.slane %v307_v5, %v912_v57  ;;  %v419_v7 = vrot.slane %v308_v28, %v912_v57 }
 0x11f   : > { %v291_v31 = vpop.permute.xlu1 %290  ;;  %v293_v14 = vpop.permute.xlu0 %292 }
 0x120   : > { %v309_v32 = vmul.f32 %v291_v31, %v269_v4  ;;  %v310_v33 = vmul.f32 %v293_v14, %v270_v29  ;;  %445 = vperm.xlu1 %689, %v415_v30   ;;  %449 = vperm.xlu0 %690, %v419_v7  }
 0x122   : > { %v423_v35 = vrot.slane %v309_v32, %v912_v57  ;;  %v427_v36 = vrot.slane %v310_v33, %v912_v57 }
 0x123   : > { %v295_v15 = vpop.permute.xlu1 %294 }
 0x124   : > { %v311_v20 = vmul.f32 %v295_v15, %v271_v34  ;;  %453 = vperm.xlu1 %689, %v423_v35   ;;  %457 = vperm.xlu0 %690, %v427_v36  }
 0x126   : > { %v431_v37 = vrot.slane %v311_v20, %v912_v57 }
 0x128   : > { %461 = vperm.xlu1 %689, %v431_v37  }
 0x130   : > { %v354_v39 = vpop.permute.xlu0 %353 }
 0x131   : > { %v384_v45 = vmul.f32 %v354_v39, %v312_v43 }
 0x134   : > { %v358_v38 = vpop.permute.xlu1 %357  ;;  %v366_v41 = vpop.permute.xlu0 %365 }
 0x135   : > { %v385_v51 = vmul.f32 %v358_v38, %v313_v46  ;;  %v387_v61 = vmul.f32 %v366_v41, %v315_v52 }
 0x138   : > { %v362_v40 = vpop.permute.xlu1 %361  ;;  %v374_v21 = vpop.permute.xlu0 %373 }
 0x139   : > { %v386_v53 = vmul.f32 %v362_v40, %v314_v47  ;;  %v389_v13 = vmul.f32 %v374_v21, %v317_v62 }
 0x13c   : > { %v370_v42 = vpop.permute.xlu1 %369  ;;  %v382_v48 = vpop.permute.xlu0 %381 }
 0x13d   : > { %v388_v63 = vmul.f32 %v370_v42, %v316_v54  ;;  %v391_v27 = vmul.f32 %v382_v48, %v319_v16 }
 0x140   : > { %v378_v44 = vpop.permute.xlu1 %377 }
 0x141   : > { %v390_v17 = vmul.f32 %v378_v44, %v318_v0 }
 0x197   : > { %v434_v49 = vpop.permute.xlu1 %433 }
 0x198   : > { %v464_v50 = vadd.f32 %v434_v49, %v384_v45 }
 0x19a   : > { %vm472_vm1 = vcmp.ge.f32.partialorder %v464_v50, 0.0  ;;  %v480_v55 = vmul.f32 0.2, %v464_v50 }
 0x19b   : > { %v442_v56 = vpop.permute.xlu1 %441  ;;  %v438_v57 = vpop.permute.xlu0 %437 }
 0x19c   : > { %v488_v58 = vsel %vm472_vm1, %v464_v50, %v480_v55  ;;  %v466_v59 = vadd.f32 %v442_v56, %v386_v53  ;;  %v465_v60 = vadd.f32 %v438_v57, %v385_v51 }
 0x19d   : > { %497 = vst.msk [vmem:[%s954_s8] sm:$0xff] %vm496_vm0, %v488_v58 }
 0x19e   : > { %vm474_vm2 = vcmp.ge.f32.partialorder %v466_v59, 0.0  ;;  %v482_v1 = vmul.f32 0.2, %v466_v59  ;;  %vm473_vm3 = vcmp.ge.f32.partialorder %v465_v60, 0.0  ;;  %v481_v2 = vmul.f32 0.2, %v465_v60 }
 0x19f   : > { %v446_v6 = vpop.permute.xlu1 %445  ;;  %v450_v8 = vpop.permute.xlu0 %449 }
 0x1a0   : > { %v490_v9 = vsel %vm474_vm2, %v466_v59, %v482_v1  ;;  %v489_v10 = vsel %vm473_vm3, %v465_v60, %v481_v2  ;;  %v467_v11 = vadd.f32 %v446_v6, %v387_v61  ;;  %v468_v12 = vadd.f32 %v450_v8, %v388_v63 }
 0x1a1   : > { %499 = vst.msk [vmem:[%s954_s8 + $0x10] sm:$0xff] %vm496_vm0, %v490_v9  ;;  %498 = vst.msk [vmem:[%s954_s8 + $0x8] sm:$0xff] %vm496_vm0, %v489_v10 }
 0x1a2   : > { %vm475_vm4 = vcmp.ge.f32.partialorder %v467_v11, 0.0  ;;  %v483_v18 = vmul.f32 0.2, %v467_v11  ;;  %vm476_vm5 = vcmp.ge.f32.partialorder %v468_v12, 0.0  ;;  %v484_v19 = vmul.f32 0.2, %v468_v12 }
 0x1a3   : > { %v454_v22 = vpop.permute.xlu1 %453  ;;  %v458_v23 = vpop.permute.xlu0 %457 }
 0x1a4   : > { %v491_v24 = vsel %vm475_vm4, %v467_v11, %v483_v18  ;;  %v492_v25 = vsel %vm476_vm5, %v468_v12, %v484_v19  ;;  %v469_v3 = vadd.f32 %v454_v22, %v389_v13  ;;  %v470_v26 = vadd.f32 %v458_v23, %v390_v17 }
 0x1a5   : > { %500 = vst.msk [vmem:[%s954_s8 + $0x18] sm:$0xff] %vm496_vm0, %v491_v24  ;;  %501 = vst.msk [vmem:[%s954_s8 + $0x20] sm:$0xff] %vm496_vm0, %v492_v25 }
 0x1a6   : > { %vm477_vm6 = vcmp.ge.f32.partialorder %v469_v3, 0.0  ;;  %v485_v5 = vmul.f32 0.2, %v469_v3  ;;  %vm478_vm7 = vcmp.ge.f32.partialorder %v470_v26, 0.0  ;;  %v486_v28 = vmul.f32 0.2, %v470_v26 }
 0x1a7   : > { %v462_v4 = vpop.permute.xlu1 %461 }
 0x1a8   : > { %v493_v29 = vsel %vm477_vm6, %v469_v3, %v485_v5  ;;  %v494_v30 = vsel %vm478_vm7, %v470_v26, %v486_v28  ;;  %v471_v7 = vadd.f32 %v462_v4, %v391_v27 }
 0x1a9   : > { %502 = vst.msk [vmem:[%s954_s8 + $0x28] sm:$0xff] %vm496_vm0, %v493_v29  ;;  %503 = vst.msk [vmem:[%s954_s8 + $0x30] sm:$0xff] %vm496_vm0, %v494_v30 }
 0x1aa   : > { %vm479_vm8 = vcmp.ge.f32.partialorder %v471_v7, 0.0  ;;  %v487_v31 = vmul.f32 0.2, %v471_v7 }
 0x1ac   : > { %v495_v14 = vsel %vm479_vm8, %v471_v7, %v487_v31 }
 0x1ad   : > { %504 = vst.msk [vmem:[%s954_s8 + $0x38] sm:$0xff] %vm496_vm0, %v495_v14 }
 0x1ae   : > { %720 = shalt.err (!%p717_p5)
}
 0x1af   : > { %s721_s28 = scalar_lea.hbm %s976_s23, 1024  ;;  %s725_s3 = scalar_lea.hbm %s1032_s2, 2048 }
 0x1b0   : > { %p722_p6 = scmp.ne.s32.totalorder %s976_s23, %s721_s28  ;;  %p726_p10 = scmp.lt.u32.totalorder %s976_s23, %s1032_s2 }
 0x1b1   : > { %p727_p11 = scmp.lt.u32.totalorder %s725_s3, %s721_s28  ;;  %p729_p13 = scmp.lt.u32.totalorder %s721_s28, %s976_s23 }
 0x1b2   : > { %p723_p7 = pnand %p722_p6, %p849_p4 }
 0x1b3   : > { %p728_p12 = por %p727_p11, %p726_p10 }
 0x1b4   : > { %p724_p9 = pneg %p723_p7 }
 0x1b5   : > { %p730_p0 = por %p729_p13, %p728_p12 }
 0x1b7   : > { %p731_p1 = pnand %p730_p0, %p724_p9 }
 0x1b9   : > { %734 = shalt.err (!%p731_p1)
}
 0x1ba   : > { %s792_s6 = smov 128   ;;  %s793_s7 = smov 8  }
 0x1bb   : > { %626 = dma.vmem_to_hbm [thread:$0]  (%p849_p4), %s978_s16, 1024, %s976_s23, %s984_s12, %s792_s6, %s792_s6, %s793_s7  }
 0x1bc PF: > { %p632_p2 = scmp.ge.s32.totalorder %s785_s14, 2  ;;  %s535_s8 = sand.u32 1, %s765_s9  }
 0x1bd   : > { %s536_s15 = scalar_lea.sflag [#allocation3], %s535_s8 }
 0x1be   : > { %p629_p3 = pnand %p632_p2, %p856_p8 }
 0x1c0   : > { %760 = dma.done.wait (!%p629_p3), %s536_s15, 1024  }
 0x1c1   : > { %762 = vsyncadd (!%p629_p3), %s536_s15, 4294966272  ;;  %s15_s14 = sadd.s32 1, %s785_s14   ;;  %s1035_s9 = smov %s769_s10 }
 0x1c2   : > { %p12_p5 = scmp.ge.s32.totalorder %s15_s14, 4   ;;  %s1036_s10 = smov %s773_s11 }
 0x1c3   : > { %s1037_s11 = smov %s862_s22  ;;  %s1038_s12 = smov %s781_s13 }
 0x1c4   : > { %s1039_s13 = smov %s1041_s17  ;;  %14 = sbr.rel (!%p12_p5) target bundleno = 4 (0x4), region = 66 }
 0x1cb   :  { %541 = vsyncpa [#allocation3], 1 }
 0x1cc   :  { %543 = vsyncpa [#allocation3 + $0x1], 1 }

// kernel: _lambda_.2
= control target key start
LH: loop header
LB: loop body
LE: loop exit
PB: predicated region body
PF: predicated region fallthrough
CT: control target
= control target key end

     0   :  { %s5199_s15 = smov 0   ;;  %s5201_s16 = smov 0   ;;  %s6368_s0 = inlined_call_operand.vmem [shape: bf16[4,8,16], index: 0, kind: input, shape index: {}]   ;;  %s6369_s1 = inlined_call_operand.vmem [shape: bf16[2,16,8,9], index: 1, kind: input, shape index: {}]   ;;  %s6370_s2 = inlined_call_operand.vmem [shape: bf16[2,16,8,9], index: 2, kind: input, shape index: {}]   ;;  %s6371_s3 = inlined_call_operand.vmem [shape: f32[2,8,8,8], index: 3, kind: output, shape index: {0}]   ;;  %s6372_s4 = inlined_call_operand.vmem [shape: f32[2,8,1,2], index: 4, kind: output, shape index: {1}]  }
   0x1   :  { %s5203_s17 = smov 0  }
   0x2 LB: > { %s27_s18 = sadd.s32 1, %s5163_s16  ;;  %p4264_p0 = scmp.ge.s32.totalorder %s5167_s17, 1  ;;  %s5167_s17 = sphi %s5203_s17, %s15_s17   ;;  %s5163_s16 = sphi %s5201_s16, %s6374_s16   ;;  %s5159_s15 = sphi %s5199_s15, %s6373_s15  }
   0x3   : > { %p29_p1 = scmp.ge.s32.totalorder %s27_s18, 2  ;;  %p199_p2 = scmp.lt.s32.totalorder %s5167_s17, 3 }
   0x5   : > { %s6376_s18 = smov (%p29_p1, %s27_s18), 0  ;;  %p200_p3 = pnand %p4264_p0, %p199_p2 }
   0x6   : > { %p243_p4 = scmp.lt.s32.totalorder (!%p200_p3), %s5159_s15, 1  ;;  %v5169_v0 = vmov (!%p200_p3), 0.0   ;;  %vm5170_vm0 = vmmov (!%p200_p3), 0   ;;  %vm389_vm1 = vcmask (!%p200_p3), 1041409   ;;  %vm392_vm2 = vcmask (!%p200_p3), 1042434   ;;  %s5171_s10 = smov (!%p200_p3), 9  }
   0x7   : > { %203 = sbr.rel (%p200_p3) target bundleno = 961 (0x3c1), region = 32  ;;  %4644 = vmatprep.subr.bf16.mxu0 (!%p200_p3), %v5169_v0  ;;  %4632 = vmatprep.subr.bf16.mxu1 (!%p200_p3), %v5169_v0  ;;  %vm395_vm3 = vcmask (!%p200_p3), 1043459   ;;  %vm398_vm4 = vcmask (!%p200_p3), 1044484   ;;  %vm401_vm5 = vcmask (!%p200_p3), 1045509   ;;  %vm404_vm6 = vcmask (!%p200_p3), 1046534  }
   0x8   : > { %4646 = vmatprep.mubr.msk.bf16.mxu0 (!%p200_p3), %vm5170_vm0, %v5169_v0  ;;  %4634 = vmatprep.mubr.msk.bf16.mxu1 (!%p200_p3), %vm5170_vm0, %v5169_v0  ;;  %vm407_vm7 = vcmask (!%p200_p3), 1047559   ;;  %vm425_vm8 = vcmask (!%p200_p3), 130048   ;;  %vm692_vm9 = vcmask (!%p200_p3), 1047624   ;;  %vm771_vm10 = vcmask (!%p200_p3), 64512  }
   0x9   : > { %vm762_vm11 = vcmask (!%p200_p3), 57344   ;;  %vm276_vm12 = vcmask (!%p200_p3), 8192   ;;  %vm4051_vm13 = vcmask (!%p200_p3), 7168  }
   0xe   : > { %s6378_s15 = smov (!%p243_p4, %s5159_s15), 1 }
   0xf   : > { %s5226_s19 = sshll.u32 %s6378_s15, 6 }
  0x10   : > { %s5232_s22 = scalar_lea.vmem %s6370_s2, %s5226_s19  ;;  %s5253_s25 = scalar_lea.vmem %s6369_s1, %s5226_s19 }
  0x11   : > { %v4885_v1 = vld [vmem:[%s5232_s22] ss:$0 sps:$4 sm:$0x11]   ;;  %v4886_v2 = vld [vmem:[%s5232_s22 + $0x4] ss:$0 sps:$4 sm:$0x11]  }
  0x12   : > { %v4887_v3 = vld [vmem:[%s5232_s22 + $0x8] ss:$0 sps:$4 sm:$0x11]   ;;  %v4888_v4 = vld [vmem:[%s5232_s22 + $0xc] ss:$0 sps:$4 sm:$0x11]   ;;  %v373_v10 = vunpack.c.l.b16 %v4886_v2  ;;  %v372_v18 = vunpack.c.l.b16 %v4885_v1 }
  0x13   : > { %v4889_v5 = vld [vmem:[%s5232_s22 + $0x10] ss:$0 sps:$4 sm:$0x11]   ;;  %v4890_v6 = vld [vmem:[%s5232_s22 + $0x14] ss:$0 sps:$4 sm:$0x11]   ;;  %v374_v11 = vunpack.c.l.b16 %v4887_v3  ;;  %v375_v14 = vunpack.c.l.b16 %v4888_v4 }
  0x14   : > { %v4891_v7 = vld [vmem:[%s5232_s22 + $0x18] ss:$0 sps:$4 sm:$0x11]   ;;  %v4892_v8 = vld [vmem:[%s5232_s22 + $0x1c] ss:$0 sps:$4 sm:$0x11]   ;;  %v376_v15 = vunpack.c.l.b16 %v4889_v5  ;;  %v377_v19 = vunpack.c.l.b16 %v4890_v6 }
  0x15   : > { %v4893_v9 = vld [vmem:[%s5232_s22 + $0x20] ss:$0 sps:$4 sm:$0x11]   ;;  %v4894_v12 = vld [vmem:[%s5232_s22 + $0x24] ss:$0 sps:$4 sm:$0x11]   ;;  %v378_v20 = vunpack.c.l.b16 %v4891_v7  ;;  %v379_v23 = vunpack.c.l.b16 %v4892_v8 }
  0x16   : > { %v4895_v13 = vld [vmem:[%s5232_s22 + $0x28] ss:$0 sps:$4 sm:$0x11]   ;;  %v4896_v16 = vld [vmem:[%s5232_s22 + $0x2c] ss:$0 sps:$4 sm:$0x11]   ;;  %v380_v24 = vunpack.c.l.b16 %v4893_v9  ;;  %v381_v25 = vunpack.c.l.b16 %v4894_v12 }
  0x17   : > { %v4897_v17 = vld [vmem:[%s5232_s22 + $0x30] ss:$0 sps:$4 sm:$0x11]   ;;  %v4898_v21 = vld [vmem:[%s5232_s22 + $0x34] ss:$0 sps:$4 sm:$0x11]   ;;  %v382_v26 = vunpack.c.l.b16 %v4895_v13  ;;  %v383_v28 = vunpack.c.l.b16 %v4896_v16 }
  0x18   : > { %v4899_v22 = vld [vmem:[%s5232_s22 + $0x38] ss:$0 sps:$4 sm:$0x11]   ;;  %v4900_v27 = vld [vmem:[%s5232_s22 + $0x3c] ss:$0 sps:$4 sm:$0x11]   ;;  %v384_v29 = vunpack.c.l.b16 %v4897_v17  ;;  %v385_v32 = vunpack.c.l.b16 %v4898_v21 }
  0x19   : > { %v388_v30 = vrot.slane %v373_v10, 7  ;;  %v391_v31 = vrot.slane %v374_v11, 6  ;;  %v386_v33 = vunpack.c.l.b16 %v4899_v22  ;;  %v394_v34 = vrot.slane %v375_v14, 5  ;;  %v4901_v59 = vld [vmem:[%s5253_s25] ss:$0 sps:$4 sm:$0x11]  }
  0x1a   : > { %v397_v35 = vrot.slane %v376_v15, 4  ;;  %v387_v36 = vunpack.c.l.b16 %v4900_v27  ;;  %v400_v38 = vrot.slane %v377_v19, 3  ;;  %v403_v39 = vrot.slane %v378_v20, 2  ;;  %v4902_v60 = vld [vmem:[%s5253_s25 + $0x4] ss:$0 sps:$4 sm:$0x11]  }
  0x1b   : > { %v390_v37 = vsel %vm389_vm1, %v388_v30, %v372_v18  ;;  %v406_v41 = vrot.slane %v379_v23, 1  ;;  %v409_v42 = vrot.slane %v381_v25, 7  ;;  %v411_v43 = vrot.slane %v382_v26, 6  ;;  %v4903_v62 = vld [vmem:[%s5253_s25 + $0x8] ss:$0 sps:$4 sm:$0x11]  }
  0x1c   : > { %v393_v40 = vsel %vm392_vm2, %v391_v31, %v390_v37  ;;  %v413_v45 = vrot.slane %v383_v28, 5  ;;  %v415_v46 = vrot.slane %v384_v29, 4  ;;  %v417_v47 = vrot.slane %v385_v32, 3  ;;  %v4904_v63 = vld [vmem:[%s5253_s25 + $0xc] ss:$0 sps:$4 sm:$0x11]  }
  0x1d   : > { %v396_v44 = vsel %vm395_vm3, %v394_v34, %v393_v40  ;;  %v410_v49 = vsel %vm389_vm1, %v409_v42, %v380_v24  ;;  %v419_v50 = vrot.slane %v386_v33, 2  ;;  %v421_v51 = vrot.slane %v387_v36, 1  ;;  %v4905_v2 = vld [vmem:[%s5253_s25 + $0x10] ss:$0 sps:$4 sm:$0x11]  }
  0x1e   : > { %v399_v48 = vsel %vm398_vm4, %v397_v35, %v396_v44  ;;  %v412_v53 = vsel %vm392_vm2, %v411_v43, %v410_v49  ;;  %v4906_v3 = vld [vmem:[%s5253_s25 + $0x14] ss:$0 sps:$4 sm:$0x11]   ;;  %v5279_v5 = vld [vmem:[%s6368_s0 + $0xc] sm:$0xf]  ;;  %v518_v10 = vunpack.c.l.b16 %v4902_v60  ;;  %v519_v11 = vunpack.c.l.b16 %v4903_v62 }
  0x1f   : > { %v402_v52 = vsel %vm401_vm5, %v400_v38, %v399_v48  ;;  %v414_v55 = vsel %vm395_vm3, %v413_v45, %v412_v53  ;;  %v4907_v6 = vld [vmem:[%s5253_s25 + $0x18] ss:$0 sps:$4 sm:$0x11]   ;;  %v4908_v7 = vld [vmem:[%s5253_s25 + $0x1c] ss:$0 sps:$4 sm:$0x11]   ;;  %v520_v14 = vunpack.c.l.b16 %v4904_v63  ;;  %v521_v15 = vunpack.c.l.b16 %v4905_v2 }
  0x20   : > { %v405_v54 = vsel %vm404_vm6, %v403_v39, %v402_v52  ;;  %v416_v56 = vsel %vm398_vm4, %v415_v46, %v414_v55  ;;  %v4909_v8 = vld [vmem:[%s5253_s25 + $0x20] ss:$0 sps:$4 sm:$0x11]   ;;  %v4910_v9 = vld [vmem:[%s5253_s25 + $0x24] ss:$0 sps:$4 sm:$0x11]   ;;  %v517_v18 = vunpack.c.l.b16 %v4901_v59  ;;  %v522_v19 = vunpack.c.l.b16 %v4906_v3 }
  0x21   : > { %v408_v57 = vsel %vm407_vm7, %v406_v41, %v405_v54  ;;  %v418_v58 = vsel %vm401_vm5, %v417_v47, %v416_v56  ;;  %v4911_v12 = vld [vmem:[%s5253_s25 + $0x28] ss:$0 sps:$4 sm:$0x11]   ;;  %v4912_v13 = vld [vmem:[%s5253_s25 + $0x2c] ss:$0 sps:$4 sm:$0x11]   ;;  %v523_v20 = vunpack.c.l.b16 %v4907_v6  ;;  %v524_v21 = vunpack.c.l.b16 %v4908_v7 }
  0x22   : > { %v420_v61 = vsel %vm404_vm6, %v419_v50, %v418_v58  ;;  %v4913_v16 = vld [vmem:[%s5253_s25 + $0x30] ss:$0 sps:$4 sm:$0x11]   ;;  %v4914_v17 = vld [vmem:[%s5253_s25 + $0x34] ss:$0 sps:$4 sm:$0x11]   ;;  %v525_v24 = vunpack.c.l.b16 %v4909_v8  ;;  %v526_v25 = vunpack.c.l.b16 %v4910_v9  ;;  %v527_v26 = vunpack.c.l.b16 %v4911_v12 }
  0x23   : > { %v422_v1 = vsel %vm407_vm7, %v421_v51, %v420_v61  ;;  %v4915_v22 = vld [vmem:[%s5253_s25 + $0x38] ss:$0 sps:$4 sm:$0x11]   ;;  %v4916_v23 = vld [vmem:[%s5253_s25 + $0x3c] ss:$0 sps:$4 sm:$0x11]   ;;  %v528_v27 = vunpack.c.l.b16 %v4912_v13  ;;  %v529_v28 = vunpack.c.l.b16 %v4913_v16  ;;  %v530_v29 = vunpack.c.l.b16 %v4914_v17 }
  0x24   : > { %v423_v4 = vpack.c.b16 %v422_v1, %v408_v57  ;;  %v533_v30 = vrot.slane %v518_v10, 7  ;;  %v535_v31 = vrot.slane %v519_v11, 6  ;;  %v531_v32 = vunpack.c.l.b16 %v4915_v22  ;;  %v4917_v56 = vld [vmem:[%s5232_s22] ss:$0 sps:$4 sm:$0x11]  }
  0x25   : > { %v532_v33 = vunpack.c.l.b16 %v4916_v23  ;;  %v537_v34 = vrot.slane %v520_v14, 5  ;;  %v539_v35 = vrot.slane %v521_v15, 4  ;;  %v541_v37 = vrot.slane %v522_v19, 3  ;;  %v4918_v57 = vld [vmem:[%s5232_s22 + $0x4] ss:$0 sps:$4 sm:$0x11]  }
  0x26   : > { %4645 = vmatpush3.bf16.msra.mxu0 %v423_v4  ;;  %4633 = vmatpush3.bf16.msra.mxu1 %v423_v4  ;;  %v534_v36 = vsel %vm389_vm1, %v533_v30, %v517_v18  ;;  %v543_v38 = vrot.slane %v523_v20, 2  ;;  %v547_v40 = vrot.slane %v526_v25, 7  ;;  %v549_v41 = vrot.slane %v527_v26, 6  ;;  %v4919_v60 = vld [vmem:[%s5232_s22 + $0x8] ss:$0 sps:$4 sm:$0x11]  }
  0x27   : > { %4650 = vmatprep.subr.bf16.mxu0 %v5169_v0  ;;  %4638 = vmatprep.subr.bf16.mxu1 %v5169_v0  ;;  %v536_v39 = vsel %vm392_vm2, %v535_v31, %v534_v36  ;;  %v551_v42 = vrot.slane %v528_v27, 5  ;;  %v545_v44 = vrot.slane %v524_v21, 1  ;;  %v553_v45 = vrot.slane %v529_v28, 4  ;;  %v4920_v61 = vld [vmem:[%s5232_s22 + $0xc] ss:$0 sps:$4 sm:$0x11]  }
  0x28   : > { %v538_v43 = vsel %vm395_vm3, %v537_v34, %v536_v39  ;;  %v555_v46 = vrot.slane %v530_v29, 3  ;;  %v548_v48 = vsel %vm389_vm1, %v547_v40, %v525_v24  ;;  %v557_v49 = vrot.slane %v531_v32, 2  ;;  %v4921_v63 = vld [vmem:[%s5232_s22 + $0x10] ss:$0 sps:$4 sm:$0x11]  }
  0x29   : > { %4647 = vmatmul.mubr.msk.bf16.vlgmr.msra.gmra.mrb[0].mxu0 %vm425_vm8, %v5279_v5  ;;  %v540_v47 = vsel %vm398_vm4, %v539_v35, %v538_v43  ;;  %v559_v50 = vrot.slane %v532_v33, 1  ;;  %v550_v52 = vsel %vm392_vm2, %v549_v41, %v548_v48  ;;  %v4922_v1 = vld [vmem:[%s5232_s22 + $0x14] ss:$0 sps:$4 sm:$0x11]   ;;  %v5324_v7 = vld [vmem:[%s6368_s0 + $0x4] sm:$0xf]  ;;  %v861_v10 = vunpack.c.l.b16 %v4917_v56 }
  0x2a   : > { %4652 = vmatprep.mubr.msk.bf16.mxu0 %vm5170_vm0, %v5169_v0  ;;  %v542_v51 = vsel %vm401_vm5, %v541_v37, %v540_v47  ;;  %v552_v54 = vsel %vm395_vm3, %v551_v42, %v550_v52  ;;  %v4923_v3 = vld [vmem:[%s5232_s22 + $0x18] ss:$0 sps:$4 sm:$0x11]   ;;  %v4924_v4 = vld [vmem:[%s5232_s22 + $0x1c] ss:$0 sps:$4 sm:$0x11]   ;;  %v863_v11 = vunpack.c.l.b16 %v4919_v60  ;;  %v864_v14 = vunpack.c.l.b16 %v4920_v61 }
  0x2b   : > { %v544_v53 = vsel %vm404_vm6, %v543_v38, %v542_v51  ;;  %v554_v55 = vsel %vm398_vm4, %v553_v45, %v552_v54  ;;  %v4925_v8 = vld [vmem:[%s5232_s22 + $0x20] ss:$0 sps:$4 sm:$0x11]   ;;  %v4926_v9 = vld [vmem:[%s5232_s22 + $0x24] ss:$0 sps:$4 sm:$0x11]   ;;  %v865_v15 = vunpack.c.l.b16 %v4921_v63  ;;  %v862_v18 = vunpack.c.l.b16 %v4918_v57 }
  0x2c   : > { %v546_v58 = vsel %vm407_vm7, %v545_v44, %v544_v53  ;;  %v556_v59 = vsel %vm401_vm5, %v555_v46, %v554_v55  ;;  %v4927_v12 = vld [vmem:[%s5232_s22 + $0x28] ss:$0 sps:$4 sm:$0x11]   ;;  %v4928_v13 = vld [vmem:[%s5232_s22 + $0x2c] ss:$0 sps:$4 sm:$0x11]   ;;  %v866_v19 = vunpack.c.l.b16 %v4922_v1  ;;  %v867_v20 = vunpack.c.l.b16 %v4923_v3 }
  0x2d   : > { %v558_v62 = vsel %vm404_vm6, %v557_v49, %v556_v59  ;;  %v4929_v16 = vld [vmem:[%s5232_s22 + $0x30] ss:$0 sps:$4 sm:$0x11]   ;;  %v4930_v17 = vld [vmem:[%s5232_s22 + $0x34] ss:$0 sps:$4 sm:$0x11]   ;;  %v868_v21 = vunpack.c.l.b16 %v4924_v4  ;;  %v869_v24 = vunpack.c.l.b16 %v4925_v8  ;;  %v870_v25 = vunpack.c.l.b16 %v4926_v9 }
  0x2e   : > { %v560_v2 = vsel %vm407_vm7, %v559_v50, %v558_v62  ;;  %v4931_v22 = vld [vmem:[%s5232_s22 + $0x38] ss:$0 sps:$4 sm:$0x11]   ;;  %v4932_v23 = vld [vmem:[%s5232_s22 + $0x3c] ss:$0 sps:$4 sm:$0x11]   ;;  %v871_v26 = vunpack.c.l.b16 %v4927_v12  ;;  %v872_v27 = vunpack.c.l.b16 %v4928_v13  ;;  %v873_v28 = vunpack.c.l.b16 %v4929_v16 }
  0x2f   : > { %v5319_v6 = vpack.c.b16 %v560_v2, %v546_v58  ;;  %v874_v29 = vunpack.c.l.b16 %v4930_v17  ;;  %v877_v30 = vrot.slane %v861_v10, 1  ;;  %v879_v31 = vrot.slane %v863_v11, 7  ;;  %v4933_v56 = vld [vmem:[%s5253_s25] ss:$0 sps:$4 sm:$0x11]  }
  0x30   : > { %v875_v32 = vunpack.c.l.b16 %v4931_v22  ;;  %v876_v33 = vunpack.c.l.b16 %v4932_v23  ;;  %v881_v34 = vrot.slane %v864_v14, 6  ;;  %v883_v35 = vrot.slane %v865_v15, 5  ;;  %v4934_v59 = vld [vmem:[%s5253_s25 + $0x4] ss:$0 sps:$4 sm:$0x11]  }
  0x31   : > { %4651 = vmatpush3.bf16.msra.mxu0 %v5319_v6  ;;  %v878_v36 = vsel %vm389_vm1, %v862_v18, %v877_v30  ;;  %v885_v37 = vrot.slane %v866_v19, 4  ;;  %v887_v38 = vrot.slane %v867_v20, 3  ;;  %v891_v40 = vrot.slane %v869_v24, 1  ;;  %v4935_v60 = vld [vmem:[%s5253_s25 + $0x8] ss:$0 sps:$4 sm:$0x11]  }
  0x32   : > { %4668 = vmatprep.subr.bf16.mxu0 %v5169_v0  ;;  %v880_v39 = vsel %vm392_vm2, %v879_v31, %v878_v36  ;;  %v893_v41 = vrot.slane %v871_v26, 7  ;;  %v895_v42 = vrot.slane %v872_v27, 6  ;;  %v889_v44 = vrot.slane %v868_v21, 2  ;;  %v4936_v62 = vld [vmem:[%s5253_s25 + $0xc] ss:$0 sps:$4 sm:$0x11]  }
  0x33   : > { %v882_v43 = vsel %vm395_vm3, %v881_v34, %v880_v39  ;;  %v897_v45 = vrot.slane %v873_v28, 5  ;;  %v899_v46 = vrot.slane %v874_v29, 4  ;;  %v892_v48 = vsel %vm389_vm1, %v870_v25, %v891_v40  ;;  %v4937_v63 = vld [vmem:[%s5253_s25 + $0x10] ss:$0 sps:$4 sm:$0x11]  }
  0x34   : > { %v884_v47 = vsel %vm398_vm4, %v883_v35, %v882_v43  ;;  %v901_v49 = vrot.slane %v875_v32, 3  ;;  %v903_v50 = vrot.slane %v876_v33, 2  ;;  %v894_v52 = vsel %vm392_vm2, %v893_v41, %v892_v48  ;;  %v4938_v2 = vld [vmem:[%s5253_s25 + $0x14] ss:$0 sps:$4 sm:$0x11]  }
  0x35   : > { %4653 = vmatmul.mubr.msk.bf16.vlgmr.msra.gmra.mrb[0].mxu0 %vm425_vm8, %v5324_v7  ;;  %v886_v51 = vsel %vm401_vm5, %v885_v37, %v884_v47  ;;  %v896_v54 = vsel %vm395_vm3, %v895_v42, %v894_v52  ;;  %v4939_v3 = vld [vmem:[%s5253_s25 + $0x18] ss:$0 sps:$4 sm:$0x11]   ;;  %v4940_v8 = vld [vmem:[%s5253_s25 + $0x1c] ss:$0 sps:$4 sm:$0x11]   ;;  %v995_v10 = vunpack.c.l.b16 %v4933_v56  ;;  %v997_v11 = vunpack.c.l.b16 %v4935_v60 }
  0x36   : > { %4670 = vmatprep.mubr.msk.bf16.mxu0 %vm5170_vm0, %v5169_v0  ;;  %v888_v53 = vsel %vm404_vm6, %v887_v38, %v886_v51  ;;  %v898_v55 = vsel %vm398_vm4, %v897_v45, %v896_v54  ;;  %v4941_v9 = vld [vmem:[%s5253_s25 + $0x20] ss:$0 sps:$4 sm:$0x11]   ;;  %v4942_v12 = vld [vmem:[%s5253_s25 + $0x24] ss:$0 sps:$4 sm:$0x11]   ;;  %v998_v14 = vunpack.c.l.b16 %v4936_v62  ;;  %v999_v15 = vunpack.c.l.b16 %v4937_v63 }
  0x37   : > { %v890_v57 = vsel %vm407_vm7, %v889_v44, %v888_v53  ;;  %v900_v58 = vsel %vm401_vm5, %v899_v46, %v898_v55  ;;  %v4943_v13 = vld [vmem:[%s5253_s25 + $0x28] ss:$0 sps:$4 sm:$0x11]   ;;  %v4944_v16 = vld [vmem:[%s5253_s25 + $0x2c] ss:$0 sps:$4 sm:$0x11]   ;;  %v996_v18 = vunpack.c.l.b16 %v4934_v59  ;;  %v1000_v19 = vunpack.c.l.b16 %v4938_v2 }
  0x38   : > { %v902_v61 = vsel %vm404_vm6, %v901_v49, %v900_v58  ;;  %v4945_v17 = vld [vmem:[%s5253_s25 + $0x30] ss:$0 sps:$4 sm:$0x11]   ;;  %v1001_v20 = vunpack.c.l.b16 %v4939_v3  ;;  %v4946_v21 = vld [vmem:[%s5253_s25 + $0x34] ss:$0 sps:$4 sm:$0x11]   ;;  %v1002_v23 = vunpack.c.l.b16 %v4940_v8  ;;  %v1003_v24 = vunpack.c.l.b16 %v4941_v9 }
  0x39   : > { %v904_v1 = vsel %vm407_vm7, %v903_v50, %v902_v61  ;;  %v4947_v22 = vld [vmem:[%s5253_s25 + $0x38] ss:$0 sps:$4 sm:$0x11]   ;;  %v1004_v25 = vunpack.c.l.b16 %v4942_v12  ;;  %v1005_v26 = vunpack.c.l.b16 %v4943_v13  ;;  %v4948_v27 = vld [vmem:[%s5253_s25 + $0x3c] ss:$0 sps:$4 sm:$0x11]   ;;  %v1006_v28 = vunpack.c.l.b16 %v4944_v16 }
  0x3a   : > { %v5361_v4 = vpack.c.b16 %v904_v1, %v890_v57  ;;  %v1007_v29 = vunpack.c.l.b16 %v4945_v17  ;;  %v1011_v30 = vrot.slane %v995_v10, 1  ;;  %v1013_v31 = vrot.slane %v997_v11, 7  ;;  %v4949_v59 = vld [vmem:[%s5232_s22] ss:$0 sps:$4 sm:$0x22]  }
  0x3b   : > { %v1008_v32 = vunpack.c.l.b16 %v4946_v21  ;;  %v1009_v33 = vunpack.c.l.b16 %v4947_v22  ;;  %v1015_v34 = vrot.slane %v998_v14, 6  ;;  %v1017_v35 = vrot.slane %v999_v15, 5  ;;  %v4950_v60 = vld [vmem:[%s5232_s22 + $0x4] ss:$0 sps:$4 sm:$0x22]  }
  0x3c   : > { %4669 = vmatpush3.bf16.msra.mxu0 %v5361_v4  ;;  %v1010_v36 = vunpack.c.l.b16 %v4948_v27  ;;  %v1012_v37 = vsel %vm389_vm1, %v996_v18, %v1011_v30  ;;  %v1019_v38 = vrot.slane %v1000_v19, 4  ;;  %v1021_v39 = vrot.slane %v1001_v20, 3  ;;  %v4951_v62 = vld [vmem:[%s5232_s22 + $0x8] ss:$0 sps:$4 sm:$0x22]  }
  0x3d   : > { %4674 = vmatprep.subr.bf16.mxu0 %v5169_v0  ;;  %v1014_v40 = vsel %vm392_vm2, %v1013_v31, %v1012_v37  ;;  %v1023_v41 = vrot.slane %v1002_v23, 2  ;;  %v1025_v42 = vrot.slane %v1003_v24, 1  ;;  %v1027_v43 = vrot.slane %v1005_v26, 7  ;;  %v4952_v63 = vld [vmem:[%s5232_s22 + $0xc] ss:$0 sps:$4 sm:$0x22]  }
  0x3e   : > { %v1016_v44 = vsel %vm395_vm3, %v1015_v34, %v1014_v40  ;;  %v1029_v45 = vrot.slane %v1006_v28, 6  ;;  %v1031_v46 = vrot.slane %v1007_v29, 5  ;;  %v1033_v47 = vrot.slane %v1008_v32, 4  ;;  %v4953_v2 = vld [vmem:[%s5232_s22 + $0x10] ss:$0 sps:$4 sm:$0x22]  }
  0x3f   : > { %4671 = vmatmul.mubr.msk.bf16.vlgmr.msra.gmra.mrb[4].mxu0 %vm425_vm8, %v5279_v5  ;;  %v1018_v48 = vsel %vm398_vm4, %v1017_v35, %v1016_v44  ;;  %v1026_v49 = vsel %vm389_vm1, %v1004_v25, %v1025_v42  ;;  %v1035_v50 = vrot.slane %v1009_v33, 3  ;;  %v1037_v51 = vrot.slane %v1010_v36, 2  ;;  %v4954_v3 = vld [vmem:[%s5232_s22 + $0x14] ss:$0 sps:$4 sm:$0x22]  }
  0x40   : > { %4676 = vmatprep.mubr.msk.bf16.mxu0 %vm5170_vm0, %v5169_v0  ;;  %v1020_v52 = vsel %vm401_vm5, %v1019_v38, %v1018_v48  ;;  %v1028_v53 = vsel %vm392_vm2, %v1027_v43, %v1026_v49  ;;  %v4955_v9 = vld [vmem:[%s5232_s22 + $0x18] ss:$0 sps:$4 sm:$0x22]   ;;  %v4956_v10 = vld [vmem:[%s5232_s22 + $0x1c] ss:$0 sps:$4 sm:$0x22]   ;;  %v1327_v13 = vunpack.c.l.b16 %v4949_v59  ;;  %v1328_v14 = vunpack.c.l.b16 %v4950_v60 }
  0x41   : > { %v1022_v54 = vsel %vm404_vm6, %v1021_v39, %v1020_v52  ;;  %v1030_v55 = vsel %vm395_vm3, %v1029_v45, %v1028_v53  ;;  %v4957_v11 = vld [vmem:[%s5232_s22 + $0x20] ss:$0 sps:$4 sm:$0x22]   ;;  %v4958_v12 = vld [vmem:[%s5232_s22 + $0x24] ss:$0 sps:$4 sm:$0x22]   ;;  %v1330_v17 = vunpack.c.l.b16 %v4952_v63  ;;  %v1331_v18 = vunpack.c.l.b16 %v4953_v2 }
  0x42   : > { %v1032_v56 = vsel %vm398_vm4, %v1031_v46, %v1030_v55  ;;  %v1024_v57 = vsel %vm407_vm7, %v1023_v41, %v1022_v54  ;;  %v4959_v15 = vld [vmem:[%s5232_s22 + $0x28] ss:$0 sps:$4 sm:$0x22]   ;;  %v4960_v16 = vld [vmem:[%s5232_s22 + $0x2c] ss:$0 sps:$4 sm:$0x22]   ;;  %v1329_v21 = vunpack.c.l.b16 %v4951_v62  ;;  %v1332_v22 = vunpack.c.l.b16 %v4954_v3 }
  0x43   : > { %v1034_v58 = vsel %vm401_vm5, %v1033_v47, %v1032_v56  ;;  %v4961_v19 = vld [vmem:[%s5232_s22 + $0x30] ss:$0 sps:$4 sm:$0x22]   ;;  %v4962_v20 = vld [vmem:[%s5232_s22 + $0x34] ss:$0 sps:$4 sm:$0x22]   ;;  %v1333_v23 = vunpack.c.l.b16 %v4955_v9  ;;  %v1334_v26 = vunpack.c.l.b16 %v4956_v10  ;;  %v1335_v27 = vunpack.c.l.b16 %v4957_v11 }
  0x44   : > { %v1036_v61 = vsel %vm404_vm6, %v1035_v50, %v1034_v58  ;;  %v4963_v24 = vld [vmem:[%s5232_s22 + $0x38] ss:$0 sps:$4 sm:$0x22]   ;;  %v4964_v25 = vld [vmem:[%s5232_s22 + $0x3c] ss:$0 sps:$4 sm:$0x22]   ;;  %v1336_v28 = vunpack.c.l.b16 %v4958_v12  ;;  %v1338_v29 = vunpack.c.l.b16 %v4960_v16  ;;  %v1339_v30 = vunpack.c.l.b16 %v4961_v19 }
  0x45   : > { %v1038_v1 = vsel %vm407_vm7, %v1037_v51, %v1036_v61  ;;  %v1340_v31 = vunpack.c.l.b16 %v4962_v20  ;;  %v1343_v32 = vrot.slane %v1327_v13, 2  ;;  %v1344_v33 = vrot.slane %v1328_v14, 1  ;;  %v4965_v59 = vld [vmem:[%s5253_s25] ss:$0 sps:$4 sm:$0x22]  }
  0x46   : > { %v5398_v8 = vpack.c.b16 %v1038_v1, %v1024_v57  ;;  %v1341_v34 = vunpack.c.l.b16 %v4963_v24  ;;  %v1342_v35 = vunpack.c.l.b16 %v4964_v25  ;;  %v1347_v36 = vrot.slane %v1330_v17, 7  ;;  %v4966_v60 = vld [vmem:[%s5253_s25 + $0x4] ss:$0 sps:$4 sm:$0x22]  }
  0x47   : > { %v1349_v37 = vrot.slane %v1331_v18, 6  ;;  %v1337_v38 = vunpack.c.l.b16 %v4959_v15  ;;  %v1345_v39 = vsel %vm389_vm1, %v1344_v33, %v1343_v32  ;;  %v1351_v40 = vrot.slane %v1332_v22, 5  ;;  %v4967_v63 = vld [vmem:[%s5253_s25 + $0x8] ss:$0 sps:$4 sm:$0x22]  }
  0x48   : > { %4675 = vmatpush3.bf16.msra.mxu0 %v5398_v8  ;;  %v1353_v41 = vrot.slane %v1333_v23, 4  ;;  %v1346_v42 = vsel %vm392_vm2, %v1329_v21, %v1345_v39  ;;  %v1357_v43 = vrot.slane %v1335_v27, 2  ;;  %v1358_v44 = vrot.slane %v1336_v28, 1  ;;  %v4968_v1 = vld [vmem:[%s5253_s25 + $0xc] ss:$0 sps:$4 sm:$0x22]  }
  0x49   : > { %4692 = vmatprep.subr.bf16.mxu0 %v5169_v0  ;;  %v1361_v45 = vrot.slane %v1338_v29, 7  ;;  %v1348_v46 = vsel %vm395_vm3, %v1347_v36, %v1346_v42  ;;  %v1355_v47 = vrot.slane %v1334_v26, 3  ;;  %v1363_v48 = vrot.slane %v1339_v30, 6  ;;  %v4969_v3 = vld [vmem:[%s5253_s25 + $0x10] ss:$0 sps:$4 sm:$0x22]  }
  0x4a   : > { %v1365_v49 = vrot.slane %v1340_v31, 5  ;;  %v1350_v50 = vsel %vm398_vm4, %v1349_v37, %v1348_v46  ;;  %v1359_v51 = vsel %vm389_vm1, %v1358_v44, %v1357_v43  ;;  %v1367_v52 = vrot.slane %v1341_v34, 4  ;;  %v4970_v9 = vld [vmem:[%s5253_s25 + $0x14] ss:$0 sps:$4 sm:$0x22]  }
  0x4b   : > { %4677 = vmatmul.mubr.msk.bf16.vlgmr.msra.gmra.mrb[4].mxu0 %vm425_vm8, %v5324_v7  ;;  %v1369_v53 = vrot.slane %v1342_v35, 3  ;;  %v1352_v54 = vsel %vm401_vm5, %v1351_v40, %v1350_v50  ;;  %v1360_v55 = vsel %vm392_vm2, %v1337_v38, %v1359_v51  ;;  %v4971_v11 = vld [vmem:[%s5253_s25 + $0x18] ss:$0 sps:$4 sm:$0x22]   ;;  %v1461_v16 = vunpack.c.l.b16 %v4965_v59 }
  0x4c   : > { %4694 = vmatprep.mubr.msk.bf16.mxu0 %vm5170_vm0, %v5169_v0  ;;  %v1354_v56 = vsel %vm404_vm6, %v1353_v41, %v1352_v54  ;;  %v1362_v57 = vsel %vm395_vm3, %v1361_v45, %v1360_v55  ;;  %v4972_v12 = vld [vmem:[%s5253_s25 + $0x1c] ss:$0 sps:$4 sm:$0x22]   ;;  %v4973_v14 = vld [vmem:[%s5253_s25 + $0x20] ss:$0 sps:$4 sm:$0x22]   ;;  %v1462_v17 = vunpack.c.l.b16 %v4966_v60  ;;  %v1464_v20 = vunpack.c.l.b16 %v4968_v1 }
  0x4d   : > { %v1364_v58 = vsel %vm398_vm4, %v1363_v48, %v1362_v57  ;;  %v1356_v61 = vsel %vm407_vm7, %v1355_v47, %v1354_v56  ;;  %v4974_v15 = vld [vmem:[%s5253_s25 + $0x24] ss:$0 sps:$4 sm:$0x22]   ;;  %v4975_v18 = vld [vmem:[%s5253_s25 + $0x28] ss:$0 sps:$4 sm:$0x22]   ;;  %v1465_v21 = vunpack.c.l.b16 %v4969_v3  ;;  %v1463_v24 = vunpack.c.l.b16 %v4967_v63 }
  0x4e   : > { %v1366_v62 = vsel %vm401_vm5, %v1365_v49, %v1364_v58  ;;  %v4976_v19 = vld [vmem:[%s5253_s25 + $0x2c] ss:$0 sps:$4 sm:$0x22]   ;;  %v4977_v22 = vld [vmem:[%s5253_s25 + $0x30] ss:$0 sps:$4 sm:$0x22]   ;;  %v1466_v25 = vunpack.c.l.b16 %v4970_v9  ;;  %v1467_v26 = vunpack.c.l.b16 %v4971_v11  ;;  %v1468_v29 = vunpack.c.l.b16 %v4972_v12 }
  0x4f   : > { %v1368_v2 = vsel %vm404_vm6, %v1367_v52, %v1366_v62  ;;  %v4978_v23 = vld [vmem:[%s5253_s25 + $0x34] ss:$0 sps:$4 sm:$0x22]   ;;  %v4979_v27 = vld [vmem:[%s5253_s25 + $0x38] ss:$0 sps:$4 sm:$0x22]   ;;  %v1469_v30 = vunpack.c.l.b16 %v4973_v14  ;;  %v1470_v31 = vunpack.c.l.b16 %v4974_v15  ;;  %v1472_v32 = vunpack.c.l.b16 %v4976_v19 }
  0x50   : > { %v1370_v10 = vsel %vm407_vm7, %v1369_v53, %v1368_v2  ;;  %v4980_v28 = vld [vmem:[%s5253_s25 + $0x3c] ss:$0 sps:$4 sm:$0x22]   ;;  %v1473_v33 = vunpack.c.l.b16 %v4977_v22  ;;  %v1474_v34 = vunpack.c.l.b16 %v4978_v23  ;;  %v1477_v35 = vrot.slane %v1461_v16, 2 }
  0x51   : > { %v5438_v13 = vpack.c.b16 %v1370_v10, %v1356_v61  ;;  %v1478_v36 = vrot.slane %v1462_v17, 1  ;;  %v1475_v37 = vunpack.c.l.b16 %v4979_v27  ;;  %v1476_v38 = vunpack.c.l.b16 %v4980_v28  ;;  %v4981_v61 = vld [vmem:[%s5232_s22] ss:$0 sps:$4 sm:$0x22]  }
  0x52   : > { %v1481_v39 = vrot.slane %v1464_v20, 7  ;;  %v1483_v40 = vrot.slane %v1465_v21, 6  ;;  %v1471_v41 = vunpack.c.l.b16 %v4975_v18  ;;  %v1485_v43 = vrot.slane %v1466_v25, 5  ;;  %v4982_v1 = vld [vmem:[%s5232_s22 + $0x4] ss:$0 sps:$4 sm:$0x22]  }
  0x53   : > { %4693 = vmatpush3.bf16.msra.mxu0 %v5438_v13  ;;  %v1479_v42 = vsel %vm389_vm1, %v1478_v36, %v1477_v35  ;;  %v1487_v44 = vrot.slane %v1467_v26, 4  ;;  %v1491_v46 = vrot.slane %v1469_v30, 2  ;;  %v1492_v47 = vrot.slane %v1470_v31, 1  ;;  %v4983_v2 = vld [vmem:[%s5232_s22 + $0x8] ss:$0 sps:$4 sm:$0x22]  }
  0x54   : > { %4698 = vmatprep.subr.bf16.mxu0 %v5169_v0  ;;  %v1480_v45 = vsel %vm392_vm2, %v1463_v24, %v1479_v42  ;;  %v1495_v48 = vrot.slane %v1472_v32, 7  ;;  %v1489_v49 = vrot.slane %v1468_v29, 3  ;;  %v1497_v50 = vrot.slane %v1473_v33, 6  ;;  %v4984_v9 = vld [vmem:[%s5232_s22 + $0xc] ss:$0 sps:$4 sm:$0x22]  }
  0x55   : > { %v1499_v51 = vrot.slane %v1474_v34, 5  ;;  %v1493_v53 = vsel %vm389_vm1, %v1492_v47, %v1491_v46  ;;  %v1501_v54 = vrot.slane %v1475_v37, 4  ;;  %v1503_v55 = vrot.slane %v1476_v38, 3  ;;  %v4985_v10 = vld [vmem:[%s5232_s22 + $0x10] ss:$0 sps:$4 sm:$0x22]  }
  0x56   : > { %4695 = vmatmul.mubr.msk.bf16.vlgmr.msra.gmra.mrb[8].mxu0 %vm425_vm8, %v5279_v5  ;;  %v1482_v5 = vsel %vm395_vm3, %v1481_v39, %v1480_v45  ;;  %v1494_v57 = vsel %vm392_vm2, %v1471_v41, %v1493_v53  ;;  %v4986_v12 = vld [vmem:[%s5232_s22 + $0x14] ss:$0 sps:$4 sm:$0x22]   ;;  %v4987_v14 = vld [vmem:[%s5232_s22 + $0x18] ss:$0 sps:$4 sm:$0x22]   ;;  %v1793_v18 = vunpack.c.l.b16 %v4981_v61  ;;  %v1794_v19 = vunpack.c.l.b16 %v4982_v1 }
  0x57   : > { %4700 = vmatprep.mubr.msk.bf16.mxu0 %vm5170_vm0, %v5169_v0  ;;  %v1484_v52 = vsel %vm398_vm4, %v1483_v40, %v1482_v5  ;;  %v1496_v59 = vsel %vm395_vm3, %v1495_v48, %v1494_v57  ;;  %v4988_v16 = vld [vmem:[%s5232_s22 + $0x1c] ss:$0 sps:$4 sm:$0x22]   ;;  %v4989_v17 = vld [vmem:[%s5232_s22 + $0x20] ss:$0 sps:$4 sm:$0x22]   ;;  %v1795_v22 = vunpack.c.l.b16 %v4983_v2  ;;  %v1797_v23 = vunpack.c.l.b16 %v4985_v10 }
  0x58   : > { %v1486_v56 = vsel %vm401_vm5, %v1485_v43, %v1484_v52  ;;  %v1498_v60 = vsel %vm398_vm4, %v1497_v50, %v1496_v59  ;;  %v4990_v20 = vld [vmem:[%s5232_s22 + $0x24] ss:$0 sps:$4 sm:$0x22]   ;;  %v4991_v21 = vld [vmem:[%s5232_s22 + $0x28] ss:$0 sps:$4 sm:$0x22]   ;;  %v1796_v26 = vunpack.c.l.b16 %v4984_v9  ;;  %v1798_v27 = vunpack.c.l.b16 %v4986_v12 }
  0x59   : > { %v1488_v58 = vsel %vm404_vm6, %v1487_v44, %v1486_v56  ;;  %v1500_v63 = vsel %vm401_vm5, %v1499_v51, %v1498_v60  ;;  %v4992_v24 = vld [vmem:[%s5232_s22 + $0x2c] ss:$0 sps:$4 sm:$0x22]   ;;  %v4993_v25 = vld [vmem:[%s5232_s22 + $0x30] ss:$0 sps:$4 sm:$0x22]   ;;  %v1799_v28 = vunpack.c.l.b16 %v4987_v14  ;;  %v1800_v31 = vunpack.c.l.b16 %v4988_v16 }
  0x5a   : > { %v1490_v62 = vsel %vm407_vm7, %v1489_v49, %v1488_v58  ;;  %v1502_v3 = vsel %vm404_vm6, %v1501_v54, %v1500_v63  ;;  %v4994_v29 = vld [vmem:[%s5232_s22 + $0x34] ss:$0 sps:$4 sm:$0x22]   ;;  %v4995_v30 = vld [vmem:[%s5232_s22 + $0x38] ss:$0 sps:$4 sm:$0x22]   ;;  %v1801_v32 = vunpack.c.l.b16 %v4989_v17  ;;  %v1802_v33 = vunpack.c.l.b16 %v4990_v20 }
  0x5b   : > { %v1504_v11 = vsel %vm407_vm7, %v1503_v55, %v1502_v3  ;;  %v1803_v34 = vunpack.c.l.b16 %v4991_v21  ;;  %v4996_v35 = vld [vmem:[%s5232_s22 + $0x3c] ss:$0 sps:$4 sm:$0x22]   ;;  %v1804_v36 = vunpack.c.l.b16 %v4992_v24  ;;  %v1805_v37 = vunpack.c.l.b16 %v4993_v25  ;;  %v4997_v2 = vld [vmem:[%s5253_s25] ss:$0 sps:$4 sm:$0x22]  }
  0x5c   : > { %v5475_v15 = vpack.c.b16 %v1504_v11, %v1490_v62  ;;  %v1809_v38 = vrot.slane %v1793_v18, 3  ;;  %v1810_v39 = vrot.slane %v1794_v19, 2  ;;  %v1806_v40 = vunpack.c.l.b16 %v4994_v29  ;;  %v4998_v3 = vld [vmem:[%s5253_s25 + $0x4] ss:$0 sps:$4 sm:$0x22]  }
  0x5d   : > { %v1807_v41 = vunpack.c.l.b16 %v4995_v30  ;;  %v1812_v42 = vrot.slane %v1795_v22, 1  ;;  %v1815_v43 = vrot.slane %v1797_v23, 7  ;;  %v1808_v44 = vunpack.c.l.b16 %v4996_v35  ;;  %v4999_v10 = vld [vmem:[%s5253_s25 + $0x8] ss:$0 sps:$4 sm:$0x22]  }
  0x5e   : > { %4699 = vmatpush3.bf16.msra.mxu0 %v5475_v15  ;;  %v1811_v45 = vsel %vm389_vm1, %v1810_v39, %v1809_v38  ;;  %v1817_v46 = vrot.slane %v1798_v27, 6  ;;  %v1819_v47 = vrot.slane %v1799_v28, 5  ;;  %v1821_v5 = vrot.slane %v1800_v31, 4  ;;  %v5000_v11 = vld [vmem:[%s5253_s25 + $0xc] ss:$0 sps:$4 sm:$0x22]  }
  0x5f   : > { %4716 = vmatprep.subr.bf16.mxu0 %v5169_v0  ;;  %v1813_v48 = vsel %vm392_vm2, %v1812_v42, %v1811_v45  ;;  %v1823_v49 = vrot.slane %v1801_v32, 3  ;;  %v1824_v50 = vrot.slane %v1802_v33, 2  ;;  %v1826_v51 = vrot.slane %v1803_v34, 1  ;;  %v5001_v14 = vld [vmem:[%s5253_s25 + $0x10] ss:$0 sps:$4 sm:$0x22]  }
  0x60   : > { %v1829_v52 = vrot.slane %v1805_v37, 7  ;;  %v1831_v53 = vrot.slane %v1806_v40, 6  ;;  %v1833_v56 = vrot.slane %v1807_v41, 5  ;;  %v1835_v57 = vrot.slane %v1808_v44, 4  ;;  %v5529_v39 = vld [vmem:[%s6368_s0 + $0xc] sm:$0xf] }
  0x61   : > { %v1825_v55 = vsel %vm389_vm1, %v1824_v50, %v1823_v49  ;;  %v5002_v16 = vld [vmem:[%s5253_s25 + $0x14] ss:$0 sps:$4 sm:$0x22]   ;;  %v5003_v18 = vld [vmem:[%s5253_s25 + $0x18] ss:$0 sps:$4 sm:$0x22]   ;;  %v1927_v22 = vunpack.c.l.b16 %v4997_v2  ;;  %v1928_v23 = vunpack.c.l.b16 %v4998_v3  ;;  %v1931_v27 = vunpack.c.l.b16 %v5001_v14 }
  0x62   : > { %4701 = vmatmul.mubr.msk.bf16.vlgmr.msra.gmra.mrb[8].mxu0 %vm425_vm8, %v5324_v7  ;;  %v1814_v7 = vsel %vm395_vm3, %v1796_v26, %v1813_v48  ;;  %v1827_v59 = vsel %vm392_vm2, %v1826_v51, %v1825_v55  ;;  %v5004_v19 = vld [vmem:[%s5253_s25 + $0x1c] ss:$0 sps:$4 sm:$0x22]   ;;  %v5005_v20 = vld [vmem:[%s5253_s25 + $0x20] ss:$0 sps:$4 sm:$0x22]   ;;  %v1929_v26 = vunpack.c.l.b16 %v4999_v10  ;;  %v1930_v30 = vunpack.c.l.b16 %v5000_v11 }
  0x63   : > { %4718 = vmatprep.mubr.msk.bf16.mxu0 %vm5170_vm0, %v5169_v0  ;;  %v1816_v54 = vsel %vm398_vm4, %v1815_v43, %v1814_v7  ;;  %v1828_v61 = vsel %vm395_vm3, %v1804_v36, %v1827_v59  ;;  %v5006_v21 = vld [vmem:[%s5253_s25 + $0x24] ss:$0 sps:$4 sm:$0x22]   ;;  %v5007_v24 = vld [vmem:[%s5253_s25 + $0x28] ss:$0 sps:$4 sm:$0x22]   ;;  %v1932_v31 = vunpack.c.l.b16 %v5002_v16  ;;  %v1933_v32 = vunpack.c.l.b16 %v5003_v18 }
  0x64   : > { %v1818_v58 = vsel %vm401_vm5, %v1817_v46, %v1816_v54  ;;  %v1830_v62 = vsel %vm398_vm4, %v1829_v52, %v1828_v61  ;;  %v5008_v25 = vld [vmem:[%s5253_s25 + $0x2c] ss:$0 sps:$4 sm:$0x22]   ;;  %v5009_v28 = vld [vmem:[%s5253_s25 + $0x30] ss:$0 sps:$4 sm:$0x22]   ;;  %v1934_v35 = vunpack.c.l.b16 %v5004_v19  ;;  %v1935_v36 = vunpack.c.l.b16 %v5005_v20 }
  0x65   : > { %v1820_v60 = vsel %vm404_vm6, %v1819_v47, %v1818_v58  ;;  %v1832_v1 = vsel %vm401_vm5, %v1831_v53, %v1830_v62  ;;  %v5010_v29 = vld [vmem:[%s5253_s25 + $0x34] ss:$0 sps:$4 sm:$0x22]   ;;  %v5011_v33 = vld [vmem:[%s5253_s25 + $0x38] ss:$0 sps:$4 sm:$0x22]   ;;  %v1936_v37 = vunpack.c.l.b16 %v5006_v21  ;;  %v1937_v38 = vunpack.c.l.b16 %v5007_v24 }
  0x66   : > { %v1822_v63 = vsel %vm407_vm7, %v1821_v5, %v1820_v60  ;;  %v1834_v9 = vsel %vm404_vm6, %v1833_v56, %v1832_v1  ;;  %v5012_v34 = vld [vmem:[%s5253_s25 + $0x3c] ss:$0 sps:$4 sm:$0x22]   ;;  %v1939_v40 = vunpack.c.l.b16 %v5009_v28  ;;  %v1940_v41 = vunpack.c.l.b16 %v5010_v29  ;;  %v5014_v10 = vld [vmem:[%s5232_s22 + $0x4] ss:$0 sps:$4 sm:$0x44]  }
  0x67   : > { %v1836_v12 = vsel %vm407_vm7, %v1835_v57, %v1834_v9  ;;  %v1943_v42 = vrot.slane %v1927_v22, 3  ;;  %v1944_v43 = vrot.slane %v1928_v23, 2  ;;  %v1941_v44 = vunpack.c.l.b16 %v5011_v33  ;;  %v5013_v9 = vld [vmem:[%s5232_s22] ss:$0 sps:$4 sm:$0x44]  }
  0x68   : > { %v5512_v17 = vpack.c.b16 %v1836_v12, %v1822_v63  ;;  %v1942_v45 = vunpack.c.l.b16 %v5012_v34  ;;  %v1946_v46 = vrot.slane %v1929_v26, 1  ;;  %v1949_v47 = vrot.slane %v1931_v27, 7  ;;  %v5015_v14 = vld [vmem:[%s5232_s22 + $0x8] ss:$0 sps:$4 sm:$0x44]  }
  0x69   : > { %v1938_v48 = vunpack.c.l.b16 %v5008_v25  ;;  %v1945_v5 = vsel %vm389_vm1, %v1944_v43, %v1943_v42  ;;  %v1951_v49 = vrot.slane %v1932_v31, 6  ;;  %v1953_v50 = vrot.slane %v1933_v32, 5  ;;  %v5016_v16 = vld [vmem:[%s5232_s22 + $0xc] ss:$0 sps:$4 sm:$0x44]  }
  0x6a   : > { %4717 = vmatpush3.bf16.msra.mxu0 %v5512_v17  ;;  %v1947_v7 = vsel %vm392_vm2, %v1946_v46, %v1945_v5  ;;  %v1957_v51 = vrot.slane %v1935_v36, 3  ;;  %v1958_v52 = vrot.slane %v1936_v37, 2  ;;  %v1960_v53 = vrot.slane %v1937_v38, 1  ;;  %v5017_v19 = vld [vmem:[%s5232_s22 + $0x10] ss:$0 sps:$4 sm:$0x44]  }
  0x6b   : > { %4722 = vmatprep.subr.bf16.mxu0 %v5169_v0  ;;  %v1948_v54 = vsel %vm395_vm3, %v1930_v30, %v1947_v7  ;;  %v1955_v55 = vrot.slane %v1934_v35, 4  ;;  %v1963_v56 = vrot.slane %v1939_v40, 7  ;;  %v1965_v57 = vrot.slane %v1940_v41, 6  ;;  %v5018_v20 = vld [vmem:[%s5232_s22 + $0x14] ss:$0 sps:$4 sm:$0x44]  }
  0x6c   : > { %v1950_v58 = vsel %vm398_vm4, %v1949_v47, %v1948_v54  ;;  %v1959_v59 = vsel %vm389_vm1, %v1958_v52, %v1957_v51  ;;  %v1967_v60 = vrot.slane %v1941_v44, 5  ;;  %v1969_v61 = vrot.slane %v1942_v45, 4  ;;  %v5019_v22 = vld [vmem:[%s5232_s22 + $0x18] ss:$0 sps:$4 sm:$0x44]  }
  0x6d   : > { %4719 = vmatmul.mubr.msk.bf16.vlgmr.msra.gmra.mrb[12].mxu0 %vm425_vm8, %v5529_v39  ;;  %v1952_v62 = vsel %vm401_vm5, %v1951_v49, %v1950_v58  ;;  %v1961_v63 = vsel %vm392_vm2, %v1960_v53, %v1959_v59  ;;  %v5020_v23 = vld [vmem:[%s5232_s22 + $0x1c] ss:$0 sps:$4 sm:$0x44]   ;;  %v5021_v25 = vld [vmem:[%s5232_s22 + $0x20] ss:$0 sps:$4 sm:$0x44]   ;;  %v2259_v27 = vunpack.c.l.b16 %v5013_v9  ;;  %v2260_v28 = vunpack.c.l.b16 %v5014_v10 }
  0x6e   : > { %4724 = vmatprep.mubr.msk.bf16.mxu0 %vm5170_vm0, %v5169_v0  ;;  %v1954_v1 = vsel %vm404_vm6, %v1953_v50, %v1952_v62  ;;  %v1962_v2 = vsel %vm395_vm3, %v1938_v48, %v1961_v63  ;;  %v5022_v26 = vld [vmem:[%s5232_s22 + $0x24] ss:$0 sps:$4 sm:$0x44]   ;;  %v5023_v29 = vld [vmem:[%s5232_s22 + $0x28] ss:$0 sps:$4 sm:$0x44]   ;;  %v2261_v31 = vunpack.c.l.b16 %v5015_v14  ;;  %v2262_v32 = vunpack.c.l.b16 %v5016_v16 }
  0x6f   : > { %v1964_v3 = vsel %vm398_vm4, %v1963_v56, %v1962_v2  ;;  %v1956_v11 = vsel %vm407_vm7, %v1955_v55, %v1954_v1  ;;  %v5024_v30 = vld [vmem:[%s5232_s22 + $0x2c] ss:$0 sps:$4 sm:$0x44]   ;;  %v5025_v33 = vld [vmem:[%s5232_s22 + $0x30] ss:$0 sps:$4 sm:$0x44]   ;;  %v2263_v35 = vunpack.c.l.b16 %v5017_v19  ;;  %v2264_v36 = vunpack.c.l.b16 %v5018_v20 }
  0x70   : > { %v1966_v12 = vsel %vm401_vm5, %v1965_v57, %v1964_v3  ;;  %v5026_v34 = vld [vmem:[%s5232_s22 + $0x34] ss:$0 sps:$4 sm:$0x44]   ;;  %v2265_v37 = vunpack.c.l.b16 %v5019_v22  ;;  %v5027_v38 = vld [vmem:[%s5232_s22 + $0x38] ss:$0 sps:$4 sm:$0x44]   ;;  %v2266_v41 = vunpack.c.l.b16 %v5020_v23  ;;  %v2267_v42 = vunpack.c.l.b16 %v5021_v25 }
  0x71   : > { %v1968_v18 = vsel %vm404_vm6, %v1967_v60, %v1966_v12  ;;  %v5028_v40 = vld [vmem:[%s5232_s22 + $0x3c] ss:$0 sps:$4 sm:$0x44]   ;;  %v2268_v43 = vunpack.c.l.b16 %v5022_v26  ;;  %v2269_v44 = vunpack.c.l.b16 %v5023_v29  ;;  %v2270_v45 = vunpack.c.l.b16 %v5024_v30  ;;  %v5572_v5 = vld [vmem:[%s6368_s0 + $0x4] sm:$0xf] }
  0x72   : > { %v1970_v21 = vsel %vm407_vm7, %v1969_v61, %v1968_v18  ;;  %v2272_v46 = vunpack.c.l.b16 %v5026_v34  ;;  %v2275_v47 = vrot.slane %v2259_v27, 4  ;;  %v2276_v48 = vrot.slane %v2260_v28, 3  ;;  %v5029_v18 = vld [vmem:[%s5253_s25] ss:$0 sps:$4 sm:$0x44]  }
  0x73   : > { %v5557_v24 = vpack.c.b16 %v1970_v21, %v1956_v11  ;;  %v2273_v49 = vunpack.c.l.b16 %v5027_v38  ;;  %v2274_v50 = vunpack.c.l.b16 %v5028_v40  ;;  %v2278_v7 = vrot.slane %v2261_v31, 2  ;;  %v5030_v21 = vld [vmem:[%s5253_s25 + $0x4] ss:$0 sps:$4 sm:$0x44]  }
  0x74   : > { %v2280_v51 = vrot.slane %v2262_v32, 1  ;;  %v2271_v52 = vunpack.c.l.b16 %v5025_v33  ;;  %v2277_v53 = vsel %vm389_vm1, %v2276_v48, %v2275_v47  ;;  %v2283_v54 = vrot.slane %v2264_v36, 7  ;;  %v5031_v22 = vld [vmem:[%s5253_s25 + $0x8] ss:$0 sps:$4 sm:$0x44]  }
  0x75   : > { %4723 = vmatpush3.bf16.msra.mxu0 %v5557_v24  ;;  %v2285_v55 = vrot.slane %v2265_v37, 6  ;;  %v2279_v56 = vsel %vm392_vm2, %v2278_v7, %v2277_v53  ;;  %v2289_v57 = vrot.slane %v2267_v42, 4  ;;  %v2290_v58 = vrot.slane %v2268_v43, 3  ;;  %v5032_v25 = vld [vmem:[%s5253_s25 + $0xc] ss:$0 sps:$4 sm:$0x44]  }
  0x76   : > { %4740 = vmatprep.subr.bf16.mxu0 %v5169_v0  ;;  %v2292_v59 = vrot.slane %v2269_v44, 2  ;;  %v2281_v60 = vsel %vm395_vm3, %v2280_v51, %v2279_v56  ;;  %v2287_v61 = vrot.slane %v2266_v41, 5  ;;  %v2294_v62 = vrot.slane %v2270_v45, 1  ;;  %v5033_v26 = vld [vmem:[%s5253_s25 + $0x10] ss:$0 sps:$4 sm:$0x44]  }
  0x77   : > { %v2297_v63 = vrot.slane %v2272_v46, 7  ;;  %v2282_v1 = vsel %vm398_vm4, %v2263_v35, %v2281_v60  ;;  %v2291_v2 = vsel %vm389_vm1, %v2290_v58, %v2289_v57  ;;  %v2299_v3 = vrot.slane %v2273_v49, 6  ;;  %v5034_v28 = vld [vmem:[%s5253_s25 + $0x14] ss:$0 sps:$4 sm:$0x44]  }
  0x78   : > { %v2301_v9 = vrot.slane %v2274_v50, 5  ;;  %v2284_v10 = vsel %vm401_vm5, %v2283_v54, %v2282_v1  ;;  %v2293_v11 = vsel %vm392_vm2, %v2292_v59, %v2291_v2  ;;  %v5035_v29 = vld [vmem:[%s5253_s25 + $0x18] ss:$0 sps:$4 sm:$0x44]   ;;  %v2393_v33 = vunpack.c.l.b16 %v5029_v18 }
  0x79   : > { %4725 = vmatmul.mubr.msk.bf16.vlgmr.msra.gmra.mrb[12].mxu0 %vm425_vm8, %v5572_v5  ;;  %v2286_v12 = vsel %vm404_vm6, %v2285_v55, %v2284_v10  ;;  %v2295_v14 = vsel %vm395_vm3, %v2294_v62, %v2293_v11  ;;  %v5036_v31 = vld [vmem:[%s5253_s25 + $0x1c] ss:$0 sps:$4 sm:$0x44]   ;;  %v5037_v32 = vld [vmem:[%s5253_s25 + $0x20] ss:$0 sps:$4 sm:$0x44]   ;;  %v2394_v34 = vunpack.c.l.b16 %v5030_v21  ;;  %v2395_v37 = vunpack.c.l.b16 %v5031_v22 }
  0x7a   : > { %4742 = vmatprep.mubr.msk.bf16.mxu0 %vm5170_vm0, %v5169_v0  ;;  %v2296_v16 = vsel %vm398_vm4, %v2271_v52, %v2295_v14  ;;  %v2288_v19 = vsel %vm407_vm7, %v2287_v61, %v2286_v12  ;;  %v5038_v35 = vld [vmem:[%s5253_s25 + $0x24] ss:$0 sps:$4 sm:$0x44]   ;;  %v5039_v36 = vld [vmem:[%s5253_s25 + $0x28] ss:$0 sps:$4 sm:$0x44]   ;;  %v2396_v38 = vunpack.c.l.b16 %v5032_v25  ;;  %v2397_v42 = vunpack.c.l.b16 %v5033_v26 }
  0x7b   : > { %v2298_v20 = vsel %vm401_vm5, %v2297_v63, %v2296_v16  ;;  %v5040_v40 = vld [vmem:[%s5253_s25 + $0x2c] ss:$0 sps:$4 sm:$0x44]   ;;  %v5041_v41 = vld [vmem:[%s5253_s25 + $0x30] ss:$0 sps:$4 sm:$0x44]   ;;  %v2398_v43 = vunpack.c.l.b16 %v5034_v28  ;;  %v2399_v44 = vunpack.c.l.b16 %v5035_v29  ;;  %v2400_v47 = vunpack.c.l.b16 %v5036_v31 }
  0x7c   : > { %v2300_v23 = vsel %vm404_vm6, %v2299_v3, %v2298_v20  ;;  %v5042_v45 = vld [vmem:[%s5253_s25 + $0x34] ss:$0 sps:$4 sm:$0x44]   ;;  %v5043_v46 = vld [vmem:[%s5253_s25 + $0x38] ss:$0 sps:$4 sm:$0x44]   ;;  %v2401_v48 = vunpack.c.l.b16 %v5037_v32  ;;  %v2402_v49 = vunpack.c.l.b16 %v5038_v35  ;;  %v2403_v50 = vunpack.c.l.b16 %v5039_v36 }
  0x7d   : > { %v2302_v27 = vsel %vm407_vm7, %v2301_v9, %v2300_v23  ;;  %v5044_v7 = vld [vmem:[%s5253_s25 + $0x3c] ss:$0 sps:$4 sm:$0x44]   ;;  %v2404_v51 = vunpack.c.l.b16 %v5040_v40  ;;  %v2405_v52 = vunpack.c.l.b16 %v5041_v41  ;;  %v2409_v53 = vrot.slane %v2393_v33, 4 }
  0x7e   : > { %v5599_v30 = vpack.c.b16 %v2302_v27, %v2288_v19  ;;  %v2410_v54 = vrot.slane %v2394_v34, 3  ;;  %v2406_v55 = vunpack.c.l.b16 %v5042_v45  ;;  %v2407_v56 = vunpack.c.l.b16 %v5043_v46  ;;  %v5045_v28 = vld [vmem:[%s5232_s22] ss:$0 sps:$4 sm:$0x44]  }
  0x7f   : > { %v2412_v57 = vrot.slane %v2395_v37, 2  ;;  %v2414_v58 = vrot.slane %v2396_v38, 1  ;;  %v2408_v59 = vunpack.c.l.b16 %v5044_v7  ;;  %v2417_v61 = vrot.slane %v2398_v43, 7  ;;  %v5046_v29 = vld [vmem:[%s5232_s22 + $0x4] ss:$0 sps:$4 sm:$0x44]  }
  0x80   : > { %4741 = vmatpush3.bf16.msra.mxu0 %v5599_v30  ;;  %v2411_v60 = vsel %vm389_vm1, %v2410_v54, %v2409_v53  ;;  %v2419_v62 = vrot.slane %v2399_v44, 6  ;;  %v2421_v1 = vrot.slane %v2400_v47, 5  ;;  %v2423_v2 = vrot.slane %v2401_v48, 4  ;;  %v5047_v32 = vld [vmem:[%s5232_s22 + $0x8] ss:$0 sps:$4 sm:$0x44]  }
  0x81   : > { %4746 = vmatprep.subr.bf16.mxu0 %v5169_v0  ;;  %v2413_v63 = vsel %vm392_vm2, %v2412_v57, %v2411_v60  ;;  %v2424_v3 = vrot.slane %v2402_v49, 3  ;;  %v2426_v10 = vrot.slane %v2403_v50, 2  ;;  %v2428_v11 = vrot.slane %v2404_v51, 1  ;;  %v5048_v33 = vld [vmem:[%s5232_s22 + $0xc] ss:$0 sps:$4 sm:$0x44]  }
  0x82   : > { %v2415_v9 = vsel %vm395_vm3, %v2414_v58, %v2413_v63  ;;  %v2431_v12 = vrot.slane %v2406_v55, 7  ;;  %v2433_v18 = vrot.slane %v2407_v56, 6  ;;  %v2435_v19 = vrot.slane %v2408_v59, 5  ;;  %v5049_v35 = vld [vmem:[%s5232_s22 + $0x10] ss:$0 sps:$4 sm:$0x44]  }
  0x83   : > { %4743 = vmatmul.mubr.msk.bf16.vlgmr.msra.gmra.mrb[16].mxu0 %vm425_vm8, %v5529_v39  ;;  %v2416_v14 = vsel %vm398_vm4, %v2397_v42, %v2415_v9  ;;  %v2425_v16 = vsel %vm389_vm1, %v2424_v3, %v2423_v2  ;;  %v5050_v36 = vld [vmem:[%s5232_s22 + $0x14] ss:$0 sps:$4 sm:$0x44]   ;;  %v5051_v38 = vld [vmem:[%s5232_s22 + $0x18] ss:$0 sps:$4 sm:$0x44]   ;;  %v2725_v43 = vunpack.c.l.b16 %v5045_v28  ;;  %v2726_v44 = vunpack.c.l.b16 %v5046_v29 }
  0x84   : > { %4748 = vmatprep.mubr.msk.bf16.mxu0 %vm5170_vm0, %v5169_v0  ;;  %v2418_v20 = vsel %vm401_vm5, %v2417_v61, %v2416_v14  ;;  %v2427_v21 = vsel %vm392_vm2, %v2426_v10, %v2425_v16  ;;  %v5052_v40 = vld [vmem:[%s5232_s22 + $0x1c] ss:$0 sps:$4 sm:$0x44]   ;;  %v5053_v41 = vld [vmem:[%s5232_s22 + $0x20] ss:$0 sps:$4 sm:$0x44]   ;;  %v2727_v47 = vunpack.c.l.b16 %v5047_v32  ;;  %v2728_v48 = vunpack.c.l.b16 %v5048_v33 }
  0x85   : > { %v2420_v22 = vsel %vm404_vm6, %v2419_v62, %v2418_v20  ;;  %v2429_v23 = vsel %vm395_vm3, %v2428_v11, %v2427_v21  ;;  %v5054_v42 = vld [vmem:[%s5232_s22 + $0x24] ss:$0 sps:$4 sm:$0x44]   ;;  %v5055_v45 = vld [vmem:[%s5232_s22 + $0x28] ss:$0 sps:$4 sm:$0x44]   ;;  %v2729_v7 = vunpack.c.l.b16 %v5049_v35  ;;  %v2730_v51 = vunpack.c.l.b16 %v5050_v36 }
  0x86   : > { %v2430_v25 = vsel %vm398_vm4, %v2405_v52, %v2429_v23  ;;  %v2422_v26 = vsel %vm407_vm7, %v2421_v1, %v2420_v22  ;;  %v5056_v46 = vld [vmem:[%s5232_s22 + $0x2c] ss:$0 sps:$4 sm:$0x44]   ;;  %v5057_v49 = vld [vmem:[%s5232_s22 + $0x30] ss:$0 sps:$4 sm:$0x44]   ;;  %v2731_v52 = vunpack.c.l.b16 %v5051_v38  ;;  %v2732_v55 = vunpack.c.l.b16 %v5052_v40 }
  0x87   : > { %v2432_v27 = vsel %vm401_vm5, %v2431_v12, %v2430_v25  ;;  %v5058_v50 = vld [vmem:[%s5232_s22 + $0x34] ss:$0 sps:$4 sm:$0x44]   ;;  %v5059_v53 = vld [vmem:[%s5232_s22 + $0x38] ss:$0 sps:$4 sm:$0x44]   ;;  %v2733_v56 = vunpack.c.l.b16 %v5053_v41  ;;  %v2734_v57 = vunpack.c.l.b16 %v5054_v42  ;;  %v2735_v58 = vunpack.c.l.b16 %v5055_v45 }
  0x88   : > { %v2434_v31 = vsel %vm404_vm6, %v2433_v18, %v2432_v27  ;;  %v5060_v54 = vld [vmem:[%s5232_s22 + $0x3c] ss:$0 sps:$4 sm:$0x44]   ;;  %v2736_v59 = vunpack.c.l.b16 %v5056_v46  ;;  %v2737_v60 = vunpack.c.l.b16 %v5057_v49  ;;  %v2741_v61 = vrot.slane %v2725_v43, 5 }
  0x89   : > { %v2436_v34 = vsel %vm407_vm7, %v2435_v19, %v2434_v31  ;;  %v2742_v62 = vrot.slane %v2726_v44, 4  ;;  %v2739_v63 = vunpack.c.l.b16 %v5059_v53  ;;  %v2740_v1 = vunpack.c.l.b16 %v5060_v54  ;;  %v5061_v35 = vld [vmem:[%s5253_s25] ss:$0 sps:$4 sm:$0x44]  }
  0x8a   : > { %v5636_v37 = vpack.c.b16 %v2436_v34, %v2422_v26  ;;  %v2744_v2 = vrot.slane %v2727_v47, 3  ;;  %v2746_v3 = vrot.slane %v2728_v48, 2  ;;  %v2738_v9 = vunpack.c.l.b16 %v5058_v50  ;;  %v5062_v36 = vld [vmem:[%s5253_s25 + $0x4] ss:$0 sps:$4 sm:$0x44]  }
  0x8b   : > { %v2743_v10 = vsel %vm389_vm1, %v2742_v62, %v2741_v61  ;;  %v2748_v11 = vrot.slane %v2729_v7, 1  ;;  %v2751_v12 = vrot.slane %v2731_v52, 7  ;;  %v2755_v16 = vrot.slane %v2733_v56, 5  ;;  %v5063_v41 = vld [vmem:[%s5253_s25 + $0x8] ss:$0 sps:$4 sm:$0x44]  }
  0x8c   : > { %4747 = vmatpush3.bf16.msra.mxu0 %v5636_v37  ;;  %v2745_v14 = vsel %vm392_vm2, %v2744_v2, %v2743_v10  ;;  %v2756_v18 = vrot.slane %v2734_v57, 4  ;;  %v2758_v19 = vrot.slane %v2735_v58, 3  ;;  %v2753_v21 = vrot.slane %v2732_v55, 6  ;;  %v5064_v42 = vld [vmem:[%s5253_s25 + $0xc] ss:$0 sps:$4 sm:$0x44]  }
  0x8d   : > { %4764 = vmatprep.subr.bf16.mxu0 %v5169_v0  ;;  %v2747_v20 = vsel %vm395_vm3, %v2746_v3, %v2745_v14  ;;  %v2760_v22 = vrot.slane %v2736_v59, 2  ;;  %v2762_v23 = vrot.slane %v2737_v60, 1  ;;  %v2765_v27 = vrot.slane %v2739_v63, 7  ;;  %v5065_v44 = vld [vmem:[%s5253_s25 + $0x10] ss:$0 sps:$4 sm:$0x44]  }
  0x8e   : > { %v2749_v25 = vsel %vm398_vm4, %v2748_v11, %v2747_v20  ;;  %v2757_v26 = vsel %vm389_vm1, %v2756_v18, %v2755_v16  ;;  %v2767_v28 = vrot.slane %v2740_v1, 6  ;;  %v5066_v45 = vld [vmem:[%s5253_s25 + $0x14] ss:$0 sps:$4 sm:$0x44]   ;;  %v2860_v52 = vunpack.c.l.b16 %v5062_v36 }
  0x8f   : > { %4749 = vmatmul.mubr.msk.bf16.vlgmr.msra.gmra.mrb[16].mxu0 %vm425_vm8, %v5572_v5  ;;  %v2750_v29 = vsel %vm401_vm5, %v2730_v51, %v2749_v25  ;;  %v2759_v31 = vsel %vm392_vm2, %v2758_v19, %v2757_v26  ;;  %v5067_v47 = vld [vmem:[%s5253_s25 + $0x18] ss:$0 sps:$4 sm:$0x44]   ;;  %v5068_v48 = vld [vmem:[%s5253_s25 + $0x1c] ss:$0 sps:$4 sm:$0x44]   ;;  %v2859_v51 = vunpack.c.l.b16 %v5061_v35  ;;  %v2861_v55 = vunpack.c.l.b16 %v5063_v41 }
  0x90   : > { %4766 = vmatprep.mubr.msk.bf16.mxu0 %vm5170_vm0, %v5169_v0  ;;  %v2752_v32 = vsel %vm404_vm6, %v2751_v12, %v2750_v29  ;;  %v2761_v33 = vsel %vm395_vm3, %v2760_v22, %v2759_v31  ;;  %v5069_v50 = vld [vmem:[%s5253_s25 + $0x20] ss:$0 sps:$4 sm:$0x44]   ;;  %v5070_v7 = vld [vmem:[%s5253_s25 + $0x24] ss:$0 sps:$4 sm:$0x44]   ;;  %v2862_v56 = vunpack.c.l.b16 %v5064_v42  ;;  %v2863_v59 = vunpack.c.l.b16 %v5065_v44 }
  0x91   : > { %v2763_v34 = vsel %vm398_vm4, %v2762_v23, %v2761_v33  ;;  %v2754_v38 = vsel %vm407_vm7, %v2753_v21, %v2752_v32  ;;  %v5071_v53 = vld [vmem:[%s5253_s25 + $0x28] ss:$0 sps:$4 sm:$0x44]   ;;  %v5072_v54 = vld [vmem:[%s5253_s25 + $0x2c] ss:$0 sps:$4 sm:$0x44]   ;;  %v2864_v60 = vunpack.c.l.b16 %v5066_v45  ;;  %v2865_v61 = vunpack.c.l.b16 %v5067_v47 }
  0x92   : > { %v2764_v40 = vsel %vm401_vm5, %v2738_v9, %v2763_v34  ;;  %v5073_v57 = vld [vmem:[%s5253_s25 + $0x30] ss:$0 sps:$4 sm:$0x44]   ;;  %v5074_v58 = vld [vmem:[%s5253_s25 + $0x34] ss:$0 sps:$4 sm:$0x44]   ;;  %v2866_v1 = vunpack.c.l.b16 %v5068_v48  ;;  %v2867_v2 = vunpack.c.l.b16 %v5069_v50  ;;  %v2868_v3 = vunpack.c.l.b16 %v5070_v7 }
  0x93   : > { %v2766_v43 = vsel %vm404_vm6, %v2765_v27, %v2764_v40  ;;  %v5075_v62 = vld [vmem:[%s5253_s25 + $0x38] ss:$0 sps:$4 sm:$0x44]   ;;  %v5076_v63 = vld [vmem:[%s5253_s25 + $0x3c] ss:$0 sps:$4 sm:$0x44]   ;;  %v2869_v9 = vunpack.c.l.b16 %v5071_v53  ;;  %v2870_v10 = vunpack.c.l.b16 %v5072_v54  ;;  %v2871_v11 = vunpack.c.l.b16 %v5073_v57 }
  0x94   : > { %v2768_v46 = vsel %vm407_vm7, %v2767_v28, %v2766_v43  ;;  %v2875_v12 = vrot.slane %v2859_v51, 5  ;;  %v2876_v14 = vrot.slane %v2860_v52, 4  ;;  %v2873_v16 = vunpack.c.l.b16 %v5075_v62  ;;  %v5078_v50 = vld [vmem:[%s5232_s22 + $0x4] ss:$0 sps:$4 sm:$0x88]  }
  0x95   : > { %v5676_v49 = vpack.c.b16 %v2768_v46, %v2754_v38  ;;  %v2874_v18 = vunpack.c.l.b16 %v5076_v63  ;;  %v2878_v19 = vrot.slane %v2861_v55, 3  ;;  %v2880_v20 = vrot.slane %v2862_v56, 2  ;;  %v5077_v46 = vld [vmem:[%s5232_s22] ss:$0 sps:$4 sm:$0x88]  }
  0x96   : > { %v2872_v21 = vunpack.c.l.b16 %v5074_v58  ;;  %v2877_v22 = vsel %vm389_vm1, %v2876_v14, %v2875_v12  ;;  %v2882_v23 = vrot.slane %v2863_v59, 1  ;;  %v2885_v25 = vrot.slane %v2865_v61, 7  ;;  %v5079_v7 = vld [vmem:[%s5232_s22 + $0x8] ss:$0 sps:$4 sm:$0x88]  }
  0x97   : > { %4765 = vmatpush3.bf16.msra.mxu0 %v5676_v49  ;;  %v2879_v26 = vsel %vm392_vm2, %v2878_v19, %v2877_v22  ;;  %v2889_v27 = vrot.slane %v2867_v2, 5  ;;  %v2890_v28 = vrot.slane %v2868_v3, 4  ;;  %v2892_v29 = vrot.slane %v2869_v9, 3  ;;  %v5080_v52 = vld [vmem:[%s5232_s22 + $0xc] ss:$0 sps:$4 sm:$0x88]  }
  0x98   : > { %4770 = vmatprep.subr.bf16.mxu0 %v5169_v0  ;;  %v2881_v31 = vsel %vm395_vm3, %v2880_v20, %v2879_v26  ;;  %v2887_v32 = vrot.slane %v2866_v1, 6  ;;  %v2894_v33 = vrot.slane %v2870_v10, 2  ;;  %v2896_v34 = vrot.slane %v2871_v11, 1  ;;  %v5081_v53 = vld [vmem:[%s5232_s22 + $0x10] ss:$0 sps:$4 sm:$0x88]  }
  0x99   : > { %v2883_v35 = vsel %vm398_vm4, %v2882_v23, %v2881_v31  ;;  %v2891_v36 = vsel %vm389_vm1, %v2890_v28, %v2889_v27  ;;  %v2899_v38 = vrot.slane %v2873_v16, 7  ;;  %v2901_v40 = vrot.slane %v2874_v18, 6  ;;  %v5082_v55 = vld [vmem:[%s5232_s22 + $0x14] ss:$0 sps:$4 sm:$0x88]  }
  0x9a   : > { %4767 = vmatmul.mubr.msk.bf16.vlgmr.msra.gmra.mrb[20].mxu0 %vm425_vm8, %v5529_v39  ;;  %v2884_v41 = vsel %vm401_vm5, %v2864_v60, %v2883_v35  ;;  %v2893_v42 = vsel %vm392_vm2, %v2892_v29, %v2891_v36  ;;  %v5083_v56 = vld [vmem:[%s5232_s22 + $0x18] ss:$0 sps:$4 sm:$0x88]   ;;  %v5084_v58 = vld [vmem:[%s5232_s22 + $0x1c] ss:$0 sps:$4 sm:$0x88]   ;;  %v3191_v60 = vunpack.c.l.b16 %v5077_v46  ;;  %v3192_v61 = vunpack.c.l.b16 %v5078_v50 }
  0x9b   : > { %4772 = vmatprep.mubr.msk.bf16.mxu0 %vm5170_vm0, %v5169_v0  ;;  %v2886_v43 = vsel %vm404_vm6, %v2885_v25, %v2884_v41  ;;  %v2895_v44 = vsel %vm395_vm3, %v2894_v33, %v2893_v42  ;;  %v5085_v59 = vld [vmem:[%s5232_s22 + $0x20] ss:$0 sps:$4 sm:$0x88]   ;;  %v5086_v62 = vld [vmem:[%s5232_s22 + $0x24] ss:$0 sps:$4 sm:$0x88]   ;;  %v3193_v1 = vunpack.c.l.b16 %v5079_v7  ;;  %v3194_v2 = vunpack.c.l.b16 %v5080_v52 }
  0x9c   : > { %v2897_v45 = vsel %vm398_vm4, %v2896_v34, %v2895_v44  ;;  %v2888_v47 = vsel %vm407_vm7, %v2887_v32, %v2886_v43  ;;  %v5087_v63 = vld [vmem:[%s5232_s22 + $0x28] ss:$0 sps:$4 sm:$0x88]   ;;  %v5088_v3 = vld [vmem:[%s5232_s22 + $0x2c] ss:$0 sps:$4 sm:$0x88]   ;;  %v3195_v10 = vunpack.c.l.b16 %v5081_v53  ;;  %v3196_v11 = vunpack.c.l.b16 %v5082_v55 }
  0x9d   : > { %v2898_v48 = vsel %vm401_vm5, %v2872_v21, %v2897_v45  ;;  %v5089_v9 = vld [vmem:[%s5232_s22 + $0x30] ss:$0 sps:$4 sm:$0x88]   ;;  %v5090_v12 = vld [vmem:[%s5232_s22 + $0x34] ss:$0 sps:$4 sm:$0x88]   ;;  %v3198_v14 = vunpack.c.l.b16 %v5084_v58  ;;  %v3199_v16 = vunpack.c.l.b16 %v5085_v59  ;;  %v3200_v18 = vunpack.c.l.b16 %v5086_v62 }
  0x9e   : > { %v2900_v51 = vsel %vm404_vm6, %v2899_v38, %v2898_v48  ;;  %v3201_v19 = vunpack.c.l.b16 %v5087_v63  ;;  %v5091_v20 = vld [vmem:[%s5232_s22 + $0x38] ss:$0 sps:$4 sm:$0x88]   ;;  %v5092_v21 = vld [vmem:[%s5232_s22 + $0x3c] ss:$0 sps:$4 sm:$0x88]   ;;  %v3202_v22 = vunpack.c.l.b16 %v5088_v3  ;;  %v3203_v23 = vunpack.c.l.b16 %v5089_v9 }
  0x9f   : > { %v2902_v54 = vsel %vm407_vm7, %v2901_v40, %v2900_v51  ;;  %v3207_v25 = vrot.slane %v3191_v60, 6  ;;  %v3208_v26 = vrot.slane %v3192_v61, 5  ;;  %v3197_v27 = vunpack.c.l.b16 %v5083_v56  ;;  %v5093_v59 = vld [vmem:[%s5253_s25] ss:$0 sps:$4 sm:$0x88]  }
  0xa0   : > { %v5713_v57 = vpack.c.b16 %v2902_v54, %v2888_v47  ;;  %v3204_v28 = vunpack.c.l.b16 %v5090_v12  ;;  %v3210_v29 = vrot.slane %v3193_v1, 4  ;;  %v3212_v31 = vrot.slane %v3194_v2, 3  ;;  %v5094_v60 = vld [vmem:[%s5253_s25 + $0x4] ss:$0 sps:$4 sm:$0x88]  }
  0xa1   : > { %v3206_v32 = vunpack.c.l.b16 %v5092_v21  ;;  %v3209_v33 = vsel %vm389_vm1, %v3208_v26, %v3207_v25  ;;  %v3214_v34 = vrot.slane %v3195_v10, 2  ;;  %v3216_v35 = vrot.slane %v3196_v11, 1  ;;  %v5095_v62 = vld [vmem:[%s5253_s25 + $0x8] ss:$0 sps:$4 sm:$0x88]  }
  0xa2   : > { %4771 = vmatpush3.bf16.msra.mxu0 %v5713_v57  ;;  %v3211_v36 = vsel %vm392_vm2, %v3210_v29, %v3209_v33  ;;  %v3219_v38 = vrot.slane %v3198_v14, 7  ;;  %v3221_v40 = vrot.slane %v3199_v16, 6  ;;  %v3222_v41 = vrot.slane %v3200_v18, 5  ;;  %v5096_v63 = vld [vmem:[%s5253_s25 + $0xc] ss:$0 sps:$4 sm:$0x88]  }
  0xa3   : > { %4788 = vmatprep.subr.bf16.mxu0 %v5169_v0  ;;  %v3213_v42 = vsel %vm395_vm3, %v3212_v31, %v3211_v36  ;;  %v3224_v43 = vrot.slane %v3201_v19, 4  ;;  %v3226_v44 = vrot.slane %v3202_v22, 3  ;;  %v3228_v45 = vrot.slane %v3203_v23, 2  ;;  %v5097_v2 = vld [vmem:[%s5253_s25 + $0x10] ss:$0 sps:$4 sm:$0x88]  }
  0xa4   : > { %v3215_v46 = vsel %vm398_vm4, %v3214_v34, %v3213_v42  ;;  %v3223_v47 = vsel %vm389_vm1, %v3222_v41, %v3221_v40  ;;  %v3230_v48 = vrot.slane %v3204_v28, 1  ;;  %v3233_v50 = vrot.slane %v3206_v32, 7  ;;  %v5098_v3 = vld [vmem:[%s5253_s25 + $0x14] ss:$0 sps:$4 sm:$0x88]  }
  0xa5   : > { %v3205_v7 = vunpack.c.l.b16 %v5091_v20  ;;  %v3217_v51 = vsel %vm401_vm5, %v3216_v35, %v3215_v46  ;;  %v3225_v52 = vsel %vm392_vm2, %v3224_v43, %v3223_v47  ;;  %v5100_v10 = vld [vmem:[%s5253_s25 + $0x1c] ss:$0 sps:$4 sm:$0x88]   ;;  %v5099_v11 = vld [vmem:[%s5253_s25 + $0x18] ss:$0 sps:$4 sm:$0x88]   ;;  %v3325_v16 = vunpack.c.l.b16 %v5093_v59 }
  0xa6   : > { %4773 = vmatmul.mubr.msk.bf16.vlgmr.msra.gmra.mrb[20].mxu0 %vm425_vm8, %v5572_v5  ;;  %v3218_v53 = vsel %vm404_vm6, %v3197_v27, %v3217_v51  ;;  %v3227_v54 = vsel %vm395_vm3, %v3226_v44, %v3225_v52  ;;  %v5101_v12 = vld [vmem:[%s5253_s25 + $0x20] ss:$0 sps:$4 sm:$0x88]   ;;  %v5102_v14 = vld [vmem:[%s5253_s25 + $0x24] ss:$0 sps:$4 sm:$0x88]   ;;  %v3326_v18 = vunpack.c.l.b16 %v5094_v60  ;;  %v3327_v21 = vunpack.c.l.b16 %v5095_v62 }
  0xa7   : > { %4790 = vmatprep.mubr.msk.bf16.mxu0 %vm5170_vm0, %v5169_v0  ;;  %v3229_v55 = vsel %vm398_vm4, %v3228_v45, %v3227_v54  ;;  %v3220_v56 = vsel %vm407_vm7, %v3219_v38, %v3218_v53  ;;  %v5103_v19 = vld [vmem:[%s5253_s25 + $0x28] ss:$0 sps:$4 sm:$0x88]   ;;  %v5104_v20 = vld [vmem:[%s5253_s25 + $0x2c] ss:$0 sps:$4 sm:$0x88]   ;;  %v3328_v22 = vunpack.c.l.b16 %v5096_v63  ;;  %v3329_v26 = vunpack.c.l.b16 %v5097_v2 }
  0xa8   : > { %v3231_v58 = vsel %vm401_vm5, %v3230_v48, %v3229_v55  ;;  %v5105_v23 = vld [vmem:[%s5253_s25 + $0x30] ss:$0 sps:$4 sm:$0x88]   ;;  %v5106_v25 = vld [vmem:[%s5253_s25 + $0x34] ss:$0 sps:$4 sm:$0x88]   ;;  %v3330_v27 = vunpack.c.l.b16 %v5098_v3  ;;  %v3332_v29 = vunpack.c.l.b16 %v5100_v10  ;;  %v3333_v31 = vunpack.c.l.b16 %v5101_v12 }
  0xa9   : > { %v3232_v61 = vsel %vm404_vm6, %v3205_v7, %v3231_v58  ;;  %v5108_v28 = vld [vmem:[%s5253_s25 + $0x3c] ss:$0 sps:$4 sm:$0x88]   ;;  %v3334_v32 = vunpack.c.l.b16 %v5102_v14  ;;  %v3335_v33 = vunpack.c.l.b16 %v5103_v19  ;;  %v5107_v34 = vld [vmem:[%s5253_s25 + $0x38] ss:$0 sps:$4 sm:$0x88]   ;;  %v3336_v35 = vunpack.c.l.b16 %v5104_v20 }
  0xaa   : > { %v3234_v1 = vsel %vm407_vm7, %v3233_v50, %v3232_v61  ;;  %v3337_v36 = vunpack.c.l.b16 %v5105_v23  ;;  %v3341_v38 = vrot.slane %v3325_v16, 6  ;;  %v3342_v40 = vrot.slane %v3326_v18, 5  ;;  %v5109_v10 = vld [vmem:[%s5232_s22] ss:$0 sps:$4 sm:$0x88]  }
  0xab   : > { %v5750_v9 = vpack.c.b16 %v3234_v1, %v3220_v56  ;;  %v3338_v41 = vunpack.c.l.b16 %v5106_v25  ;;  %v3340_v42 = vunpack.c.l.b16 %v5108_v28  ;;  %v3344_v43 = vrot.slane %v3327_v21, 4  ;;  %v5111_v16 = vld [vmem:[%s5232_s22 + $0x8] ss:$0 sps:$4 sm:$0x88]  }
  0xac   : > { %v3346_v44 = vrot.slane %v3328_v22, 3  ;;  %v3331_v45 = vunpack.c.l.b16 %v5099_v11  ;;  %v3343_v46 = vsel %vm389_vm1, %v3342_v40, %v3341_v38  ;;  %v3348_v47 = vrot.slane %v3329_v26, 2  ;;  %v5110_v11 = vld [vmem:[%s5232_s22 + $0x4] ss:$0 sps:$4 sm:$0x88]  }
  0xad   : > { %4789 = vmatpush3.bf16.msra.mxu0 %v5750_v9  ;;  %v3350_v48 = vrot.slane %v3330_v27, 1  ;;  %v3345_v50 = vsel %vm392_vm2, %v3344_v43, %v3343_v46  ;;  %v3356_v7 = vrot.slane %v3334_v32, 5  ;;  %v3358_v51 = vrot.slane %v3335_v33, 4  ;;  %v5112_v18 = vld [vmem:[%s5232_s22 + $0xc] ss:$0 sps:$4 sm:$0x88]  }
  0xae   : > { %4794 = vmatprep.subr.bf16.mxu0 %v5169_v0  ;;  %v3347_v52 = vsel %vm395_vm3, %v3346_v44, %v3345_v50  ;;  %v3353_v53 = vrot.slane %v3332_v29, 7  ;;  %v3360_v54 = vrot.slane %v3336_v35, 3  ;;  %v3362_v55 = vrot.slane %v3337_v36, 2  ;;  %v5113_v20 = vld [vmem:[%s5232_s22 + $0x10] ss:$0 sps:$4 sm:$0x88]  }
  0xaf   : > { %v3349_v56 = vsel %vm398_vm4, %v3348_v47, %v3347_v52  ;;  %v3364_v59 = vrot.slane %v3338_v41, 1  ;;  %v3367_v60 = vrot.slane %v3340_v42, 7  ;;  %v3339_v61 = vunpack.c.l.b16 %v5107_v34  ;;  %v5114_v21 = vld [vmem:[%s5232_s22 + $0x14] ss:$0 sps:$4 sm:$0x88]  }
  0xb0   : > { %4791 = vmatmul.mubr.msk.bf16.vlgmr.msra.gmra.mrb[24].mxu0 %vm425_vm8, %v5529_v39  ;;  %v3355_v39 = vrot.slane %v3333_v31, 6  ;;  %v3351_v62 = vsel %vm401_vm5, %v3350_v48, %v3349_v56  ;;  %v5115_v23 = vld [vmem:[%s5232_s22 + $0x18] ss:$0 sps:$4 sm:$0x88]   ;;  %v3657_v28 = vunpack.c.l.b16 %v5109_v10  ;;  %v3658_v29 = vunpack.c.l.b16 %v5110_v11 }
  0xb1   : > { %4796 = vmatprep.mubr.msk.bf16.mxu0 %vm5170_vm0, %v5169_v0  ;;  %v3352_v1 = vsel %vm404_vm6, %v3331_v45, %v3351_v62  ;;  %v5117_v26 = vld [vmem:[%s5232_s22 + $0x20] ss:$0 sps:$4 sm:$0x88]   ;;  %v5118_v27 = vld [vmem:[%s5232_s22 + $0x24] ss:$0 sps:$4 sm:$0x88]   ;;  %v3659_v33 = vunpack.c.l.b16 %v5111_v16  ;;  %v3660_v34 = vunpack.c.l.b16 %v5112_v18  ;;  %v3661_v38 = vunpack.c.l.b16 %v5113_v20 }
  0xb2   : > { %v3357_v58 = vsel %vm389_vm1, %v3356_v7, %v3355_v39  ;;  %v3354_v12 = vsel %vm407_vm7, %v3353_v53, %v3352_v1  ;;  %v5119_v31 = vld [vmem:[%s5232_s22 + $0x28] ss:$0 sps:$4 sm:$0x88]   ;;  %v5120_v32 = vld [vmem:[%s5232_s22 + $0x2c] ss:$0 sps:$4 sm:$0x88]   ;;  %v3662_v40 = vunpack.c.l.b16 %v5114_v21  ;;  %v3663_v41 = vunpack.c.l.b16 %v5115_v23 }
  0xb3   : > { %v3359_v63 = vsel %vm392_vm2, %v3358_v51, %v3357_v58  ;;  %v5121_v35 = vld [vmem:[%s5232_s22 + $0x30] ss:$0 sps:$4 sm:$0x88]   ;;  %v5122_v36 = vld [vmem:[%s5232_s22 + $0x34] ss:$0 sps:$4 sm:$0x88]   ;;  %v3665_v44 = vunpack.c.l.b16 %v5117_v26  ;;  %v3666_v45 = vunpack.c.l.b16 %v5118_v27  ;;  %v3667_v46 = vunpack.c.l.b16 %v5119_v31 }
  0xb4   : > { %v3361_v2 = vsel %vm395_vm3, %v3360_v54, %v3359_v63  ;;  %v5116_v42 = vld [vmem:[%s5232_s22 + $0x1c] ss:$0 sps:$4 sm:$0x88]   ;;  %v5123_v43 = vld [vmem:[%s5232_s22 + $0x38] ss:$0 sps:$4 sm:$0x88]   ;;  %v3668_v47 = vunpack.c.l.b16 %v5120_v32  ;;  %v3669_v48 = vunpack.c.l.b16 %v5121_v35  ;;  %v3670_v51 = vunpack.c.l.b16 %v5122_v36 }
  0xb5   : > { %v3363_v3 = vsel %vm398_vm4, %v3362_v55, %v3361_v2  ;;  %v3673_v50 = vrot.slane %v3657_v28, 7  ;;  %v3674_v39 = vrot.slane %v3658_v29, 6  ;;  %v5124_v7 = vld [vmem:[%s5232_s22 + $0x3c] ss:$0 sps:$4 sm:$0x88]   ;;  %v3671_v52 = vunpack.c.l.b16 %v5123_v43  ;;  %s5172_s22 = smov 127  }
  0xb6   : > { %v3365_v14 = vsel %vm401_vm5, %v3364_v59, %v3363_v3  ;;  %v3676_v53 = vrot.slane %v3659_v33, 5  ;;  %v3678_v54 = vrot.slane %v3660_v34, 4  ;;  %v3680_v56 = vrot.slane %v3661_v38, 3  ;;  %v5125_v23 = vld [vmem:[%s5253_s25] ss:$0 sps:$4 sm:$0x88]  }
  0xb7   : > { %v3366_v19 = vsel %vm404_vm6, %v3339_v61, %v3365_v14  ;;  %v3675_v55 = vsel %vm389_vm1, %v3674_v39, %v3673_v50  ;;  %v3682_v58 = vrot.slane %v3662_v40, 2  ;;  %v3684_v59 = vrot.slane %v3663_v41, 1  ;;  %v5126_v28 = vld [vmem:[%s5253_s25 + $0x4] ss:$0 sps:$4 sm:$0x88]  }
  0xb8   : > { %v3368_v22 = vsel %vm407_vm7, %v3367_v60, %v3366_v19  ;;  %v3677_v60 = vsel %vm392_vm2, %v3676_v53, %v3675_v55  ;;  %v3687_v61 = vrot.slane %v3665_v44, 7  ;;  %v3688_v62 = vrot.slane %v3666_v45, 6  ;;  %v5127_v29 = vld [vmem:[%s5253_s25 + $0x8] ss:$0 sps:$4 sm:$0x88]  }
  0xb9   : > { %v5789_v25 = vpack.c.b16 %v3368_v22, %v3354_v12  ;;  %v3690_v63 = vrot.slane %v3667_v46, 5  ;;  %v3679_v1 = vsel %vm395_vm3, %v3678_v54, %v3677_v60  ;;  %v3692_v2 = vrot.slane %v3668_v47, 4  ;;  %v5128_v32 = vld [vmem:[%s5253_s25 + $0xc] ss:$0 sps:$4 sm:$0x88]  }
  0xba   : > { %v3694_v3 = vrot.slane %v3669_v48, 3  ;;  %v3681_v10 = vsel %vm398_vm4, %v3680_v56, %v3679_v1  ;;  %v3689_v11 = vsel %vm389_vm1, %v3688_v62, %v3687_v61  ;;  %v3696_v12 = vrot.slane %v3670_v51, 2  ;;  %v5129_v33 = vld [vmem:[%s5253_s25 + $0x10] ss:$0 sps:$4 sm:$0x88]  }
  0xbb   : > { %4795 = vmatpush3.bf16.msra.mxu0 %v5789_v25  ;;  %v3698_v14 = vrot.slane %v3671_v52, 1  ;;  %v3683_v16 = vsel %vm401_vm5, %v3682_v58, %v3681_v10  ;;  %v3691_v18 = vsel %vm392_vm2, %v3690_v63, %v3689_v11  ;;  %v3672_v19 = vunpack.c.l.b16 %v5124_v7  ;;  %v5130_v35 = vld [vmem:[%s5253_s25 + $0x14] ss:$0 sps:$4 sm:$0x88]   ;;  %v5143_v62 = vld [vmem:[%s6368_s0 + $0xc] sm:$0xf] }
  0xbc   : > { %4812 = vmatprep.subr.bf16.mxu0 %v5169_v0  ;;  %v3685_v20 = vsel %vm404_vm6, %v3684_v59, %v3683_v16  ;;  %v3693_v21 = vsel %vm395_vm3, %v3692_v2, %v3691_v18  ;;  %v5131_v36 = vld [vmem:[%s5253_s25 + $0x18] ss:$0 sps:$4 sm:$0x88]   ;;  %v5133_v40 = vld [vmem:[%s5253_s25 + $0x20] ss:$0 sps:$4 sm:$0x88]   ;;  %v3791_v41 = vunpack.c.l.b16 %v5125_v23  ;;  %v3793_v45 = vunpack.c.l.b16 %v5127_v29 }
  0xbd   : > { %v3695_v22 = vsel %vm398_vm4, %v3694_v3, %v3693_v21  ;;  %v5134_v43 = vld [vmem:[%s5253_s25 + $0x24] ss:$0 sps:$4 sm:$0x88]   ;;  %v5135_v44 = vld [vmem:[%s5253_s25 + $0x28] ss:$0 sps:$4 sm:$0x88]   ;;  %v3794_v46 = vunpack.c.l.b16 %v5128_v32  ;;  %v3795_v50 = vunpack.c.l.b16 %v5129_v33  ;;  %v3796_v39 = vunpack.c.l.b16 %v5130_v35 }
  0xbe   : > { %4797 = vmatmul.mubr.msk.bf16.vlgmr.msra.gmra.mrb[24].mxu0 %vm425_vm8, %v5572_v5  ;;  %v3664_v5 = vunpack.c.l.b16 %v5116_v42  ;;  %v3697_v27 = vsel %vm401_vm5, %v3696_v12, %v3695_v22  ;;  %v3792_v42 = vunpack.c.l.b16 %v5126_v28  ;;  %v5136_v47 = vld [vmem:[%s5253_s25 + $0x2c] ss:$0 sps:$4 sm:$0x88]   ;;  %v5137_v48 = vld [vmem:[%s5253_s25 + $0x30] ss:$0 sps:$4 sm:$0x88]   ;;  %v3797_v52 = vunpack.c.l.b16 %v5131_v36 }
  0xbf   : > { %4814 = vmatprep.mubr.msk.bf16.mxu0 %vm5170_vm0, %v5169_v0  ;;  %v3699_v31 = vsel %vm404_vm6, %v3698_v14, %v3697_v27  ;;  %v5138_v7 = vld [vmem:[%s5253_s25 + $0x34] ss:$0 sps:$4 sm:$0x88]   ;;  %v5139_v51 = vld [vmem:[%s5253_s25 + $0x38] ss:$0 sps:$4 sm:$0x88]   ;;  %v3799_v53 = vunpack.c.l.b16 %v5133_v40  ;;  %v3800_v54 = vunpack.c.l.b16 %v5134_v43  ;;  %v3801_v55 = vunpack.c.l.b16 %v5135_v44 }
  0xc0   : > { %v3686_v26 = vsel %vm407_vm7, %v3664_v5, %v3685_v20  ;;  %v3700_v34 = vsel %vm407_vm7, %v3672_v19, %v3699_v31  ;;  %v3802_v56 = vunpack.c.l.b16 %v5136_v47  ;;  %v3803_v58 = vunpack.c.l.b16 %v5137_v48  ;;  %v5132_v63 = vld [vmem:[%s5253_s25 + $0x1c] ss:$0 sps:$4 sm:$0x88]  }
  0xc1   : > { %v5827_v38 = vpack.c.b16 %v3700_v34, %v3686_v26  ;;  %v3807_v59 = vrot.slane %v3791_v41, 7  ;;  %v3808_v60 = vrot.slane %v3792_v42, 6  ;;  %v3804_v5 = vunpack.c.l.b16 %v5138_v7  ;;  %v5140_v10 = vld [vmem:[%s5253_s25 + $0x3c] ss:$0 sps:$4 sm:$0x88]   ;;  %s6065_s25 = scalar_lea.vmem %s6371_s3, %s5226_s19  ;;  %s4271_s19 = sshll.u32 %s6378_s15, 3 }
  0xc2   : > { %v3810_v1 = vrot.slane %v3793_v45, 5  ;;  %v3812_v2 = vrot.slane %v3794_v46, 4  ;;  %v3805_v11 = vunpack.c.l.b16 %v5139_v51  ;;  %v3814_v14 = vrot.slane %v3795_v50, 3  ;;  %s6302_s28 = scalar_lea.vmem %s6372_s4, %s4271_s19 }
  0xc3   : > { %4813 = vmatpush3.bf16.msra.mxu0 %v5827_v38  ;;  %v3809_v12 = vsel %vm389_vm1, %v3808_v60, %v3807_v59  ;;  %v3816_v16 = vrot.slane %v3796_v39, 2  ;;  %v3818_v20 = vrot.slane %v3797_v52, 1  ;;  %v3821_v21 = vrot.slane %v3799_v53, 7  ;;  %v5144_v39 = vld [vmem:[%s6368_s0 + $0x4] sm:$0xf] }
  0xc4   : > { %4818 = vmatprep.subr.bf16.mxu0 %v5169_v0  ;;  %v3811_v19 = vsel %vm392_vm2, %v3810_v1, %v3809_v12  ;;  %v3822_v22 = vrot.slane %v3800_v54, 6  ;;  %v3824_v27 = vrot.slane %v3801_v55, 5  ;;  %v3826_v28 = vrot.slane %v3802_v56, 4  ;;  %v5882_v59 = vld [vmem:[%s6368_s0 + $0x8] sm:$0xf] }
  0xc5   : > { %v3813_v26 = vsel %vm395_vm3, %v3812_v2, %v3811_v19  ;;  %v3828_v29 = vrot.slane %v3803_v58, 3  ;;  %v3798_v31 = vunpack.c.l.b16 %v5132_v63  ;;  %v3830_v34 = vrot.slane %v3804_v5, 2  ;;  %4635 = vmatmul.mubr.msk.bf16.vlgmr.msra.gmra.mrb[0].mxu1 %vm425_vm8, %v5882_v59  ;;  %v5897_v1 = vld [vmem:[%s6368_s0] sm:$0xf]  ;;  %277 = vst.msk [vmem:[%s6302_s28] sm:$0x1] %vm276_vm12, %v5169_v0 }
  0xc6   : > { %4815 = vmatmul.mubr.msk.bf16.vlgmr.msra.gmra.mrb[28].mxu0 %vm425_vm8, %v5143_v62  ;;  %v3815_v32 = vsel %vm398_vm4, %v3814_v14, %v3813_v26  ;;  %v3823_v33 = vsel %vm389_vm1, %v3822_v22, %v3821_v21  ;;  %v3832_v40 = vrot.slane %v3805_v11, 1  ;;  %v3806_v41 = vunpack.c.l.b16 %v5140_v10  ;;  %4639 = vmatpush3.bf16.msra.mxu1 %v5319_v6  ;;  %278 = vst.msk [vmem:[%s6302_s28 + $0x1] sm:$0x1] %vm276_vm12, %v5169_v0 }
  0xc7   : > { %4820 = vmatprep.mubr.msk.bf16.mxu0 %vm5170_vm0, %v5169_v0  ;;  %v3817_v35 = vsel %vm401_vm5, %v3816_v16, %v3815_v32  ;;  %v3825_v36 = vsel %vm392_vm2, %v3824_v27, %v3823_v33  ;;  %4640 = vmatprep.mubr.msk.bf16.mxu1 %vm5170_vm0, %v5169_v0  ;;  %279 = vst.msk [vmem:[%s6302_s28 + $0x2] sm:$0x1] %vm276_vm12, %v5169_v0  ;;  %280 = vst.msk [vmem:[%s6302_s28 + $0x3] sm:$0x1] %vm276_vm12, %v5169_v0 }
  0xc8   : > { %v3819_v42 = vsel %vm404_vm6, %v3818_v20, %v3817_v35  ;;  %v3827_v43 = vsel %vm395_vm3, %v3826_v28, %v3825_v36  ;;  %4656 = vmatprep.subr.bf16.mxu1 %v5169_v0  ;;  %281 = vst.msk [vmem:[%s6302_s28 + $0x4] sm:$0x1] %vm276_vm12, %v5169_v0  ;;  %282 = vst.msk [vmem:[%s6302_s28 + $0x5] sm:$0x1] %vm276_vm12, %v5169_v0 }
  0xc9   : > { %v3829_v44 = vsel %vm398_vm4, %v3828_v29, %v3827_v43  ;;  %v3820_v45 = vsel %vm407_vm7, %v3798_v31, %v3819_v42  ;;  %283 = vst.msk [vmem:[%s6302_s28 + $0x6] sm:$0x1] %vm276_vm12, %v5169_v0  ;;  %284 = vst.msk [vmem:[%s6302_s28 + $0x7] sm:$0x1] %vm276_vm12, %v5169_v0 }
  0xca   : > { %v3831_v46 = vsel %vm401_vm5, %v3830_v34, %v3829_v44 }
  0xcb   : > { %v3833_v47 = vsel %vm404_vm6, %v3832_v40, %v3831_v46 }
  0xcc   : > { %v3834_v48 = vsel %vm407_vm7, %v3806_v41, %v3833_v47 }
  0xcd   : > { %v5864_v50 = vpack.c.b16 %v3834_v48, %v3820_v45  ;;  %4641 = vmatmul.mubr.msk.bf16.vlgmr.msra.gmra.mrb[4].mxu1 %vm425_vm8, %v5897_v1 }
  0xce   : > { %4657 = vmatpush3.bf16.msra.mxu1 %v5361_v4  ;;  %4658 = vmatprep.mubr.msk.bf16.mxu1 %vm5170_vm0, %v5169_v0 }
  0xcf   : > { %4819 = vmatpush3.bf16.msra.mxu0 %v5864_v50  ;;  %4662 = vmatprep.subr.bf16.mxu1 %v5169_v0 }
  0xd2   : > { %4821 = vmatmul.mubr.msk.bf16.vlgmr.msra.gmra.mrb[28].mxu0 %vm425_vm8, %v5144_v39 }
  0xd5   : > { %4659 = vmatmul.mubr.msk.bf16.vlgmr.msra.gmra.mrb[8].mxu1 %vm425_vm8, %v5882_v59 }
  0xd6   : > { %4663 = vmatpush3.bf16.msra.mxu1 %v5398_v8  ;;  %4664 = vmatprep.mubr.msk.bf16.mxu1 %vm5170_vm0, %v5169_v0 }
  0xd7   : > { %4680 = vmatprep.subr.bf16.mxu1 %v5169_v0 }
  0xdd   : > { %4665 = vmatmul.mubr.msk.bf16.vlgmr.msra.gmra.mrb[12].mxu1 %vm425_vm8, %v5897_v1 }
  0xde   : > { %4681 = vmatpush3.bf16.msra.mxu1 %v5438_v13  ;;  %4682 = vmatprep.mubr.msk.bf16.mxu1 %vm5170_vm0, %v5169_v0 }
  0xdf   : > { %4686 = vmatprep.subr.bf16.mxu1 %v5169_v0 }
  0xe5   : > { %4683 = vmatmul.mubr.msk.bf16.vlgmr.msra.gmra.mrb[16].mxu1 %vm425_vm8, %v5882_v59 }
  0xe6   : > { %4687 = vmatpush3.bf16.msra.mxu1 %v5475_v15  ;;  %4688 = vmatprep.mubr.msk.bf16.mxu1 %vm5170_vm0, %v5169_v0 }
  0xe7   : > { %4704 = vmatprep.subr.bf16.mxu1 %v5169_v0 }
  0xed   : > { %4689 = vmatmul.mubr.msk.bf16.vlgmr.msra.gmra.mrb[20].mxu1 %vm425_vm8, %v5897_v1 }
  0xee   : > { %4705 = vmatpush3.bf16.msra.mxu1 %v5512_v17  ;;  %4706 = vmatprep.mubr.msk.bf16.mxu1 %vm5170_vm0, %v5169_v0 }
  0xef   : > { %4710 = vmatprep.subr.bf16.mxu1 %v5169_v0 }
  0xf5   : > { %4707 = vmatmul.mubr.msk.bf16.vlgmr.msra.gmra.mrb[24].mxu1 %vm425_vm8, %v5882_v59 }
  0xf6   : > { %4711 = vmatpush3.bf16.msra.mxu1 %v5557_v24  ;;  %4712 = vmatprep.mubr.msk.bf16.mxu1 %vm5170_vm0, %v5169_v0 }
  0xf7   : > { %4728 = vmatprep.subr.bf16.mxu1 %v5169_v0 }
  0xfd   : > { %4713 = vmatmul.mubr.msk.bf16.vlgmr.msra.gmra.mrb[28].mxu1 %vm425_vm8, %v5897_v1 }
  0xfe   : > { %4729 = vmatpush3.bf16.msra.mxu1 %v5599_v30  ;;  %4730 = vmatprep.mubr.msk.bf16.mxu1 %vm5170_vm0, %v5169_v0 }
  0xff   : > { %4734 = vmatprep.subr.bf16.mxu1 %v5169_v0 }
 0x105   : > { %4731 = vmatmul.mubr.msk.bf16.vlgmr.msra.gmra.mrb[32].mxu1 %vm425_vm8, %v5882_v59 }
 0x106   : > { %4735 = vmatpush3.bf16.msra.mxu1 %v5636_v37  ;;  %4736 = vmatprep.mubr.msk.bf16.mxu1 %vm5170_vm0, %v5169_v0 }
 0x107   : > { %4752 = vmatprep.subr.bf16.mxu1 %v5169_v0 }
 0x108   : > { %v5838_v61 = vpop.f32.mrb[0].mxu0 }
 0x109   : > { %693 = vrot.lane.b32.xlu0 %v5838_v61, %s5171_s10  ;;  %v4654_v3 = vpop.f32.mrb[1].mxu0 }
 0x10a   : > { %v689_v18 = vpop.f32.mrb[2].mxu0 }
 0x10b   : > { %v4655_v23 = vpop.f32.mrb[3].mxu0 }
 0x10d   : > { %4737 = vmatmul.mubr.msk.bf16.vlgmr.msra.gmra.mrb[36].mxu1 %vm425_vm8, %v5897_v1 }
 0x10e   : > { %4753 = vmatpush3.bf16.msra.mxu1 %v5676_v49  ;;  %4754 = vmatprep.mubr.msk.bf16.mxu1 %vm5170_vm0, %v5169_v0 }
 0x10f   : > { %4758 = vmatprep.subr.bf16.mxu1 %v5169_v0 }
 0x115   : > { %4755 = vmatmul.mubr.msk.bf16.vlgmr.msra.gmra.mrb[40].mxu1 %vm425_vm8, %v5882_v59 }
 0x116   : > { %4759 = vmatpush3.bf16.msra.mxu1 %v5713_v57  ;;  %4760 = vmatprep.mubr.msk.bf16.mxu1 %vm5170_vm0, %v5169_v0 }
 0x117   : > { %4776 = vmatprep.subr.bf16.mxu1 %v5169_v0 }
 0x11d   : > { %4761 = vmatmul.mubr.msk.bf16.vlgmr.msra.gmra.mrb[44].mxu1 %vm425_vm8, %v5897_v1 }
 0x11e   : > { %v5871_v7 = vpop.f32.mrb[4].mxu0  ;;  %4777 = vmatpush3.bf16.msra.mxu1 %v5750_v9  ;;  %4778 = vmatprep.mubr.msk.bf16.mxu1 %vm5170_vm0, %v5169_v0 }
 0x11f   : > { %1161 = vrot.lane.b32.xlu0 %v5871_v7, %s5171_s10  ;;  %v4678_v51 = vpop.f32.mrb[5].mxu0  ;;  %4782 = vmatprep.subr.bf16.mxu1 %v5169_v0 }
 0x120   : > { %v1158_v52 = vpop.f32.mrb[6].mxu0 }
 0x121   : > { %v4679_v53 = vpop.f32.mrb[7].mxu0 }
 0x125   : > { %4779 = vmatmul.mubr.msk.bf16.vlgmr.msra.gmra.mrb[48].mxu1 %vm425_vm8, %v5882_v59 }
 0x126   : > { %4783 = vmatpush3.bf16.msra.mxu1 %v5789_v25  ;;  %4784 = vmatprep.mubr.msk.bf16.mxu1 %vm5170_vm0, %v5169_v0 }
 0x127   : > { %4800 = vmatprep.subr.bf16.mxu1 %v5169_v0 }
 0x12d   : > { %4785 = vmatmul.mubr.msk.bf16.vlgmr.msra.gmra.mrb[52].mxu1 %vm425_vm8, %v5897_v1 }
 0x12e   : > { %4801 = vmatpush3.bf16.msra.mxu1 %v5827_v38  ;;  %4802 = vmatprep.mubr.msk.bf16.mxu1 %vm5170_vm0, %v5169_v0 }
 0x12f   : > { %4806 = vmatprep.subr.bf16.mxu1 %v5169_v0 }
 0x135   : > { %v5875_v54 = vpop.f32.mrb[8].mxu0  ;;  %4803 = vmatmul.mubr.msk.bf16.vlgmr.msra.gmra.mrb[56].mxu1 %vm425_vm8, %v5882_v59 }
 0x136   : > { %1627 = vrot.lane.b32.xlu1 %v5875_v54, %s5171_s10  ;;  %v4702_v55 = vpop.f32.mrb[9].mxu0  ;;  %4807 = vmatpush3.bf16.msra.mxu1 %v5864_v50 }
 0x137   : > { %v1624_v56 = vpop.f32.mrb[10].mxu0  ;;  %4808 = vmatprep.mubr.msk.bf16.mxu1 %vm5170_vm0, %v5169_v0 }
 0x138   : > { %v4703_v58 = vpop.f32.mrb[11].mxu0 }
 0x13d   : > { %4809 = vmatmul.mubr.msk.bf16.vlgmr.msra.gmra.mrb[60].mxu1 %vm425_vm8, %v5897_v1 }
 0x14c   : > { %v5890_v60 = vpop.f32.mrb[12].mxu0 }
 0x14d   : > { %2093 = vrot.lane.b32.xlu1 %v5890_v60, %s5171_s10  ;;  %v4726_v62 = vpop.f32.mrb[13].mxu0 }
 0x14e   : > { %v2090_v63 = vpop.f32.mrb[14].mxu0 }
 0x14f   : > { %v4727_v5 = vpop.f32.mrb[15].mxu0 }
 0x162   : > { %v5923_v6 = vpop.f32.mrb[16].mxu0 }
 0x163   : > { %2559 = vrot.lane.b32.xlu0 %v5923_v6, %s5171_s10  ;;  %v4750_v4 = vpop.f32.mrb[17].mxu0 }
 0x164   : > { %v2556_v8 = vpop.f32.mrb[18].mxu0 }
 0x165   : > { %v4751_v13 = vpop.f32.mrb[19].mxu0 }
 0x179   : > { %v5951_v15 = vpop.f32.mrb[20].mxu0 }
 0x17a   : > { %3025 = vrot.lane.b32.xlu1 %v5951_v15, %s5171_s10  ;;  %v4774_v17 = vpop.f32.mrb[21].mxu0 }
 0x17b   : > { %v3022_v24 = vpop.f32.mrb[22].mxu0  ;;  %v694_v49 = vpop.permute.xlu0 %693 }
 0x17c   : > { %v4775_v30 = vpop.f32.mrb[23].mxu0  ;;  %v695_v25 = vsel %vm692_vm9, %v694_v49, %v5838_v61 }
 0x191   : > { %v5979_v37 = vpop.f32.mrb[24].mxu0  ;;  %v1162_v3 = vpop.permute.xlu0 %1161 }
 0x192   : > { %3491 = vrot.lane.b32.xlu0 %v5979_v37, %s5171_s10  ;;  %v4798_v57 = vpop.f32.mrb[25].mxu0  ;;  %v1163_v16 = vsel %vm692_vm9, %v1162_v3, %v5871_v7 }
 0x193   : > { %v3488_v9 = vpop.f32.mrb[26].mxu0 }
 0x194   : > { %v4799_v2 = vpop.f32.mrb[27].mxu0 }
 0x196   : > { %696 = vrot.lane.b32.xlu0 %v695_v25, %s5171_s10 }
 0x198   : > { %v463_v27 = vpop.f32.mrb[0].mxu1 }
 0x199   : > { %v4636_v28 = vpop.f32.mrb[1].mxu1 }
 0x19a   : > { %v466_v29 = vpop.f32.mrb[2].mxu1 }
 0x19b   : > { %v4637_v31 = vpop.f32.mrb[3].mxu1 }
 0x1a0   : > { %v600_v33 = vpop.f32.mrb[4].mxu1 }
 0x1a1   : > { %v6018_v34 = vadd.f32 %v600_v33, %v463_v27  ;;  %v4642_v35 = vpop.f32.mrb[5].mxu1 }
 0x1a2   : > { %v603_v40 = vpop.f32.mrb[6].mxu1 }
 0x1a3   : > { %v4643_v42 = vpop.f32.mrb[7].mxu1 }
 0x1a5   : > { %v5999_v38 = vpop.f32.mrb[28].mxu0 }
 0x1a6   : > { %3957 = vrot.lane.b32.xlu1 %v5999_v38, %s5171_s10  ;;  %v4822_v10 = vpop.f32.mrb[29].mxu0 }
 0x1a7   : > { %v3954_v11 = vpop.f32.mrb[30].mxu0 }
 0x1a8   : > { %v1628_v12 = vpop.permute.xlu1 %1627  ;;  %v4823_v14 = vpop.f32.mrb[31].mxu0 }
 0x1a9   : > { %v1629_v18 = vsel %vm692_vm9, %v1628_v12, %v5875_v54  ;;  %v941_v44 = vpop.f32.mrb[8].mxu1 }
 0x1aa   : > { %1164 = vrot.lane.b32.xlu1 %v1163_v16, %s5171_s10  ;;  %v4660_v45 = vpop.f32.mrb[9].mxu1 }
 0x1ab   : > { %v944_v46 = vpop.f32.mrb[10].mxu1 }
 0x1ac   : > { %v4661_v47 = vpop.f32.mrb[11].mxu1 }
 0x1ae   : > { %1630 = vrot.lane.b32.xlu1 %v1629_v18, %s5171_s10 }
 0x1b0   : > { %v1075_v48 = vpop.f32.mrb[12].mxu1 }
 0x1b1   : > { %v6026_v50 = vadd.f32 %v1075_v48, %v941_v44  ;;  %v4666_v39 = vpop.f32.mrb[13].mxu1 }
 0x1b2   : > { %v1078_v51 = vpop.f32.mrb[14].mxu1 }
 0x1b3   : > { %v4667_v52 = vpop.f32.mrb[15].mxu1 }
 0x1b4   : > { %v5173_v52 = vmov 1966171168  }
 0x1bf   : > { %v2094_v19 = vpop.permute.xlu1 %2093 }
 0x1c0   : > { %v2095_v20 = vsel %vm692_vm9, %v2094_v19, %v5890_v60 }
 0x1c1   : > { %2096 = vrot.lane.b32.xlu1 %v2095_v20, %s5171_s10 }
 0x1d5   : > { %v2560_v21 = vpop.permute.xlu0 %2559 }
 0x1d6   : > { %v2561_v22 = vsel %vm692_vm9, %v2560_v21, %v5923_v6 }
 0x1d7   : > { %2562 = vrot.lane.b32.xlu1 %v2561_v22, %s5171_s10 }
 0x1ec   : > { %v3026_v23 = vpop.permute.xlu1 %3025 }
 0x1ed   : > { %v3027_v26 = vsel %vm692_vm9, %v3026_v23, %v5951_v15 }
 0x1ee   : > { %3028 = vrot.lane.b32.xlu1 %v3027_v26, %s5171_s10 }
 0x204   : > { %v3492_v32 = vpop.permute.xlu0 %3491 }
 0x205   : > { %v3493_v43 = vsel %vm692_vm9, %v3492_v32, %v5979_v37 }
 0x208   : > { %v697_v36 = vpop.permute.xlu0 %696 }
 0x209   : > { %v698_v41 = vsel %vm692_vm9, %v697_v36, %v5838_v61  ;;  %v1407_v61 = vpop.f32.mrb[16].mxu1 }
 0x20a   : > { %700 = vrot.lane.b32.xlu1 %v698_v41, %s5172_s22  ;;  %v4684_v53 = vpop.f32.mrb[17].mxu1 }
 0x20b   : > { %v1410_v56 = vpop.f32.mrb[18].mxu1  ;;  %v709_v53 = vlaneseq }
 0x20c   : > { %v4685_v59 = vpop.f32.mrb[19].mxu1 }
 0x20d   : > { %v1541_v62 = vpop.f32.mrb[20].mxu1 }
 0x20e   : > { %3494 = vrot.lane.b32.xlu1 %v3493_v43, %s5171_s10  ;;  %v6031_v63 = vadd.f32 %v1541_v62, %v1407_v61  ;;  %v4690_v5 = vpop.f32.mrb[21].mxu1  ;;  %v707_v61 = vunpack.c.l.s4 %v5173_v52 }
 0x20f   : > { %v1544_v4 = vpop.f32.mrb[22].mxu1 }
 0x210   : > { %v4691_v13 = vpop.f32.mrb[23].mxu1 }
 0x211   : > { %v1873_v30 = vpop.f32.mrb[24].mxu1 }
 0x212   : > { %v4708_v49 = vpop.f32.mrb[25].mxu1 }
 0x213   : > { %v1876_v9 = vpop.f32.mrb[26].mxu1 }
 0x214   : > { %v4709_v25 = vpop.f32.mrb[27].mxu1 }
 0x215   : > { %v2007_v3 = vpop.f32.mrb[28].mxu1 }
 0x216   : > { %v6044_v11 = vadd.f32 %v2007_v3, %v1873_v30 }
 0x218   : > { %v3958_v55 = vpop.permute.xlu1 %3957 }
 0x219   : > { %v3959_v58 = vsel %vm692_vm9, %v3958_v55, %v5999_v38  ;;  %v708_v55 = vunpack.c.0.s8 %v707_v61 }
 0x21a   : > { %3960 = vrot.lane.b32.xlu1 %v3959_v58, %s5171_s10 }
 0x21c   : > { %v1165_v1 = vpop.permute.xlu1 %1164 }
 0x21d   : > { %v1166_v8 = vsel %vm692_vm9, %v1165_v1, %v5871_v7 }
 0x21e   : > { %1168 = vrot.lane.b32.xlu0 %v1166_v8, %s5172_s22 }
 0x220   : > { %v1631_v17 = vpop.permute.xlu1 %1630 }
 0x221   : > { %v1632_v24 = vsel %vm692_vm9, %v1631_v17, %v5875_v54  ;;  %v4714_v54 = vpop.f32.mrb[29].mxu1 }
 0x222   : > { %1634 = vrot.lane.b32.xlu1 %v1632_v24, %s5172_s22  ;;  %v2010_v12 = vpop.f32.mrb[30].mxu1 }
 0x223   : > { %v4715_v14 = vpop.f32.mrb[31].mxu1 }
 0x224   : > { %v2339_v16 = vpop.f32.mrb[32].mxu1 }
 0x225   : > { %v4732_v18 = vpop.f32.mrb[33].mxu1 }
 0x226   : > { %v2342_v19 = vpop.f32.mrb[34].mxu1 }
 0x227   : > { %v4733_v20 = vpop.f32.mrb[35].mxu1 }
 0x233   : > { %v2097_v57 = vpop.permute.xlu1 %2096 }
 0x234   : > { %v2098_v2 = vsel %vm692_vm9, %v2097_v57, %v5890_v60  ;;  %v2473_v60 = vpop.f32.mrb[36].mxu1 }
 0x235   : > { %2100 = vrot.lane.b32.xlu1 %v2098_v2, %s5172_s22  ;;  %v6047_v21 = vadd.f32 %v2473_v60, %v2339_v16  ;;  %v4738_v22 = vpop.f32.mrb[37].mxu1 }
 0x236   : > { %v2476_v23 = vpop.f32.mrb[38].mxu1 }
 0x237   : > { %v4739_v26 = vpop.f32.mrb[39].mxu1 }
 0x238   : > { %v2805_v27 = vpop.f32.mrb[40].mxu1 }
 0x239   : > { %v4756_v28 = vpop.f32.mrb[41].mxu1 }
 0x249   : > { %v2563_v7 = vpop.permute.xlu1 %2562 }
 0x24a   : > { %v2564_v10 = vsel %vm692_vm9, %v2563_v7, %v5923_v6  ;;  %v2808_v6 = vpop.f32.mrb[42].mxu1 }
 0x24b   : > { %2566 = vrot.lane.b32.xlu0 %v2564_v10, %s5172_s22  ;;  %v4757_v29 = vpop.f32.mrb[43].mxu1 }
 0x24c   : > { %v2939_v31 = vpop.f32.mrb[44].mxu1 }
 0x24d   : > { %v6049_v33 = vadd.f32 %v2939_v31, %v2805_v27  ;;  %v4762_v35 = vpop.f32.mrb[45].mxu1 }
 0x24e   : > { %v2942_v40 = vpop.f32.mrb[46].mxu1 }
 0x24f   : > { %v4763_v41 = vpop.f32.mrb[47].mxu1 }
 0x250   : > { %v3271_v42 = vpop.f32.mrb[48].mxu1 }
 0x251   : > { %v4780_v43 = vpop.f32.mrb[49].mxu1 }
 0x252   : > { %v3274_v44 = vpop.f32.mrb[50].mxu1 }
 0x253   : > { %v4781_v45 = vpop.f32.mrb[51].mxu1 }
 0x254   : > { %v3405_v46 = vpop.f32.mrb[52].mxu1 }
 0x255   : > { %v6054_v47 = vadd.f32 %v3405_v46, %v3271_v42  ;;  %v4786_v48 = vpop.f32.mrb[53].mxu1 }
 0x256   : > { %v3408_v39 = vpop.f32.mrb[54].mxu1 }
 0x257   : > { %v4787_v51 = vpop.f32.mrb[55].mxu1 }
 0x258   : > { %v3737_v3 = vpop.f32.mrb[56].mxu1 }
 0x259   : > { %v4804_v10 = vpop.f32.mrb[57].mxu1 }
 0x25a   : > { %v3740_v12 = vpop.f32.mrb[58].mxu1 }
 0x25b   : > { %v4805_v14 = vpop.f32.mrb[59].mxu1 }
 0x25c   : > { %v3871_v16 = vpop.f32.mrb[60].mxu1 }
 0x25d   : > { %v6091_v19 = vadd.f32 %v3871_v16, %v3737_v3  ;;  %v4810_v20 = vpop.f32.mrb[61].mxu1 }
 0x25e   : > { %v3874_v60 = vpop.f32.mrb[62].mxu1 }
 0x25f   : > { %v4811_v22 = vpop.f32.mrb[63].mxu1 }
 0x260   : > { %v3029_v32 = vpop.permute.xlu1 %3028 }
 0x261   : > { %v3030_v36 = vsel %vm692_vm9, %v3029_v32, %v5951_v15  ;;  %v710_v15 = vshrl.u32 %v709_v53, 7 }
 0x262   : > { %3032 = vrot.lane.b32.xlu1 %v3030_v36, %s5172_s22 }
 0x263   : > { %v6056_v56 = vsub.s32 %v708_v55, %v710_v15 }
 0x27c   : > { %v701_v58 = vpop.permute.xlu1 %700 }
 0x27d   : > { %v703_v59 = vadd.f32 %v701_v58, %v6018_v34 }
 0x27f   : > { %v705_v62 = vcombine.high %v703_v59, %v703_v59  ;;  %v712_v5 = vrot.slane %v703_v59, %v6056_v56  ;;  %v772_v1 = vsel %vm771_vm10, %v703_v59, 0.0  ;;  %v776_v4 = vmul.f32 %v703_v59, %v703_v59 }
 0x280   : > { %773 = vadd.xlane.f32.xlu0 %v772_v1  ;;  %v3495_v54 = vpop.permute.xlu1 %3494 }
 0x281   : > { %v719_v8 = vrot.slane %v705_v62, %v6056_v56  ;;  %v720_v34 = vcombine.high %v712_v5, %v712_v5  ;;  %v728_v13 = vrot.slane %v712_v5, %v6056_v56  ;;  %v777_v17 = vsel %vm771_vm10, %v776_v4, 0.0 }
 0x282   : > { %v3496_v18 = vsel %vm692_vm9, %v3495_v54, %v5979_v37 }
 0x283   : > { %v721_v24 = vcombine.high %v719_v8, %v719_v8  ;;  %v735_v30 = vrot.slane %v719_v8, %v6056_v56  ;;  %v742_v49 = vrot.slane %v720_v34, %v6056_v56  ;;  %v750_v57 = vcombine.high %v728_v13, %v728_v13  ;;  %763 = vst.msk [vmem:[%s6065_s25] sm:$0x1] %vm762_vm11, %v728_v13 }
 0x285   : > { %v749_v9 = vrot.slane %v721_v24, %v6056_v56  ;;  %v751_v2 = vcombine.high %v735_v30, %v735_v30  ;;  %v752_v25 = vcombine.high %v742_v49, %v742_v49  ;;  %764 = vst.msk [vmem:[%s6065_s25 + $0x8] sm:$0x1] %vm762_vm11, %v742_v49  ;;  %765 = vst.msk [vmem:[%s6065_s25 + $0x10] sm:$0x1] %vm762_vm11, %v750_v57 }
 0x286   : > { %778 = vadd.xlane.f32.xlu1 %v777_v17  ;;  %767 = vst.msk [vmem:[%s6065_s25 + $0x20] sm:$0x1] %vm762_vm11, %v735_v30 }
 0x287   : > { %v753_v7 = vcombine.high %v749_v9, %v749_v9  ;;  %766 = vst.msk [vmem:[%s6065_s25 + $0x18] sm:$0x1] %vm762_vm11, %v752_v25  ;;  %768 = vst.msk [vmem:[%s6065_s25 + $0x28] sm:$0x1] %vm762_vm11, %v749_v9 }
 0x288   : > { %769 = vst.msk [vmem:[%s6065_s25 + $0x30] sm:$0x1] %vm762_vm11, %v751_v2 }
 0x289   : > { %770 = vst.msk [vmem:[%s6065_s25 + $0x38] sm:$0x1] %vm762_vm11, %v753_v7 }
 0x28c   : > { %v3961_v23 = vpop.permute.xlu1 %3960 }
 0x28d   : > { %v3962_v26 = vsel %vm692_vm9, %v3961_v23, %v5999_v38 }
 0x290   : > { %v1169_v27 = vpop.permute.xlu0 %1168 }
 0x291   : > { %v6098_v28 = vadd.f32 %v1169_v27, %v6026_v50 }
 0x293   : > { %v1173_v37 = vcombine.high %v6098_v28, %v6098_v28  ;;  %v1180_v6 = vrot.slane %v6098_v28, %v6056_v56  ;;  %v1238_v29 = vsel %vm771_vm10, %v6098_v28, 0.0 }
 0x294   : > { %1239 = vadd.xlane.f32.xlu0 %v1238_v29  ;;  %v1635_v31 = vpop.permute.xlu1 %1634 }
 0x295   : > { %v1187_v38 = vrot.slane %v1173_v37, %v6056_v56  ;;  %v1188_v32 = vcombine.high %v1180_v6, %v1180_v6  ;;  %v1196_v35 = vrot.slane %v1180_v6, %v6056_v56  ;;  %v6109_v50 = vadd.f32 %v1635_v31, %v6031_v63 }
 0x297   : > { %3498 = vrot.lane.b32.xlu1 %v3496_v18, %s5172_s22  ;;  %v1189_v36 = vcombine.high %v1187_v38, %v1187_v38  ;;  %v1203_v40 = vrot.slane %v1187_v38, %v6056_v56  ;;  %v1210_v41 = vrot.slane %v1188_v32, %v6056_v56  ;;  %v1218_v42 = vcombine.high %v1196_v35, %v1196_v35 }
 0x298   : > { %1230 = vst.msk [vmem:[%s6065_s25 + $0x1] sm:$0x1] %vm762_vm11, %v1196_v35  ;;  %v1639_v43 = vcombine.high %v6109_v50, %v6109_v50  ;;  %v1646_v44 = vrot.slane %v6109_v50, %v6056_v56  ;;  %v1704_v63 = vsel %vm771_vm10, %v6109_v50, 0.0  ;;  %v1242_v38 = vmul.f32 %v6098_v28, %v6098_v28 }
 0x299   : > { %v1217_v46 = vrot.slane %v1189_v36, %v6056_v56  ;;  %v1219_v48 = vcombine.high %v1203_v40, %v1203_v40  ;;  %v1220_v39 = vcombine.high %v1210_v41, %v1210_v41  ;;  %1231 = vst.msk [vmem:[%s6065_s25 + $0x9] sm:$0x1] %vm762_vm11, %v1210_v41  ;;  %1232 = vst.msk [vmem:[%s6065_s25 + $0x11] sm:$0x1] %vm762_vm11, %v1218_v42  ;;  %1705 = vadd.xlane.f32.xlu0 %v1704_v63 }
 0x29a   : > { %1234 = vst.msk [vmem:[%s6065_s25 + $0x21] sm:$0x1] %vm762_vm11, %v1203_v40  ;;  %v1653_v52 = vrot.slane %v1639_v43, %v6056_v56  ;;  %v1654_v61 = vcombine.high %v1646_v44, %v1646_v44  ;;  %v1662_v53 = vrot.slane %v1646_v44, %v6056_v56  ;;  %v1243_v32 = vsel %vm771_vm10, %v1242_v38, 0.0 }
 0x29b   : > { %3964 = vrot.lane.b32.xlu1 %v3962_v26, %s5172_s22  ;;  %v1221_v55 = vcombine.high %v1217_v46, %v1217_v46  ;;  %1233 = vst.msk [vmem:[%s6065_s25 + $0x19] sm:$0x1] %vm762_vm11, %v1220_v39  ;;  %1235 = vst.msk [vmem:[%s6065_s25 + $0x29] sm:$0x1] %vm762_vm11, %v1217_v46  ;;  %v1708_v35 = vmul.f32 %v6109_v50, %v6109_v50 }
 0x29c   : > { %1236 = vst.msk [vmem:[%s6065_s25 + $0x31] sm:$0x1] %vm762_vm11, %v1219_v48  ;;  %v1655_v59 = vcombine.high %v1653_v52, %v1653_v52  ;;  %v1669_v62 = vrot.slane %v1653_v52, %v6056_v56  ;;  %v1676_v5 = vrot.slane %v1654_v61, %v6056_v56  ;;  %v1684_v1 = vcombine.high %v1662_v53, %v1662_v53 }
 0x29d   : > { %1696 = vst.msk [vmem:[%s6065_s25 + $0x2] sm:$0x1] %vm762_vm11, %v1662_v53  ;;  %1237 = vst.msk [vmem:[%s6065_s25 + $0x39] sm:$0x1] %vm762_vm11, %v1221_v55  ;;  %v1709_v36 = vsel %vm771_vm10, %v1708_v35, 0.0 }
 0x29e   : > { %v1683_v13 = vrot.slane %v1655_v59, %v6056_v56  ;;  %v1685_v17 = vcombine.high %v1669_v62, %v1669_v62  ;;  %v1686_v24 = vcombine.high %v1676_v5, %v1676_v5  ;;  %1697 = vst.msk [vmem:[%s6065_s25 + $0xa] sm:$0x1] %vm762_vm11, %v1676_v5  ;;  %1698 = vst.msk [vmem:[%s6065_s25 + $0x12] sm:$0x1] %vm762_vm11, %v1684_v1 }
 0x29f   : > { %1700 = vst.msk [vmem:[%s6065_s25 + $0x22] sm:$0x1] %vm762_vm11, %v1669_v62 }
 0x2a0   : > { %v1687_v25 = vcombine.high %v1683_v13, %v1683_v13  ;;  %1699 = vst.msk [vmem:[%s6065_s25 + $0x1a] sm:$0x1] %vm762_vm11, %v1686_v24  ;;  %1701 = vst.msk [vmem:[%s6065_s25 + $0x2a] sm:$0x1] %vm762_vm11, %v1683_v13 }
 0x2a1   : > { %1702 = vst.msk [vmem:[%s6065_s25 + $0x32] sm:$0x1] %vm762_vm11, %v1685_v17 }
 0x2a2   : > { %1703 = vst.msk [vmem:[%s6065_s25 + $0x3a] sm:$0x1] %vm762_vm11, %v1687_v25 }
 0x2a7   : > { %v2101_v45 = vpop.permute.xlu1 %2100 }
 0x2a8   : > { %v6129_v51 = vadd.f32 %v2101_v45, %v6044_v11 }
 0x2aa   : > { %v2105_v15 = vcombine.high %v6129_v51, %v6129_v51  ;;  %v2112_v11 = vrot.slane %v6129_v51, %v6056_v56  ;;  %v2170_v58 = vsel %vm771_vm10, %v6129_v51, 0.0  ;;  %v2174_v40 = vmul.f32 %v6129_v51, %v6129_v51 }
 0x2ab   : > { %2171 = vadd.xlane.f32.xlu0 %v2170_v58 }
 0x2ac   : > { %v2119_v4 = vrot.slane %v2105_v15, %v6056_v56  ;;  %v2120_v8 = vcombine.high %v2112_v11, %v2112_v11  ;;  %v2128_v34 = vrot.slane %v2112_v11, %v6056_v56  ;;  %v2175_v41 = vsel %vm771_vm10, %v2174_v40, 0.0 }
 0x2ae   : > { %v2121_v49 = vcombine.high %v2119_v4, %v2119_v4  ;;  %v2135_v57 = vrot.slane %v2119_v4, %v6056_v56  ;;  %v2142_v9 = vrot.slane %v2120_v8, %v6056_v56  ;;  %v2150_v2 = vcombine.high %v2128_v34, %v2128_v34  ;;  %2162 = vst.msk [vmem:[%s6065_s25 + $0x3] sm:$0x1] %vm762_vm11, %v2128_v34 }
 0x2b0   : > { %v2149_v3 = vrot.slane %v2121_v49, %v6056_v56  ;;  %v2151_v10 = vcombine.high %v2135_v57, %v2135_v57  ;;  %v2152_v54 = vcombine.high %v2142_v9, %v2142_v9  ;;  %2163 = vst.msk [vmem:[%s6065_s25 + $0xb] sm:$0x1] %vm762_vm11, %v2142_v9  ;;  %2164 = vst.msk [vmem:[%s6065_s25 + $0x13] sm:$0x1] %vm762_vm11, %v2150_v2 }
 0x2b1   : > { %2166 = vst.msk [vmem:[%s6065_s25 + $0x23] sm:$0x1] %vm762_vm11, %v2135_v57 }
 0x2b2   : > { %2165 = vst.msk [vmem:[%s6065_s25 + $0x1b] sm:$0x1] %vm762_vm11, %v2152_v54  ;;  %2167 = vst.msk [vmem:[%s6065_s25 + $0x2b] sm:$0x1] %vm762_vm11, %v2149_v3 }
 0x2b3   : > { %2168 = vst.msk [vmem:[%s6065_s25 + $0x33] sm:$0x1] %vm762_vm11, %v2151_v10 }
 0x2bd   : > { %v2567_v30 = vpop.permute.xlu0 %2566 }
 0x2be   : > { %v2569_v7 = vadd.f32 %v2567_v30, %v6047_v21  ;;  %v2153_v21 = vcombine.high %v2149_v3, %v2149_v3 }
 0x2bf   : > { %1244 = vadd.xlane.f32.xlu1 %v1243_v32 }
 0x2c0   : > { %v2571_v12 = vcombine.high %v2569_v7, %v2569_v7  ;;  %v2578_v14 = vrot.slane %v2569_v7, %v6056_v56  ;;  %v2636_v16 = vsel %vm771_vm10, %v2569_v7, 0.0  ;;  %2169 = vst.msk [vmem:[%s6065_s25 + $0x3b] sm:$0x1] %vm762_vm11, %v2153_v21  ;;  %v2640_v42 = vmul.f32 %v2569_v7, %v2569_v7 }
 0x2c1   : > { %2637 = vadd.xlane.f32.xlu0 %v2636_v16 }
 0x2c2   : > { %v2585_v18 = vrot.slane %v2571_v12, %v6056_v56  ;;  %v2586_v20 = vcombine.high %v2578_v14, %v2578_v14  ;;  %v2594_v60 = vrot.slane %v2578_v14, %v6056_v56  ;;  %v2641_v43 = vsel %vm771_vm10, %v2640_v42, 0.0 }
 0x2c3   : > { %1710 = vadd.xlane.f32.xlu1 %v1709_v36 }
 0x2c4   : > { %v2587_v22 = vcombine.high %v2585_v18, %v2585_v18  ;;  %v2601_v23 = vrot.slane %v2585_v18, %v6056_v56  ;;  %v2608_v26 = vrot.slane %v2586_v20, %v6056_v56  ;;  %v2616_v27 = vcombine.high %v2594_v60, %v2594_v60  ;;  %2628 = vst.msk [vmem:[%s6065_s25 + $0x4] sm:$0x1] %vm762_vm11, %v2594_v60 }
 0x2c6   : > { %v2615_v37 = vrot.slane %v2587_v22, %v6056_v56  ;;  %v2617_v6 = vcombine.high %v2601_v23, %v2601_v23  ;;  %v2618_v29 = vcombine.high %v2608_v26, %v2608_v26  ;;  %2629 = vst.msk [vmem:[%s6065_s25 + $0xc] sm:$0x1] %vm762_vm11, %v2608_v26  ;;  %2630 = vst.msk [vmem:[%s6065_s25 + $0x14] sm:$0x1] %vm762_vm11, %v2616_v27 }
 0x2c7   : > { %2632 = vst.msk [vmem:[%s6065_s25 + $0x24] sm:$0x1] %vm762_vm11, %v2601_v23  ;;  %2176 = vadd.xlane.f32.xlu1 %v2175_v41 }
 0x2c8   : > { %v2619_v31 = vcombine.high %v2615_v37, %v2615_v37  ;;  %2631 = vst.msk [vmem:[%s6065_s25 + $0x1c] sm:$0x1] %vm762_vm11, %v2618_v29  ;;  %2633 = vst.msk [vmem:[%s6065_s25 + $0x2c] sm:$0x1] %vm762_vm11, %v2615_v37 }
 0x2c9   : > { %2634 = vst.msk [vmem:[%s6065_s25 + $0x34] sm:$0x1] %vm762_vm11, %v2617_v6 }
 0x2ca   : > { %2635 = vst.msk [vmem:[%s6065_s25 + $0x3c] sm:$0x1] %vm762_vm11, %v2619_v31 }
 0x2cb   : > { %2642 = vadd.xlane.f32.xlu1 %v2641_v43 }
 0x2d4   : > { %v3033_v28 = vpop.permute.xlu1 %3032 }
 0x2d5   : > { %v3035_v44 = vadd.f32 %v3033_v28, %v6049_v33 }
 0x2d7   : > { %v3037_v63 = vcombine.high %v3035_v44, %v3035_v44  ;;  %v3044_v50 = vrot.slane %v3035_v44, %v6056_v56  ;;  %v3102_v45 = vsel %vm771_vm10, %v3035_v44, 0.0  ;;  %v3106_v46 = vmul.f32 %v3035_v44, %v3035_v44 }
 0x2d8   : > { %3103 = vadd.xlane.f32.xlu0 %v3102_v45 }
 0x2d9   : > { %v3051_v48 = vrot.slane %v3037_v63, %v6056_v56  ;;  %v3052_v39 = vcombine.high %v3044_v50, %v3044_v50  ;;  %v3060_v51 = vrot.slane %v3044_v50, %v6056_v56  ;;  %v3107_v52 = vsel %vm771_vm10, %v3106_v46, 0.0 }
 0x2da   : > { %3108 = vadd.xlane.f32.xlu1 %v3107_v52 }
 0x2db   : > { %v3053_v33 = vcombine.high %v3051_v48, %v3051_v48  ;;  %v3067_v61 = vrot.slane %v3051_v48, %v6056_v56  ;;  %v3074_v53 = vrot.slane %v3052_v39, %v6056_v56  ;;  %v3082_v55 = vcombine.high %v3060_v51, %v3060_v51  ;;  %3094 = vst.msk [vmem:[%s6065_s25 + $0x5] sm:$0x1] %vm762_vm11, %v3060_v51 }
 0x2dd   : > { %v3081_v15 = vrot.slane %v3053_v33, %v6056_v56  ;;  %v3083_v11 = vcombine.high %v3067_v61, %v3067_v61  ;;  %v3084_v58 = vcombine.high %v3074_v53, %v3074_v53  ;;  %3095 = vst.msk [vmem:[%s6065_s25 + $0xd] sm:$0x1] %vm762_vm11, %v3074_v53  ;;  %3096 = vst.msk [vmem:[%s6065_s25 + $0x15] sm:$0x1] %vm762_vm11, %v3082_v55 }
 0x2de   : > { %3098 = vst.msk [vmem:[%s6065_s25 + $0x25] sm:$0x1] %vm762_vm11, %v3067_v61 }
 0x2df   : > { %v3085_v59 = vcombine.high %v3081_v15, %v3081_v15  ;;  %3097 = vst.msk [vmem:[%s6065_s25 + $0x1d] sm:$0x1] %vm762_vm11, %v3084_v58  ;;  %3099 = vst.msk [vmem:[%s6065_s25 + $0x2d] sm:$0x1] %vm762_vm11, %v3081_v15 }
 0x2e0   : > { %3100 = vst.msk [vmem:[%s6065_s25 + $0x35] sm:$0x1] %vm762_vm11, %v3083_v11 }
 0x2e1   : > { %3101 = vst.msk [vmem:[%s6065_s25 + $0x3d] sm:$0x1] %vm762_vm11, %v3085_v59 }
 0x30d   : > { %v774_v32 = vpop.xlane.xlu0 %773 }
 0x313   : > { %v6246_v62 = vpop.xlane.xlu1 %778 }
 0x317   : > { %v3499_v5 = vpop.permute.xlu1 %3498 }
 0x318   : > { %v3501_v1 = vadd.f32 %v3499_v5, %v6054_v47 }
 0x31a   : > { %v3503_v4 = vcombine.high %v3501_v1, %v3501_v1  ;;  %v3510_v8 = vrot.slane %v3501_v1, %v6056_v56  ;;  %v3568_v34 = vsel %vm771_vm10, %v3501_v1, 0.0  ;;  %v3572_v13 = vmul.f32 %v3501_v1, %v3501_v1 }
 0x31b   : > { %v3965_v17 = vpop.permute.xlu1 %3964  ;;  %3569 = vadd.xlane.f32.xlu0 %v3568_v34 }
 0x31c   : > { %v3517_v24 = vrot.slane %v3503_v4, %v6056_v56  ;;  %v3518_v30 = vcombine.high %v3510_v8, %v3510_v8  ;;  %v3526_v49 = vrot.slane %v3510_v8, %v6056_v56  ;;  %v3967_v57 = vadd.f32 %v3965_v17, %v6091_v19 }
 0x31d   : > { %v3573_v47 = vsel %vm771_vm10, %v3572_v13, 0.0  ;;  %v4043_v13 = vld [vmem:[%s6302_s28] sm:$0x1] }
 0x31e   : > { %v3519_v9 = vcombine.high %v3517_v24, %v3517_v24  ;;  %v3533_v2 = vrot.slane %v3517_v24, %v6056_v56  ;;  %v3540_v25 = vrot.slane %v3518_v30, %v6056_v56  ;;  %v3548_v7 = vcombine.high %v3526_v49, %v3526_v49  ;;  %3560 = vst.msk [vmem:[%s6065_s25 + $0x6] sm:$0x1] %vm762_vm11, %v3526_v49  ;;  %v4044_v49 = vld [vmem:[%s6302_s28 + $0x1] sm:$0x1] }
 0x31f   : > { %3574 = vadd.xlane.f32.xlu1 %v3573_v47  ;;  %v3969_v3 = vcombine.high %v3967_v57, %v3967_v57  ;;  %v3976_v10 = vrot.slane %v3967_v57, %v6056_v56  ;;  %v4034_v19 = vsel %vm771_vm10, %v3967_v57, 0.0  ;;  %v4038_v54 = vmul.f32 %v3967_v57, %v3967_v57  ;;  %v4045_v57 = vld [vmem:[%s6302_s28 + $0x2] sm:$0x1]  ;;  %v4047_v47 = vld [vmem:[%s6302_s28 + $0x4] sm:$0x1] }
 0x320   : > { %v3547_v12 = vrot.slane %v3519_v9, %v6056_v56  ;;  %v3549_v14 = vcombine.high %v3533_v2, %v3533_v2  ;;  %v3550_v16 = vcombine.high %v3540_v25, %v3540_v25  ;;  %3561 = vst.msk [vmem:[%s6065_s25 + $0xe] sm:$0x1] %vm762_vm11, %v3540_v25  ;;  %3562 = vst.msk [vmem:[%s6065_s25 + $0x16] sm:$0x1] %vm762_vm11, %v3548_v7  ;;  %4035 = vadd.xlane.f32.xlu0 %v4034_v19  ;;  %v4049_v19 = vld [vmem:[%s6302_s28 + $0x6] sm:$0x1] }
 0x321   : > { %3564 = vst.msk [vmem:[%s6065_s25 + $0x26] sm:$0x1] %vm762_vm11, %v3533_v2  ;;  %v3983_v21 = vrot.slane %v3969_v3, %v6056_v56  ;;  %v3984_v18 = vcombine.high %v3976_v10, %v3976_v10  ;;  %v3992_v20 = vrot.slane %v3976_v10, %v6056_v56  ;;  %v4039_v60 = vsel %vm771_vm10, %v4038_v54, 0.0  ;;  %v1240_v36 = vpop.xlane.xlu0 %1239  ;;  %v4046_v3 = vld [vmem:[%s6302_s28 + $0x3] sm:$0x1] }
 0x322   : > { %v3551_v22 = vcombine.high %v3547_v12, %v3547_v12  ;;  %3563 = vst.msk [vmem:[%s6065_s25 + $0x1e] sm:$0x1] %vm762_vm11, %v3550_v16  ;;  %3565 = vst.msk [vmem:[%s6065_s25 + $0x2e] sm:$0x1] %vm762_vm11, %v3547_v12  ;;  %v1241_v63 = vadd.f32 %v1240_v36, %v774_v32  ;;  %v4048_v10 = vld [vmem:[%s6302_s28 + $0x5] sm:$0x1] }
 0x323   : > { %3566 = vst.msk [vmem:[%s6065_s25 + $0x36] sm:$0x1] %vm762_vm11, %v3549_v14  ;;  %4040 = vadd.xlane.f32.xlu1 %v4039_v60  ;;  %v3985_v23 = vcombine.high %v3983_v21, %v3983_v21  ;;  %v3999_v26 = vrot.slane %v3983_v21, %v6056_v56  ;;  %v4006_v27 = vrot.slane %v3984_v18, %v6056_v56  ;;  %4026 = vst.msk [vmem:[%s6065_s25 + $0x7] sm:$0x1] %vm762_vm11, %v3992_v20  ;;  %v4050_v18 = vld [vmem:[%s6302_s28 + $0x7] sm:$0x1] }
 0x324   : > { %v4014_v37 = vcombine.high %v3992_v20, %v3992_v20  ;;  %3567 = vst.msk [vmem:[%s6065_s25 + $0x3e] sm:$0x1] %vm762_vm11, %v3551_v22 }
 0x325   : > { %v4013_v6 = vrot.slane %v3985_v23, %v6056_v56  ;;  %v4015_v29 = vcombine.high %v3999_v26, %v3999_v26  ;;  %v4016_v31 = vcombine.high %v4006_v27, %v4006_v27  ;;  %4027 = vst.msk [vmem:[%s6065_s25 + $0xf] sm:$0x1] %vm762_vm11, %v4006_v27  ;;  %4030 = vst.msk [vmem:[%s6065_s25 + $0x27] sm:$0x1] %vm762_vm11, %v3999_v26 }
 0x326   : > { %4028 = vst.msk [vmem:[%s6065_s25 + $0x17] sm:$0x1] %vm762_vm11, %v4014_v37  ;;  %v1706_v41 = vpop.xlane.xlu0 %1705 }
 0x327   : > { %v4017_v38 = vcombine.high %v4013_v6, %v4013_v6  ;;  %4029 = vst.msk [vmem:[%s6065_s25 + $0x1f] sm:$0x1] %vm762_vm11, %v4016_v31  ;;  %4031 = vst.msk [vmem:[%s6065_s25 + $0x2f] sm:$0x1] %vm762_vm11, %v4013_v6  ;;  %v1707_v46 = vadd.f32 %v1706_v41, %v1241_v63 }
 0x328   : > { %4032 = vst.msk [vmem:[%s6065_s25 + $0x37] sm:$0x1] %vm762_vm11, %v4015_v29 }
 0x329   : > { %4033 = vst.msk [vmem:[%s6065_s25 + $0x3f] sm:$0x1] %vm762_vm11, %v4017_v38 }
 0x338   : > { %v2172_v42 = vpop.xlane.xlu0 %2171 }
 0x339   : > { %v2173_v51 = vadd.f32 %v2172_v42, %v1707_v46 }
 0x34c   : > { %v1245_v35 = vpop.xlane.xlu1 %1244 }
 0x34d   : > { %v1246_v50 = vadd.f32 %v1245_v35, %v6246_v62 }
 0x34e   : > { %v2638_v28 = vpop.xlane.xlu0 %2637 }
 0x34f   : > { %v2639_v0 = vadd.f32 %v2638_v28, %v2173_v51 }
 0x350   : > { %v1711_v40 = vpop.xlane.xlu1 %1710 }
 0x351   : > { %v1712_v48 = vadd.f32 %v1711_v40, %v1246_v50 }
 0x354   : > { %v2177_v43 = vpop.xlane.xlu1 %2176 }
 0x355   : > { %v2178_v52 = vadd.f32 %v2177_v43, %v1712_v48 }
 0x358   : > { %v2643_v44 = vpop.xlane.xlu1 %2642 }
 0x359   : > { %v2644_v61 = vadd.f32 %v2643_v44, %v2178_v52 }
 0x365   : > { %v3104_v45 = vpop.xlane.xlu0 %3103 }
 0x366   : > { %v3105_v55 = vadd.f32 %v3104_v45, %v2639_v0 }
 0x367   : > { %v3109_v39 = vpop.xlane.xlu1 %3108 }
 0x368   : > { %v3110_v15 = vadd.f32 %v3109_v39, %v2644_v61 }
 0x3a8   : > { %v3570_v33 = vpop.xlane.xlu0 %3569 }
 0x3a9   : > { %v3571_v58 = vadd.f32 %v3570_v33, %v3105_v55 }
 0x3ac   : > { %v3575_v53 = vpop.xlane.xlu1 %3574 }
 0x3ad   : > { %v4036_v11 = vpop.xlane.xlu0 %4035  ;;  %v3576_v59 = vadd.f32 %v3575_v53, %v3110_v15 }
 0x3ae   : > { %v4037_v5 = vadd.f32 %v4036_v11, %v3571_v58 }
 0x3b0   : > { %v4041_v62 = vpop.xlane.xlu1 %4040 }
 0x3b1   : > { %v4042_v1 = vadd.f32 %v4041_v62, %v3576_v59 }
 0x3b3   : > { %v4052_v4 = vsel %vm4051_vm13, %v4037_v5, %v4042_v1 }
 0x3b4   : > { %v4054_v8 = vcombine.high %v4052_v4, %v4052_v4  ;;  %v4061_v34 = vrot.slane %v4052_v4, %v6056_v56 }
 0x3b6   : > { %v4068_v17 = vrot.slane %v4054_v8, %v6056_v56  ;;  %v4069_v24 = vcombine.high %v4061_v34, %v4061_v34  ;;  %v4077_v30 = vrot.slane %v4061_v34, %v6056_v56 }
 0x3b8   : > { %v4070_v9 = vcombine.high %v4068_v17, %v4068_v17  ;;  %v4084_v2 = vrot.slane %v4068_v17, %v6056_v56  ;;  %v4091_v25 = vrot.slane %v4069_v24, %v6056_v56  ;;  %v4099_v7 = vcombine.high %v4077_v30, %v4077_v30 }
 0x3b9   : > { %v4111_v54 = vadd.f32 %v4077_v30, %v4043_v13 }
 0x3ba   : > { %v4098_v12 = vrot.slane %v4070_v9, %v6056_v56  ;;  %v4100_v14 = vcombine.high %v4084_v2, %v4084_v2  ;;  %v4101_v16 = vcombine.high %v4091_v25, %v4091_v25  ;;  %v4112_v21 = vadd.f32 %v4091_v25, %v4044_v49 }
 0x3bb   : > { %v4113_v20 = vadd.f32 %v4099_v7, %v4045_v57  ;;  %v4115_v60 = vadd.f32 %v4084_v2, %v4047_v47  ;;  %4120 = vst.msk [vmem:[%s6302_s28] sm:$0x1] %vm276_vm12, %v4111_v54 }
 0x3bc   : > { %v4102_v22 = vcombine.high %v4098_v12, %v4098_v12  ;;  %v4114_v23 = vadd.f32 %v4101_v16, %v4046_v3  ;;  %v4116_v26 = vadd.f32 %v4098_v12, %v4048_v10  ;;  %v4117_v27 = vadd.f32 %v4100_v14, %v4049_v19  ;;  %4121 = vst.msk [vmem:[%s6302_s28 + $0x1] sm:$0x1] %vm276_vm12, %v4112_v21 }
 0x3bd   : > { %4122 = vst.msk [vmem:[%s6302_s28 + $0x2] sm:$0x1] %vm276_vm12, %v4113_v20  ;;  %4124 = vst.msk [vmem:[%s6302_s28 + $0x4] sm:$0x1] %vm276_vm12, %v4115_v60 }
 0x3be   : > { %v4118_v56 = vadd.f32 %v4102_v22, %v4050_v18  ;;  %4123 = vst.msk [vmem:[%s6302_s28 + $0x3] sm:$0x1] %vm276_vm12, %v4114_v23  ;;  %4125 = vst.msk [vmem:[%s6302_s28 + $0x5] sm:$0x1] %vm276_vm12, %v4116_v26 }
 0x3bf   : > { %4126 = vst.msk [vmem:[%s6302_s28 + $0x6] sm:$0x1] %vm276_vm12, %v4117_v27 }
 0x3c0   : > { %4127 = vst.msk [vmem:[%s6302_s28 + $0x7] sm:$0x1] %vm276_vm12, %v4118_v56 }
 0x3c1 PF: > { %s15_s17 = sadd.s32 1, %s5167_s17   ;;  %s6373_s15 = smov %s5163_s16 }
 0x3c2   : > { %p12_p5 = scmp.ge.s32.totalorder %s15_s17, 4   ;;  %s6374_s16 = smov %s6376_s18 }
 0x3c4   :  { %14 = sbr.rel (!%p12_p5) target bundleno = 2 (0x2), region = 84 }

</bundles_post_ra>
